<compile_context>
chip_gen: v6e
topology: v6e:2x2x1
jax: 0.10.0
libtpu: 0.0.40
codegen_flags: <defaults>
</compile_context>

<pallas_src>
import math

import jax
import jax.numpy as jnp
import numpy as np
from jax.experimental import pallas as pl
from jax.experimental.pallas import tpu as pltpu


def _round_up(x, m):
    return (x + m - 1) // m * m


def _bf16_valu_supported():
    """bf16 element-wise VPU work is only profitable/available on v6e / v7x."""
    try:
        kind = jax.devices()[0].device_kind.lower()
    except Exception:
        return False
    return ("v6" in kind) or ("v7" in kind) or ("7x" in kind)


# ----------------------------------------------------------------------------
# Pallas kernel: fused pairwise relation MLP (pair-packed).
#   inputs per grid step:
#     hq : (TQ, 256)      query half of layer 1 (precomputed, compute dtype)
#     hs : (N_pad, 256)   support half of layer 1 + b1 (grid-invariant)
#     W2 : (256, 128) bf16, b2/w3 : (1, 128) f32 (grid-invariant)
#   output per grid step: (8, M_tile//8) f32 slab of pair scores (b3 added later)
# ----------------------------------------------------------------------------
def relation_kernel(hq_ref, hs_ref, w2_ref, b2_ref, w3_ref, out_ref):
    # Pairwise combine + ReLU on the VPU (bf16 on v6e/v7x, f32 on v5e), then
    # flatten the (query, support) pairs into the matmul M dimension.
    h1 = jnp.maximum(hq_ref[...][:, None, :] + hs_ref[...][None, :, :], 0.0)
    tq, npad, hdim = h1.shape
    h1 = h1.reshape(tq * npad, hdim)                       # (M_tile, 256)

    # Layer 2 on the packed pair matrix (bf16 MXU inputs, f32 accumulation).
    h2 = jnp.maximum(
        jnp.dot(h1.astype(jnp.bfloat16), w2_ref[...],
                preferred_element_type=jnp.float32) + b2_ref[...],
        0.0)                                               # (M_tile, 128) f32

    # Layer 3: 128 -> 1 projection as a lane reduction (no lane-sparse MXU op);
    # the b3 scalar is folded in by the wrapper.
    sc = jnp.sum(h2 * w3_ref[...], axis=-1)                # (M_tile,)

    # Dense (8, M_tile//8) store: sublane dim 8, lane dim a multiple of 128.
    out_ref[...] = sc.reshape(out_ref.shape)


def relation_scores(support_feat, query_feat, w1, b1, w2, b2, w3, b3):
    """support_feat: (N, 512), query_feat: (B, 512) -> scores (B, N)."""
    N, D = support_feat.shape
    B = query_feat.shape[0]
    H1, H2 = w1.shape[0], w2.shape[0]                      # 256, 128

    use_bf16 = _bf16_valu_supported()
    compute_dtype = jnp.bfloat16 if use_bf16 else jnp.float32

    # PyTorch Linear stores weight as [out, in]; transpose for x @ W layout and
    # split the first layer along the concat axis (support | query).
    w1s = jnp.asarray(w1[:, :D].T, jnp.float32)            # (512, 256)
    w1q = jnp.asarray(w1[:, D:].T, jnp.bfloat16)           # (512, 256)
    w2t = jnp.asarray(w2.T, jnp.bfloat16)                  # (256, 128)
    b2r = jnp.asarray(b2.reshape(1, H2), jnp.float32)      # (1, 128)
    w3r = jnp.asarray(w3.reshape(1, H2), jnp.float32)      # (1, 128)

    # Layer-1 halves hoisted out of the kernel (full-MXU-utilization XLA matmuls):
    #   hs = support @ W1_s + b1    (query-independent, computed exactly once)
    #   hq = query   @ W1_q         (whole batch at once)
    hs = (jnp.dot(support_feat.astype(jnp.float32), w1s,
                  preferred_element_type=jnp.float32)
          + b1.reshape(1, H1).astype(jnp.float32))                      # (N, 256)
    hq = jnp.dot(query_feat.astype(jnp.bfloat16), w1q,
                 preferred_element_type=jnp.float32)                    # (B, 256)

    # Tiling. Each grid step packs TQ queries x N_pad supports into an
    # (M_tile, 256) pair matrix.  M_tile is a multiple of 1024 so:
    #   - the layer-2 MXU matmul has >= 1024 rows and per-step overhead amortizes,
    #   - the output can be stored as fully tile-aligned (8, M_tile//8) blocks.
    # N_pad is aligned to the compute dtype's sublane packing so the in-kernel
    # (TQ, N_pad, 256) -> (M_tile, 256) collapse stays tile-aligned.
    sub_pack = 16 if use_bf16 else 8
    N_pad = _round_up(N, sub_pack)
    u_mult = 1024 // math.gcd(N_pad, 1024)                 # queries per 1024-row unit
    unit_rows = u_mult * N_pad                             # multiple of 1024
    rows_target = 4096
    units_total = -(-B // u_mult)                          # ceil(B / u_mult)
    units_per_step = max(1, min(rows_target // unit_rows, units_total))
    if units_total >= 2:
        # keep at least 2 grid steps so v7x's two TensorCores both get work
        units_per_step = min(units_per_step, max(1, units_total // 2))
    TQ = units_per_step * u_mult
    B_pad = _round_up(B, TQ)
    G = B_pad // TQ
    M_tile = TQ * N_pad
    ROWS, COLS = 8, M_tile // 8                            # COLS % 128 == 0

    hs_p = jnp.zeros((N_pad, H1), compute_dtype).at[:N].set(hs.astype(compute_dtype))
    hq_p = jnp.zeros((B_pad, H1), compute_dtype).at[:B].set(hq.astype(compute_dtype))

    out = pl.pallas_call(
        relation_kernel,
        out_shape=jax.ShapeDtypeStruct((G * ROWS, COLS), jnp.float32),
        grid_spec=pltpu.PrefetchScalarGridSpec(
            num_scalar_prefetch=0,
            grid=(G,),
            in_specs=[
                pl.BlockSpec((TQ, H1), lambda i: (i, 0)),       # hq tile (per step)
                pl.BlockSpec((N_pad, H1), lambda i: (0, 0)),    # hs (grid-invariant)
                pl.BlockSpec((H1, H2), lambda i: (0, 0)),       # W2 bf16 (invariant)
                pl.BlockSpec((1, H2), lambda i: (0, 0)),        # b2 (invariant)
                pl.BlockSpec((1, H2), lambda i: (0, 0)),        # w3 row (invariant)
            ],
            out_specs=pl.BlockSpec((ROWS, COLS), lambda i: (i, 0)),
        ),
        compiler_params=pltpu.CompilerParams(
            dimension_semantics=("parallel",)),
    )(hq_p, hs_p, w2t, b2r, w3r)

    # (G*8, M_tile//8) -> (B_pad, N_pad) -> strip padding; fold in the b3 scalar.
    scores = out.reshape(B_pad, N_pad)[:B, :N] + jnp.asarray(b3, jnp.float32)[0]
    return scores


# ----------------------------------------------------------------------------
# ResNet18 backbone (plain JAX; deterministic init in place of torch.hub load)
# TODO(synk): pretrained IMAGENET1K_V1 weights are not loadable here; the
#             backbone is structurally faithful but uses He-init conv weights
#             and default BN stats (eval mode).
# ----------------------------------------------------------------------------
def _conv2d(x, w, stride, padding):
    return jax.lax.conv_general_dilated(
        x, w, window_strides=(stride, stride),
        padding=[(padding, padding), (padding, padding)],
        dimension_numbers=("NCHW", "OIHW", "NCHW"))


def _bn_eval(x, gamma, beta, eps=1e-5):
    # running_mean=0, running_var=1 (PyTorch BatchNorm defaults), eval mode.
    return gamma[None, :, None, None] * x / jnp.sqrt(1.0 + eps) + beta[None, :, None, None]


def _maxpool_3x3_s2(x):
    return jax.lax.reduce_window(
        x, -jnp.inf, jax.lax.max,
        window_dimensions=(1, 1, 3, 3),
        window_strides=(1, 1, 2, 2),
        padding=((0, 0), (0, 0), (1, 1), (1, 1)))


def init_resnet18(key):
    keys = iter(jax.random.split(key, 32))

    def conv_w(out_ch, in_ch, k):
        fan_in = in_ch * k * k
        return (jax.random.normal(next(keys), (out_ch, in_ch, k, k), jnp.float32)
                * (2.0 / fan_in) ** 0.5)

    params = {
        "conv1": conv_w(64, 3, 7),
        "bn1_g": jnp.ones(64, jnp.float32),
        "bn1_b": jnp.zeros(64, jnp.float32),
        "layers": [],
    }
    in_ch = 64
    for ch, stride in [(64, 1), (128, 2), (256, 2), (512, 2)]:
        blocks = []
        for b in range(2):
            s = stride if b == 0 else 1
            bp = {
                "conv1": conv_w(ch, in_ch, 3),
                "bn1_g": jnp.ones(ch, jnp.float32), "bn1_b": jnp.zeros(ch, jnp.float32),
                "conv2": conv_w(ch, ch, 3),
                "bn2_g": jnp.ones(ch, jnp.float32), "bn2_b": jnp.zeros(ch, jnp.float32),
            }
            if s != 1 or in_ch != ch:
                bp["down_conv"] = conv_w(ch, in_ch, 1)
                bp["down_bn_g"] = jnp.ones(ch, jnp.float32)
                bp["down_bn_b"] = jnp.zeros(ch, jnp.float32)
            blocks.append(bp)
            in_ch = ch
        params["layers"].append(blocks)
    return params


def _basic_block(x, p, stride):
    out = _conv2d(x, p["conv1"], stride, 1)
    out = jax.nn.relu(_bn_eval(out, p["bn1_g"], p["bn1_b"]))
    out = _conv2d(out, p["conv2"], 1, 1)
    out = _bn_eval(out, p["bn2_g"], p["bn2_b"])
    if "down_conv" in p:
        sc = _bn_eval(_conv2d(x, p["down_conv"], stride, 0),
                      p["down_bn_g"], p["down_bn_b"])
    else:
        sc = x
    return jax.nn.relu(out + sc)


def resnet18_features(params, x):
    x = _conv2d(x, params["conv1"], 2, 3)
    x = jax.nn.relu(_bn_eval(x, params["bn1_g"], params["bn1_b"]))
    x = _maxpool_3x3_s2(x)
    for blocks, stride in zip(params["layers"], [1, 2, 2, 2]):
        x = _basic_block(x, blocks[0], stride)
        x = _basic_block(x, blocks[1], 1)
    # adaptive avg pool to 1x1 + flatten -> (n, 512)  (fc = Identity)
    return jnp.mean(x, axis=(2, 3))


# ----------------------------------------------------------------------------
# Relation head parameter init (PyTorch Linear default: U(-1/sqrt(in), 1/sqrt(in)))
# ----------------------------------------------------------------------------
def init_fc(key):
    ks = jax.random.split(key, 6)

    def lin(kw, kb, out_f, in_f):
        bound = 1.0 / (in_f ** 0.5)
        w = jax.random.uniform(kw, (out_f, in_f), jnp.float32, -bound, bound)
        b = jax.random.uniform(kb, (out_f,), jnp.float32, -bound, bound)
        return w, b

    w1, b1 = lin(ks[0], ks[1], 256, 512 * 2)
    w2, b2 = lin(ks[2], ks[3], 128, 256)
    w3, b3 = lin(ks[4], ks[5], 1, 128)
    return w1, b1, w2, b2, w3, b3


# Pure-JAX f32 reference of the relation head (semantics check).
def relation_ref(sf, qf, w1, b1, w2, b2, w3, b3):
    B, N = qf.shape[0], sf.shape[0]
    se = jnp.broadcast_to(sf[None, :, :], (B, N, sf.shape[1]))
    qe = jnp.broadcast_to(qf[:, None, :], (B, N, qf.shape[1]))
    rel = jnp.concatenate([se, qe], axis=-1)           # (B, N, 1024)
    h = jax.nn.relu(rel @ w1.T + b1)                   # Dropout(0.5) = identity (eval)
    h = jax.nn.relu(h @ w2.T + b2)
    return (h @ w3.T + b3).reshape(B, N)


def relation_network_forward(backbone_params, fc_params, support, query):
    support_features = resnet18_features(backbone_params, support)   # (N, 512)
    query_features = resnet18_features(backbone_params, query)       # (B, 512)
    w1, b1, w2, b2, w3, b3 = fc_params
    return relation_scores(support_features, query_features, w1, b1, w2, b2, w3, b3)


if __name__ == "__main__":
    key = jax.random.PRNGKey(0)
    k_sup, k_qry, k_bb, k_fc, k_sf, k_qf = jax.random.split(key, 6)

    # --- Full module forward at small shapes (NCHW RGB images) ---
    n_support, batch_size = 4, 2
    support = jax.random.normal(k_sup, (n_support, 3, 32, 32), jnp.float32)
    query = jax.random.normal(k_qry, (batch_size, 3, 32, 32), jnp.float32)

    backbone_params = init_resnet18(k_bb)
    fc_params = init_fc(k_fc)

    scores = relation_network_forward(backbone_params, fc_params, support, query)
    scores = jax.block_until_ready(scores)
    assert scores.shape == (batch_size, n_support)

    # Check the Pallas relation head against a pure-JAX f32 reference
    # (tolerance covers the bf16 MXU-input path inside the kernel).
    sf = resnet18_features(backbone_params, support)
    qf = resnet18_features(backbone_params, query)
    ref = relation_ref(sf, qf, *fc_params)
    np.testing.assert_allclose(np.asarray(scores), np.asarray(ref),
                               rtol=5e-2, atol=1e-1)

    # --- Relation head only at larger B/N: exercises G > 1 grid steps, the
    #     grid-invariant weight blocks and the (8, M_tile//8) output layout. ---
    sf2 = jax.random.normal(k_sf, (5, 512), jnp.float32)
    qf2 = jax.random.normal(k_qf, (320, 512), jnp.float32)
    scores2 = jax.block_until_ready(relation_scores(sf2, qf2, *fc_params))
    assert scores2.shape == (320, 5)
    ref2 = relation_ref(sf2, qf2, *fc_params)
    np.testing.assert_allclose(np.asarray(scores2), np.asarray(ref2),
                               rtol=5e-2, atol=1e-1)

    print("KERNEL_OK")
</pallas_src>

<mosaic_0001>
module attributes {stable_mosaic.version = 11 : i64} {
  func.func @relation_kernel(%arg0: i32, %arg1: memref<128x256xf32, #tpu.memory_space<vmem>>, %arg2: memref<8x256xf32, #tpu.memory_space<vmem>>, %arg3: memref<256x128xbf16, #tpu.memory_space<vmem>>, %arg4: memref<1x128xf32, #tpu.memory_space<vmem>>, %arg5: memref<1x128xf32, #tpu.memory_space<vmem>>, %arg6: memref<8x128xf32, #tpu.memory_space<vmem>>) attributes {dimension_semantics = [#tpu.dimension_semantics<parallel>], iteration_bounds = array<i64: 1>, scalar_prefetch = 0 : i64, scratch_operands = 0 : i64, tpu.core_type = #tpu.core_type<tc>, window_params = [{transform_indices = @transform_0, window_bounds = array<i64: 128, 256>}, {pipeline_mode = #tpu.pipeline_mode<synchronous>, transform_indices = @transform_1, window_bounds = array<i64: 8, 256>}, {pipeline_mode = #tpu.pipeline_mode<synchronous>, transform_indices = @transform_2, window_bounds = array<i64: 256, 128>}, {pipeline_mode = #tpu.pipeline_mode<synchronous>, transform_indices = @transform_3, window_bounds = array<i64: 1, 128>}, {pipeline_mode = #tpu.pipeline_mode<synchronous>, transform_indices = @transform_4, window_bounds = array<i64: 1, 128>}, {transform_indices = @transform_5, window_bounds = array<i64: 8, 128>}]} {
    %c0 = arith.constant 0 : index
    %c0_0 = arith.constant 0 : index
    %0 = vector.load %arg1[%c0, %c0_0] : memref<128x256xf32, #tpu.memory_space<vmem>>, vector<128x256xf32>
    %1 = vector.shape_cast %0 : vector<128x256xf32> to vector<128x1x256xf32>
    %c0_1 = arith.constant 0 : index
    %c0_2 = arith.constant 0 : index
    %2 = vector.load %arg2[%c0_1, %c0_2] : memref<8x256xf32, #tpu.memory_space<vmem>>, vector<8x256xf32>
    %3 = vector.shape_cast %2 : vector<8x256xf32> to vector<1x8x256xf32>
    %4 = vector.broadcast %1 : vector<128x1x256xf32> to vector<128x8x256xf32>
    %5 = vector.broadcast %3 : vector<1x8x256xf32> to vector<128x8x256xf32>
    %6 = arith.addf %4, %5 : vector<128x8x256xf32>
    %cst = arith.constant 0.000000e+00 : f32
    %7 = vector.broadcast %cst : f32 to vector<128x8x256xf32>
    %8 = arith.maximumf %6, %7 : vector<128x8x256xf32>
    %9 = vector.shape_cast %8 : vector<128x8x256xf32> to vector<1024x256xf32>
    %10 = arith.truncf %9 : vector<1024x256xf32> to vector<1024x256xbf16>
    %c0_3 = arith.constant 0 : index
    %c0_4 = arith.constant 0 : index
    %11 = vector.load %arg3[%c0_3, %c0_4] : memref<256x128xbf16, #tpu.memory_space<vmem>>, vector<256x128xbf16>
    %cst_5 = arith.constant dense<0.000000e+00> : vector<1024x128xf32>
    %12 = tpu.matmul %10, %11, %cst_5 {dimension_numbers = #tpu.dot_dimension_numbers<[1], [0], [0], [1], [0, 0, 1, 1], [], []>} : vector<1024x256xbf16>, vector<256x128xbf16>, vector<1024x128xf32> -> vector<1024x128xf32>
    %c0_6 = arith.constant 0 : index
    %c0_7 = arith.constant 0 : index
    %13 = vector.load %arg4[%c0_6, %c0_7] : memref<1x128xf32, #tpu.memory_space<vmem>>, vector<1x128xf32>
    %14 = vector.broadcast %13 : vector<1x128xf32> to vector<1024x128xf32>
    %15 = arith.addf %12, %14 : vector<1024x128xf32>
    %cst_8 = arith.constant 0.000000e+00 : f32
    %16 = vector.broadcast %cst_8 : f32 to vector<1024x128xf32>
    %17 = arith.maximumf %15, %16 : vector<1024x128xf32>
    %c0_9 = arith.constant 0 : index
    %c0_10 = arith.constant 0 : index
    %18 = vector.load %arg5[%c0_9, %c0_10] : memref<1x128xf32, #tpu.memory_space<vmem>>, vector<1x128xf32>
    %19 = vector.broadcast %18 : vector<1x128xf32> to vector<1024x128xf32>
    %20 = arith.mulf %17, %19 : vector<1024x128xf32>
    %cst_11 = arith.constant dense<0.000000e+00> : vector<1024xf32>
    %21 = vector.multi_reduction <add>, %20, %cst_11 [1] : vector<1024x128xf32> to vector<1024xf32>
    %22 = vector.shape_cast %21 : vector<1024xf32> to vector<8x128xf32>
    %c0_12 = arith.constant 0 : index
    %c0_13 = arith.constant 0 : index
    %23 = vector.load %arg6[%c0_12, %c0_13] : memref<8x128xf32, #tpu.memory_space<vmem>>, vector<8x128xf32>
    tpu.vector_store %arg6[%c0_12, %c0_13], %22 {strides = array<i32>} : memref<8x128xf32, #tpu.memory_space<vmem>>, vector<8x128xf32>,
    return
  }
  func.func @transform_0(%arg0: i32) -> (i32, i32) {
    %c0_i32 = arith.constant 0 : i32
    %c0_i32_0 = arith.constant 0 : i32
    return %arg0, %c0_i32 : i32, i32
  }
  func.func @transform_1(%arg0: i32) -> (i32, i32) {
    %c0_i32 = arith.constant 0 : i32
    %c0_i32_0 = arith.constant 0 : i32
    %c0_i32_1 = arith.constant 0 : i32
    return %c0_i32, %c0_i32_0 : i32, i32
  }
  func.func @transform_2(%arg0: i32) -> (i32, i32) {
    %c0_i32 = arith.constant 0 : i32
    %c0_i32_0 = arith.constant 0 : i32
    %c0_i32_1 = arith.constant 0 : i32
    return %c0_i32, %c0_i32_0 : i32, i32
  }
  func.func @transform_3(%arg0: i32) -> (i32, i32) {
    %c0_i32 = arith.constant 0 : i32
    %c0_i32_0 = arith.constant 0 : i32
    %c0_i32_1 = arith.constant 0 : i32
    return %c0_i32, %c0_i32_0 : i32, i32
  }
  func.func @transform_4(%arg0: i32) -> (i32, i32) {
    %c0_i32 = arith.constant 0 : i32
    %c0_i32_0 = arith.constant 0 : i32
    %c0_i32_1 = arith.constant 0 : i32
    return %c0_i32, %c0_i32_0 : i32, i32
  }
  func.func @transform_5(%arg0: i32) -> (i32, i32) {
    %c0_i32 = arith.constant 0 : i32
    %c0_i32_0 = arith.constant 0 : i32
    return %arg0, %c0_i32 : i32, i32
  }
}

</mosaic_0001>

<bundles_post_ra>
// kernel: tpu_custom_call.1
= control target key start
LH: loop header
LB: loop body
LE: loop exit
PB: predicated region body
PF: predicated region fallthrough
CT: control target
= control target key end

     0   :  { %10 = vsyncpa [#allocation3], 0  ;;  %s6971_s0 = inlined_call_operand.hbm [shape: f32[128,256], index: 0, kind: input, shape index: {}]   ;;  %s6972_s1 = inlined_call_operand.hbm [shape: f32[8,256], index: 1, kind: input, shape index: {}]   ;;  %s6973_s2 = inlined_call_operand.hbm [shape: bf16[256,128], index: 2, kind: input, shape index: {}]   ;;  %s6974_s3 = inlined_call_operand.vmem [shape: f32[1,128], index: 3, kind: input, shape index: {}]   ;;  %s6975_s4 = inlined_call_operand.vmem [shape: f32[1,128], index: 4, kind: input, shape index: {}]   ;;  %s6976_s5 = inlined_call_operand.hbm [shape: f32[8,128], index: 5, kind: output, shape index: {}]  }
   0x1   :  { %11 = vsyncpa [#allocation6], 0 }
   0x2   :  { %12 = vsyncpa [#allocation4], 0  ;;  %s5095_s18 = smov [#allocation5]   ;;  %s5096_s20 = smov [#allocation2]  }
   0x3   :  { %s31_s19 = sshll.u32 %s5095_s18, 4  ;;  %s18_s21 = sshll.u32 %s5096_s20, 4  ;;  %s32_s19 = int_to_ptr.vmem [resolvable:$true] %s31_s19  ;;  %s19_s21 = int_to_ptr.vmem [resolvable:$true] %s18_s21 }
   0x4   :  { %s5017_s22 = scalar_lea.vmem %s32_s19, 256  ;;  %p5022_p1 = scmp.lt.s32.totalorder %s32_s19, %s32_s19 }
   0x5   :  { %p5018_p0 = scmp.ne.s32.totalorder %s32_s19, %s5017_s22  ;;  %p5023_p2 = scmp.lt.s32.totalorder %s5017_s22, %s5017_s22 }
   0x7   :  { %p5024_p3 = por %p5023_p2, %p5022_p1 }
   0x9   :  { %p5025_p4 = pnand %p5024_p3, %p5018_p0 }
   0xb   :  { %5028 = shalt.err (!%p5025_p4)
}
   0xc   :  { %34 = dma.hbm_to_vmem [thread:$0]  %s6972_s1, 256, %s32_s19, [#allocation6]  }
   0xd   :  { %s5037_s25 = scalar_lea.vmem %s19_s21, 4096  ;;  %p5042_p6 = scmp.lt.s32.totalorder %s19_s21, %s19_s21 }
   0xe   :  { %p5038_p5 = scmp.ne.s32.totalorder %s19_s21, %s5037_s25  ;;  %p5043_p7 = scmp.lt.s32.totalorder %s5037_s25, %s5037_s25 }
  0x10   :  { %p5044_p8 = por %p5043_p7, %p5042_p6 }
  0x12   :  { %p5045_p9 = pnand %p5044_p8, %p5038_p5 }
  0x14   :  { %5048 = shalt.err (!%p5045_p9)
}
  0x15   :  { %s5097_s26 = smov 256   ;;  %s5098_s27 = smov 16  }
  0x16   :  { %24 = dma.hbm_to_vmem [thread:$0]  %s6971_s0, 4096, %s19_s21, [#allocation3], %s5097_s26, %s5097_s26, %s5098_s27  }
  0x17   :  { %s5099_s30 = smov [#allocation7]  }
  0x18   :  { %s40_s6 = sshll.u32 %s5099_s30, 4  ;;  %s41_s6 = int_to_ptr.vmem [resolvable:$true] %s40_s6 }
  0x19   :  { %s5057_s7 = scalar_lea.vmem %s41_s6, 2048  ;;  %p5062_p11 = scmp.lt.s32.totalorder %s41_s6, %s41_s6 }
  0x1a   :  { %p5058_p10 = scmp.ne.s32.totalorder %s41_s6, %s5057_s7  ;;  %p5063_p12 = scmp.lt.s32.totalorder %s5057_s7, %s5057_s7 }
  0x1c   :  { %p5064_p13 = por %p5063_p12, %p5062_p11 }
  0x1e   :  { %p5065_p0 = pnand %p5064_p13, %p5058_p10 }
  0x20   :  { %5068 = shalt.err (!%p5065_p0)
}
  0x21   :  { %s5100_s1 = smov 64   ;;  %s5101_s8 = smov 4  }
  0x22   :  { %46 = dma.hbm_to_vmem [thread:$0]  %s6973_s2, 2048, %s41_s6, [#allocation6], %s5100_s1, %s5100_s1, %s5101_s8  }
  0x23   :  { %5089 = dma.done.wait [#allocation3], 4096  }
  0x24   :  { %5090 = vsyncadd [#allocation3], 4294963200 }
  0x25   :  { %5091 = dma.done.wait [#allocation6], 2304  }
  0x26   :  { %5092 = vsyncadd [#allocation6], 4294964992  ;;  %v5102_v0 = vmov 0   ;;  %v4937_v1 = vld [vmem:[#allocation7 + $0x38] sm:$0xff]   ;;  %v4938_v2 = vld [vmem:[#allocation7 + $0x30] sm:$0xff]   ;;  %v130_v6 = vlaneseq  ;;  %vm4073_vm0 = vcmask 130112  }
  0x27   :  { %2982 = vmatprep.subr.bf16.mxu0 %v5102_v0  ;;  %4895 = vmatprep.subr.bf16.mxu1 %v5102_v0  ;;  %v4939_v3 = vld [vmem:[#allocation7 + $0x28] sm:$0xff]   ;;  %v5103_v4 = vmov 1966171168   ;;  %v4940_v7 = vld [vmem:[#allocation7 + $0x20] sm:$0xff]   ;;  %v4941_v10 = vld [vmem:[#allocation7 + $0x18] sm:$0xff]   ;;  %vm4080_vm1 = vcmask 195712  }
  0x28   :  { %2983 = vmatpush1.bf16.msra.mxu0 %v4937_v1  ;;  %4911 = vmatpush1.bf16.msra.mxu1 %v4937_v1  ;;  %v128_v5 = vunpack.c.l.s4 %v5103_v4  ;;  %v5151_v9 = vshrl.u32 %v130_v6, 7  ;;  %v4953_v12 = vld [vmem:[#allocation2] ss:$8 sps:$4 sm:$0xff]   ;;  %v4955_v14 = vld [vmem:[#allocation2 + $0x4] ss:$8 sps:$4 sm:$0xff]   ;;  %v4943_v24 = vld [vmem:[#allocation7 + $0x8] sm:$0xff]  }
  0x29   :  { %2984 = vmatprep.subr.bf16.mxu0 %v5102_v0  ;;  %4896 = vmatprep.subr.bf16.mxu1 %v5102_v0  ;;  %v4942_v13 = vld [vmem:[#allocation7 + $0x10] sm:$0xff]   ;;  %v5174_v25 = vld [vmem:[#allocation5 + $0x8] sm:$0xff]  ;;  %v4944_v44 = vld [vmem:[#allocation7] sm:$0xff]   ;;  %vm4087_vm2 = vcmask 261312   ;;  %vm4094_vm3 = vcmask 326912   ;;  %vm4101_vm4 = vcmask 392512  }
  0x2a   :  { %v129_v8 = vunpack.c.0.s8 %v128_v5  ;;  %v5162_v16 = vsub.s32 1, %v5151_v9  ;;  %v4956_v17 = vld [vmem:[#allocation2 + $0x80] ss:$8 sps:$4 sm:$0xff]   ;;  %v4958_v18 = vld [vmem:[#allocation2 + $0x84] ss:$8 sps:$4 sm:$0xff]   ;;  %v5167_v19 = vsub.s32 0, %v5151_v9 }
  0x2b   :  { %v5187_v32 = vld [vmem:[#allocation5] sm:$0xff]  ;;  %v4945_v53 = vld [vmem:[#allocation7 + $0x78] sm:$0xff]   ;;  %vm4108_vm5 = vcmask 458112   ;;  %vm4115_vm6 = vcmask 523712   ;;  %vm4122_vm7 = vcmask 589312   ;;  %vm4129_vm8 = vcmask 654912  }
  0x2c   :  { %2985 = vmatpush1.bf16.msra.mxu0 %v4938_v2  ;;  %4912 = vmatpush1.bf16.msra.mxu1 %v4938_v2  ;;  %v5156_v11 = vsub.s32 %v129_v8, %v5151_v9  ;;  %vm4136_vm9 = vcmask 720512   ;;  %vm4143_vm10 = vcmask 786112   ;;  %vm4150_vm11 = vcmask 851712  }
  0x2d   :  { %2986 = vmatprep.subr.bf16.mxu0 %v5102_v0  ;;  %4897 = vmatprep.subr.bf16.mxu1 %v5102_v0  ;;  %vm4157_vm12 = vcmask 917312   ;;  %vm4164_vm13 = vcmask 982912   ;;  %vm4171_vm14 = vcmask 1048512  }
  0x2e   :  { %v133_v15 = vrot.slane %v4953_v12, %v5156_v11  ;;  %v5170_v20 = vrot.slane %v4955_v14, %v5156_v11  ;;  %v533_v23 = vrot.slane %v4956_v17, %v5156_v11  ;;  %v5183_v28 = vrot.slane %v4958_v18, %v5156_v11 }
  0x30   :  { %2987 = vmatpush1.bf16.msra.mxu0 %v4939_v3  ;;  %4913 = vmatpush1.bf16.msra.mxu1 %v4939_v3  ;;  %v141_v21 = vcombine.high %v133_v15, %v133_v15  ;;  %v149_v22 = vrot.slane %v133_v15, %v5156_v11  ;;  %v142_v26 = vcombine.high %v5170_v20, %v5170_v20 }
  0x31   :  { %2988 = vmatprep.subr.bf16.mxu0 %v5102_v0  ;;  %4898 = vmatprep.subr.bf16.mxu1 %v5102_v0  ;;  %v5180_v27 = vrot.slane %v5170_v20, %v5156_v11  ;;  %v541_v31 = vcombine.high %v533_v23, %v533_v23  ;;  %v549_v33 = vrot.slane %v533_v23, %v5156_v11 }
  0x32   :  { %v163_v29 = vrot.slane %v141_v21, %v5156_v11  ;;  %v934_v30 = vrot.slane %v149_v22, %v5162_v16  ;;  %v930_v34 = vrot.slane %v149_v22, %v5167_v19  ;;  %v171_v35 = vcombine.high %v149_v22, %v149_v22  ;;  %v4946_v21 = vld [vmem:[#allocation7 + $0x70] sm:$0xff]  }
  0x33   :  { %v563_v38 = vrot.slane %v541_v31, %v5156_v11  ;;  %v1446_v40 = vrot.slane %v549_v33, %v5162_v16  ;;  %v1442_v42 = vrot.slane %v549_v33, %v5167_v19  ;;  %v571_v5 = vcombine.high %v549_v33, %v549_v33 }
  0x34   :  { %2989 = vmatpush1.bf16.msra.mxu0 %v4940_v7  ;;  %4914 = vmatpush1.bf16.msra.mxu1 %v4940_v7  ;;  %v942_v36 = vrot.slane %v163_v29, %v5162_v16  ;;  %v2208_v37 = vadd.f32 %v934_v30, %v5174_v25  ;;  %v938_v39 = vrot.slane %v163_v29, %v5167_v19 }
  0x35   :  { %2990 = vmatprep.subr.bf16.mxu0 %v5102_v0  ;;  %4899 = vmatprep.subr.bf16.mxu1 %v5102_v0  ;;  %v2207_v41 = vadd.f32 %v930_v34, %v5187_v32  ;;  %v173_v43 = vcombine.high %v163_v29, %v163_v29  ;;  %v1454_v47 = vrot.slane %v563_v38, %v5162_v16 }
  0x36   :  { %v2210_v45 = vadd.f32 %v942_v36, %v5174_v25  ;;  %v2464_v46 = vmax.f32 %v2208_v37, 0.0  ;;  %v2209_v48 = vadd.f32 %v938_v39, %v5187_v32  ;;  %v2336_v49 = vadd.f32 %v1446_v40, %v5174_v25 }
  0x37   :  { %v2463_v50 = vmax.f32 %v2207_v41, 0.0  ;;  %v1450_v51 = vrot.slane %v563_v38, %v5167_v19  ;;  %v2335_v52 = vadd.f32 %v1442_v42, %v5187_v32  ;;  %v2338_v55 = vadd.f32 %v1454_v47, %v5174_v25  ;;  %v4947_v41 = vld [vmem:[#allocation7 + $0x68] sm:$0xff]  }
  0x38   :  { %2991 = vmatpush1.bf16.msra.mxu0 %v4941_v10  ;;  %4915 = vmatpush1.bf16.msra.mxu1 %v4941_v10  ;;  %v2466_v54 = vmax.f32 %v2210_v45, 0.0  ;;  %v2465_v56 = vmax.f32 %v2209_v48, 0.0  ;;  %v950_v57 = vrot.slane %v171_v35, %v5162_v16  ;;  %v2592_v58 = vmax.f32 %v2336_v49, 0.0 }
  0x39   :  { %2992 = vmatprep.subr.bf16.mxu0 %v5102_v0  ;;  %4900 = vmatprep.subr.bf16.mxu1 %v5102_v0  ;;  %v2337_v59 = vadd.f32 %v1450_v51, %v5187_v32  ;;  %v2591_v60 = vmax.f32 %v2335_v52, 0.0  ;;  %v958_v61 = vrot.slane %v173_v43, %v5162_v16  ;;  %v2594_v63 = vmax.f32 %v2338_v55, 0.0  ;;  %v4948_v55 = vld [vmem:[#allocation7 + $0x60] sm:$0xff]  }
  0x3a   :  { %v2720_v62 = vpack.c.bf16 %v2466_v54, %v2464_v46  ;;  %v5212_v1 = vpack.c.bf16 %v2465_v56, %v2463_v50  ;;  %v2212_v2 = vadd.f32 %v950_v57, %v5174_v25  ;;  %v573_v7 = vcombine.high %v563_v38, %v563_v38 }
  0x3b   :  { %v2593_v3 = vmax.f32 %v2337_v59, 0.0  ;;  %v2214_v4 = vadd.f32 %v958_v61, %v5174_v25  ;;  %v2784_v8 = vpack.c.bf16 %v2594_v63, %v2592_v58  ;;  %v946_v12 = vrot.slane %v171_v35, %v5167_v19 }
  0x3c   :  { %2993 = vmatpush1.bf16.msra.mxu0 %v4942_v13  ;;  %4916 = vmatpush1.bf16.msra.mxu1 %v4942_v13  ;;  %v2468_v10 = vmax.f32 %v2212_v2, 0.0  ;;  %v954_v13 = vrot.slane %v173_v43, %v5167_v19  ;;  %v1462_v17 = vrot.slane %v571_v5, %v5162_v16  ;;  %v1470_v18 = vrot.slane %v573_v7, %v5162_v16 }
  0x3d   :  { %2994 = vmatprep.subr.bf16.mxu0 %v5102_v0  ;;  %4901 = vmatprep.subr.bf16.mxu1 %v5102_v0  ;;  %v5220_v14 = vpack.c.bf16 %v2593_v3, %v2591_v60  ;;  %v2470_v15 = vmax.f32 %v2214_v4, 0.0  ;;  %v2211_v22 = vadd.f32 %v946_v12, %v5187_v32  ;;  %v1466_v35 = vrot.slane %v573_v7, %v5167_v19 }
  0x3e   :  { %3014 = vmatprep.mubr.bf16.mxu0 %v2720_v62  ;;  %v2213_v23 = vadd.f32 %v954_v13, %v5187_v32  ;;  %v2340_v30 = vadd.f32 %v1462_v17, %v5174_v25  ;;  %v2342_v31 = vadd.f32 %v1470_v18, %v5174_v25  ;;  %3270 = vmatprep.mubr.bf16.mxu1 %v2784_v8  ;;  %v4949_v8 = vld [vmem:[#allocation7 + $0x58] sm:$0xff]  }
  0x3f   :  { %v5229_v29 = vpack.c.bf16 %v2470_v15, %v2468_v10  ;;  %v2467_v33 = vmax.f32 %v2211_v22, 0.0  ;;  %v170_v39 = vrot.slane %v142_v26, %v5156_v11  ;;  %v966_v40 = vrot.slane %v5180_v27, %v5162_v16 }
  0x40   :  { %2995 = vmatpush1.bf16.msra.mxu0 %v4943_v24  ;;  %4917 = vmatpush1.bf16.msra.mxu1 %v4943_v24  ;;  %v1458_v24 = vrot.slane %v571_v5, %v5167_v19  ;;  %v2469_v34 = vmax.f32 %v2213_v23, 0.0  ;;  %v2596_v37 = vmax.f32 %v2340_v30, 0.0  ;;  %v2598_v38 = vmax.f32 %v2342_v31, 0.0 }
  0x41   :  { %2996 = vmatprep.subr.bf16.mxu0 %v5102_v0  ;;  %4902 = vmatprep.subr.bf16.mxu1 %v5102_v0  ;;  %v2341_v43 = vadd.f32 %v1466_v35, %v5187_v32  ;;  %v542_v45 = vcombine.high %v5183_v28, %v5183_v28  ;;  %v974_v26 = vrot.slane %v170_v39, %v5162_v16 }
  0x42   :  { %v2339_v36 = vadd.f32 %v1458_v24, %v5187_v32  ;;  %v5241_v42 = vpack.c.bf16 %v2469_v34, %v2467_v33  ;;  %v5248_v20 = vpack.c.bf16 %v2598_v38, %v2596_v37  ;;  %v2216_v46 = vadd.f32 %v966_v40, %v5174_v25  ;;  %v4959_v33 = vld [vmem:[#allocation2 + $0x10] ss:$8 sps:$4 sm:$0xff]   ;;  %v4950_v38 = vld [vmem:[#allocation7 + $0x50] sm:$0xff]  }
  0x43   :  { %v2597_v47 = vmax.f32 %v2341_v43, 0.0  ;;  %v556_v48 = vrot.slane %v5183_v28, %v5156_v11  ;;  %v570_v49 = vrot.slane %v542_v45, %v5156_v11  ;;  %v962_v50 = vrot.slane %v5180_v27, %v5167_v19 }
  0x44   :  { %2997 = vmatpush1.bf16.msra.mxu0 %v4944_v44  ;;  %4918 = vmatpush1.bf16.msra.mxu1 %v4944_v44  ;;  %v2595_v44 = vmax.f32 %v2339_v36, 0.0  ;;  %v2218_v51 = vadd.f32 %v974_v26, %v5174_v25  ;;  %v2472_v52 = vmax.f32 %v2216_v46, 0.0  ;;  %v172_v54 = vcombine.high %v5180_v27, %v5180_v27 }
  0x45   :  { %2998 = vmatprep.subr.bf16.mxu0 %v5102_v0  ;;  %4903 = vmatprep.subr.bf16.mxu1 %v5102_v0  ;;  %v1478_v28 = vrot.slane %v556_v48, %v5162_v16  ;;  %v1486_v57 = vrot.slane %v570_v49, %v5162_v16  ;;  %v2215_v59 = vadd.f32 %v962_v50, %v5187_v32 }
  0x46   :  { %v5261_v56 = vpack.c.bf16 %v2597_v47, %v2595_v44  ;;  %v2474_v58 = vmax.f32 %v2218_v51, 0.0  ;;  %v1474_v27 = vrot.slane %v556_v48, %v5167_v19  ;;  %v1482_v63 = vrot.slane %v570_v49, %v5167_v19  ;;  %v4961_v47 = vld [vmem:[#allocation2 + $0x90] ss:$8 sps:$4 sm:$0xff]  }
  0x47   :  { %v2344_v61 = vadd.f32 %v1478_v28, %v5174_v25  ;;  %v2346_v62 = vadd.f32 %v1486_v57, %v5174_v25  ;;  %v174_v2 = vcombine.high %v170_v39, %v170_v39  ;;  %v2471_v4 = vmax.f32 %v2215_v59, 0.0  ;;  %v4951_v57 = vld [vmem:[#allocation7 + $0x48] sm:$0xff]  }
  0x48   :  { %2999 = vmatpush2.bf16.msra.mxu0 %v4945_v53  ;;  %4919 = vmatpush2.bf16.msra.mxu1 %v4945_v53  ;;  %v970_v53 = vrot.slane %v170_v39, %v5167_v19  ;;  %v5273_v3 = vpack.c.bf16 %v2474_v58, %v2472_v52  ;;  %v2343_v7 = vadd.f32 %v1474_v27, %v5187_v32  ;;  %v4963_v52 = vld [vmem:[#allocation2 + $0x14] ss:$8 sps:$4 sm:$0xff]  }
  0x49   :  { %3000 = vmatprep.subr.bf16.mxu0 %v5102_v0  ;;  %4904 = vmatprep.subr.bf16.mxu1 %v5102_v0  ;;  %v2600_v10 = vmax.f32 %v2344_v61, 0.0  ;;  %v2602_v12 = vmax.f32 %v2346_v62, 0.0  ;;  %v2345_v13 = vadd.f32 %v1482_v63, %v5187_v32  ;;  %v982_v15 = vrot.slane %v172_v54, %v5162_v16 }
  0x4a   :  { %v2217_v60 = vadd.f32 %v970_v53, %v5187_v32  ;;  %v2599_v18 = vmax.f32 %v2343_v7, 0.0  ;;  %v572_v22 = vcombine.high %v556_v48, %v556_v48  ;;  %v574_v31 = vcombine.high %v570_v49, %v570_v49 }
  0x4b   :  { %v5283_v23 = vpack.c.bf16 %v2602_v12, %v2600_v10  ;;  %v2601_v24 = vmax.f32 %v2345_v13, 0.0  ;;  %v2220_v30 = vadd.f32 %v982_v15, %v5174_v25  ;;  %v978_v36 = vrot.slane %v172_v54, %v5167_v19  ;;  %v4952_v15 = vld [vmem:[#allocation7 + $0x40] sm:$0xff]  }
  0x4c   :  { %3001 = vmatpush2.bf16.msra.mxu0 %v4946_v21  ;;  %4920 = vmatpush2.bf16.msra.mxu1 %v4946_v21  ;;  %v2473_v5 = vmax.f32 %v2217_v60, 0.0  ;;  %v990_v21 = vrot.slane %v174_v2, %v5162_v16  ;;  %v1494_v35 = vrot.slane %v572_v22, %v5162_v16  ;;  %v986_v37 = vrot.slane %v174_v2, %v5167_v19 }
  0x4d   :  { %3002 = vmatprep.subr.bf16.mxu0 %v5102_v0  ;;  %4905 = vmatprep.subr.bf16.mxu1 %v5102_v0  ;;  %v5290_v39 = vpack.c.bf16 %v2601_v24, %v2599_v18  ;;  %v2476_v40 = vmax.f32 %v2220_v30, 0.0  ;;  %v1490_v43 = vrot.slane %v572_v22, %v5167_v19  ;;  %v2219_v26 = vadd.f32 %v978_v36, %v5187_v32 }
  0x4e   :  { %v5280_v17 = vpack.c.bf16 %v2473_v5, %v2471_v4  ;;  %v2222_v34 = vadd.f32 %v990_v21, %v5174_v25  ;;  %v2348_v45 = vadd.f32 %v1494_v35, %v5174_v25  ;;  %v2221_v46 = vadd.f32 %v986_v37, %v5187_v32 }
  0x4f   :  { %v1498_v49 = vrot.slane %v574_v31, %v5167_v19  ;;  %v2347_v50 = vadd.f32 %v1490_v43, %v5187_v32  ;;  %v183_v51 = vrot.slane %v4959_v33, %v5156_v11  ;;  %v583_v63 = vrot.slane %v4961_v47, %v5156_v11 }
  0x50   :  { %3003 = vmatpush2.bf16.msra.mxu0 %v4947_v41  ;;  %4921 = vmatpush2.bf16.msra.mxu1 %v4947_v41  ;;  %v1502_v41 = vrot.slane %v574_v31, %v5162_v16  ;;  %v2478_v44 = vmax.f32 %v2222_v34, 0.0  ;;  %v2604_v54 = vmax.f32 %v2348_v45, 0.0  ;;  %v2477_v28 = vmax.f32 %v2221_v46, 0.0 }
  0x51   :  { %3004 = vmatprep.subr.bf16.mxu0 %v5102_v0  ;;  %4906 = vmatprep.subr.bf16.mxu1 %v5102_v0  ;;  %v2349_v59 = vadd.f32 %v1498_v49, %v5187_v32  ;;  %v2603_v60 = vmax.f32 %v2347_v50, 0.0  ;;  %v191_v27 = vcombine.high %v183_v51, %v183_v51  ;;  %v199_v62 = vrot.slane %v183_v51, %v5156_v11 }
  0x52   :  { %v2350_v48 = vadd.f32 %v1502_v41, %v5174_v25  ;;  %v5303_v53 = vpack.c.bf16 %v2478_v44, %v2476_v40  ;;  %v5316_v7 = vrot.slane %v4963_v52, %v5156_v11  ;;  %v591_v10 = vcombine.high %v583_v63, %v583_v63 }
  0x53   :  { %v2605_v4 = vmax.f32 %v2349_v59, 0.0  ;;  %v213_v5 = vrot.slane %v191_v27, %v5156_v11  ;;  %v599_v12 = vrot.slane %v583_v63, %v5156_v11  ;;  %v994_v13 = vrot.slane %v199_v62, %v5167_v19 }
  0x54   :  { %3005 = vmatpush2.bf16.msra.mxu0 %v4948_v55  ;;  %4922 = vmatpush2.bf16.msra.mxu1 %v4948_v55  ;;  %v2475_v55 = vmax.f32 %v2219_v26, 0.0  ;;  %v2606_v58 = vmax.f32 %v2350_v48, 0.0  ;;  %v613_v30 = vrot.slane %v591_v10, %v5156_v11  ;;  %v221_v48 = vcombine.high %v199_v62, %v199_v62 }
  0x55   :  { %3006 = vmatprep.subr.bf16.mxu0 %v5102_v0  ;;  %4907 = vmatprep.subr.bf16.mxu1 %v5102_v0  ;;  %v5321_v18 = vpack.c.bf16 %v2605_v4, %v2603_v60  ;;  %v1006_v21 = vrot.slane %v213_v5, %v5162_v16  ;;  %v1002_v22 = vrot.slane %v213_v5, %v5167_v19 }
  0x56   :  { %v5308_v61 = vpack.c.bf16 %v2477_v28, %v2475_v55  ;;  %v5312_v2 = vpack.c.bf16 %v2606_v58, %v2604_v54  ;;  %v1510_v31 = vrot.slane %v599_v12, %v5162_v16  ;;  %v2223_v34 = vadd.f32 %v994_v13, %v5187_v32  ;;  %v4964_v13 = vld [vmem:[#allocation2 + $0x94] ss:$8 sps:$4 sm:$0xff]  }
  0x57   :  { %v2226_v33 = vadd.f32 %v1006_v21, %v5174_v25  ;;  %v2225_v35 = vadd.f32 %v1002_v22, %v5187_v32  ;;  %v1506_v36 = vrot.slane %v599_v12, %v5167_v19  ;;  %v223_v52 = vcombine.high %v213_v5, %v213_v5 }
  0x58   :  { %3007 = vmatpush2.bf16.msra.mxu0 %v4949_v8  ;;  %4923 = vmatpush2.bf16.msra.mxu1 %v4949_v8  ;;  %v998_v8 = vrot.slane %v199_v62, %v5162_v16  ;;  %v2352_v40 = vadd.f32 %v1510_v31, %v5174_v25  ;;  %v2479_v43 = vmax.f32 %v2223_v34, 0.0  ;;  %v1014_v28 = vrot.slane %v221_v48, %v5162_v16 }
  0x59   :  { %3008 = vmatprep.subr.bf16.mxu0 %v5102_v0  ;;  %4908 = vmatprep.subr.bf16.mxu1 %v5102_v0  ;;  %v2482_v41 = vmax.f32 %v2226_v33, 0.0  ;;  %v2481_v44 = vmax.f32 %v2225_v35, 0.0  ;;  %v2351_v45 = vadd.f32 %v1506_v36, %v5187_v32  ;;  %v1022_v58 = vrot.slane %v223_v52, %v5162_v16 }
  0x5a   :  { %v2224_v24 = vadd.f32 %v998_v8, %v5174_v25  ;;  %v2608_v46 = vmax.f32 %v2352_v40, 0.0  ;;  %v623_v59 = vcombine.high %v613_v30, %v613_v30  ;;  %v1010_v60 = vrot.slane %v221_v48, %v5167_v19 }
  0x5b   :  { %v5342_v50 = vpack.c.bf16 %v2481_v44, %v2479_v43  ;;  %v2607_v51 = vmax.f32 %v2351_v45, 0.0  ;;  %v2230_v63 = vadd.f32 %v1022_v58, %v5174_v25  ;;  %v192_v34 = vcombine.high %v5316_v7, %v5316_v7 }
  0x5c   :  { %3009 = vmatpush2.bf16.msra.mxu0 %v4950_v38  ;;  %4924 = vmatpush2.bf16.msra.mxu1 %v4950_v38  ;;  %v2480_v37 = vmax.f32 %v2224_v24, 0.0  ;;  %v1518_v38 = vrot.slane %v613_v30, %v5162_v16  ;;  %v1534_v4 = vrot.slane %v623_v59, %v5162_v16  ;;  %v590_v43 = vrot.slane %v4964_v13, %v5156_v11 }
  0x5d   :  { %3010 = vmatprep.subr.bf16.mxu0 %v5102_v0  ;;  %4909 = vmatprep.subr.bf16.mxu1 %v5102_v0 }
  0x5e   :  { %v2354_v26 = vadd.f32 %v1518_v38, %v5174_v25  ;;  %v5340_v49 = vpack.c.bf16 %v2482_v41, %v2480_v37  ;;  %v2358_v21 = vadd.f32 %v1534_v4, %v5174_v25  ;;  %v206_v38 = vrot.slane %v5316_v7, %v5156_v11 }
  0x5f   :  { %v220_v41 = vrot.slane %v192_v34, %v5156_v11 }
  0x60   :  { %3011 = vmatpush2.bf16.msra.mxu0 %v4951_v57  ;;  %4925 = vmatpush2.bf16.msra.mxu1 %v4951_v57  ;;  %v2610_v54 = vmax.f32 %v2354_v26, 0.0  ;;  %v621_v57 = vcombine.high %v599_v12, %v599_v12  ;;  %v1530_v12 = vrot.slane %v623_v59, %v5167_v19  ;;  %v2614_v36 = vmax.f32 %v2358_v21, 0.0 }
  0x61   :  { %3012 = vmatprep.subr.bf16.mxu0 %v5102_v0  ;;  %4910 = vmatprep.subr.bf16.mxu1 %v5102_v0  ;;  %v1514_v0 = vrot.slane %v613_v30, %v5167_v19  ;;  %v1030_v7 = vrot.slane %v206_v38, %v5162_v16  ;;  %v1026_v48 = vrot.slane %v206_v38, %v5167_v19 }
  0x62   :  { %v5351_v27 = vpack.c.bf16 %v2610_v54, %v2608_v46  ;;  %v1522_v10 = vrot.slane %v621_v57, %v5167_v19  ;;  %v2357_v33 = vadd.f32 %v1530_v12, %v5187_v32  ;;  %v606_v46 = vrot.slane %v590_v43, %v5156_v11 }
  0x63   :  { %v2353_v47 = vadd.f32 %v1514_v0, %v5187_v32  ;;  %v224_v59 = vcombine.high %v220_v41, %v220_v41 }
  0x64   :  { %3013 = vmatpush2.bf16.msra.mxu0 %v4952_v15  ;;  %4926 = vmatpush2.bf16.msra.mxu1 %v4952_v15  ;;  %v2486_v15 = vmax.f32 %v2230_v63, 0.0  ;;  %v2355_v31 = vadd.f32 %v1522_v10, %v5187_v32  ;;  %v2613_v0 = vmax.f32 %v2357_v33, 0.0  ;;  %v1542_v54 = vrot.slane %v606_v46, %v5162_v16  ;;  %v4965_v33 = vld [vmem:[#allocation2 + $0x20] ss:$8 sps:$4 sm:$0xff]  }
  0x65   :  { %v2609_v55 = vmax.f32 %v2353_v47, 0.0  ;;  %v2232_v47 = vadd.f32 %v1030_v7, %v5174_v25 }
  0x66   :  { %v2611_v40 = vmax.f32 %v2355_v31, 0.0 }
  0x67   :  { %3015 = vmatmul.mubr.bf16.vlgmr.msra.gmra.mxu0 %v5212_v1  ;;  %3271 = vmatmul.mubr.bf16.vlgmr.msra.gmra.mxu1 %v5220_v14  ;;  %v5353_v62 = vpack.c.bf16 %v2609_v55, %v2607_v51  ;;  %v2228_v1 = vadd.f32 %v1014_v28, %v5174_v25  ;;  %v1526_v14 = vrot.slane %v621_v57, %v5162_v16  ;;  %v2488_v28 = vmax.f32 %v2232_v47, 0.0 }
  0x68   :  { %3022 = vmatprep.mubr.bf16.mxu0 %v5229_v29  ;;  %3278 = vmatprep.mubr.bf16.mxu1 %v5248_v20  ;;  %v1018_v29 = vrot.slane %v223_v52, %v5167_v19  ;;  %v2227_v20 = vadd.f32 %v1010_v60, %v5187_v32  ;;  %v5385_v26 = vpack.c.bf16 %v2613_v0, %v2611_v40 }
  0x69   :  { %v2484_v5 = vmax.f32 %v2228_v1, 0.0  ;;  %v2356_v8 = vadd.f32 %v1526_v14, %v5174_v25  ;;  %v1538_v55 = vrot.slane %v606_v46, %v5167_v19  ;;  %v2231_v57 = vadd.f32 %v1026_v48, %v5187_v32 }
  0x6a   :  { %v2229_v22 = vadd.f32 %v1018_v29, %v5187_v32  ;;  %v2483_v24 = vmax.f32 %v2227_v20, 0.0  ;;  %v2360_v14 = vadd.f32 %v1542_v54, %v5174_v25 }
  0x6b   :  { %v2612_v30 = vmax.f32 %v2356_v8, 0.0  ;;  %v5370_v35 = vpack.c.bf16 %v2486_v15, %v2484_v5  ;;  %v2487_v4 = vmax.f32 %v2231_v57, 0.0  ;;  %v2359_v20 = vadd.f32 %v1538_v55, %v5187_v32 }
  0x6c   :  { %v2485_v37 = vmax.f32 %v2229_v22, 0.0  ;;  %v2616_v12 = vmax.f32 %v2360_v14, 0.0  ;;  %v1054_v22 = vrot.slane %v224_v59, %v5162_v16 }
  0x6d   :  { %v5380_v44 = vpack.c.bf16 %v2614_v36, %v2612_v30  ;;  %v2615_v21 = vmax.f32 %v2359_v20, 0.0  ;;  %v622_v30 = vcombine.high %v606_v46, %v606_v46 }
  0x6e   :  { %v5382_v45 = vpack.c.bf16 %v2485_v37, %v2483_v24  ;;  %v2238_v34 = vadd.f32 %v1054_v22, %v5174_v25 }
  0x6f   :  { %3023 = vmatmul.mubr.bf16.gmra.mxu0 %v5241_v42  ;;  %3279 = vmatmul.mubr.bf16.gmra.mxu1 %v5261_v56  ;;  %v1038_v42 = vrot.slane %v220_v41, %v5162_v16  ;;  %v592_v56 = vcombine.high %v590_v43, %v590_v43  ;;  %v1558_v40 = vrot.slane %v622_v30, %v5162_v16 }
  0x70   :  { %3030 = vmatprep.mubr.bf16.mxu0 %v5273_v3  ;;  %3286 = vmatprep.mubr.bf16.mxu1 %v5283_v23  ;;  %v1034_v3 = vrot.slane %v220_v41, %v5167_v19  ;;  %v222_v23 = vcombine.high %v206_v38, %v206_v38  ;;  %v2494_v41 = vmax.f32 %v2238_v34, 0.0 }
  0x71   :  { %v2234_v51 = vadd.f32 %v1038_v42, %v5174_v25  ;;  %v620_v52 = vrot.slane %v592_v56, %v5156_v11  ;;  %v1554_v42 = vrot.slane %v622_v30, %v5167_v19  ;;  %v4967_v56 = vld [vmem:[#allocation2 + $0xa0] ss:$8 sps:$4 sm:$0xff]   ;;  %v2364_v46 = vadd.f32 %v1558_v40, %v5174_v25 }
  0x72   :  { %v2233_v58 = vadd.f32 %v1034_v3, %v5187_v32  ;;  %v1046_v5 = vrot.slane %v222_v23, %v5162_v16  ;;  %v1042_v37 = vrot.slane %v222_v23, %v5167_v19  ;;  %v233_v3 = vrot.slane %v4965_v33, %v5156_v11  ;;  %v4969_v23 = vld [vmem:[#allocation2 + $0x24] ss:$8 sps:$4 sm:$0xff]  }
  0x73   :  { %v2490_v60 = vmax.f32 %v2234_v51, 0.0  ;;  %v1550_v1 = vrot.slane %v620_v52, %v5162_v16  ;;  %v1546_v63 = vrot.slane %v620_v52, %v5167_v19  ;;  %v624_v31 = vcombine.high %v620_v52, %v620_v52 }
  0x74   :  { %v2489_v29 = vmax.f32 %v2233_v58, 0.0  ;;  %v2235_v43 = vadd.f32 %v1042_v37, %v5187_v32  ;;  %v2363_v55 = vadd.f32 %v1554_v42, %v5187_v32  ;;  %v249_v14 = vrot.slane %v233_v3, %v5156_v11 }
  0x75   :  { %v5405_v8 = vpack.c.bf16 %v2490_v60, %v2488_v28  ;;  %v2362_v10 = vadd.f32 %v1550_v1, %v5174_v25  ;;  %v2361_v13 = vadd.f32 %v1546_v63, %v5187_v32  ;;  %v1566_v0 = vrot.slane %v624_v31, %v5162_v16 }
  0x76   :  { %v5411_v15 = vpack.c.bf16 %v2489_v29, %v2487_v4  ;;  %v1562_v48 = vrot.slane %v624_v31, %v5167_v19  ;;  %v2491_v52 = vmax.f32 %v2235_v43, 0.0  ;;  %v2620_v28 = vmax.f32 %v2364_v46, 0.0 }
  0x77   :  { %3031 = vmatmul.mubr.bf16.gmra.mxu0 %v5280_v17  ;;  %3287 = vmatmul.mubr.bf16.gmra.mxu1 %v5290_v39  ;;  %v2236_v17 = vadd.f32 %v1046_v5, %v5174_v25  ;;  %v2618_v24 = vmax.f32 %v2362_v10, 0.0  ;;  %v2617_v39 = vmax.f32 %v2361_v13, 0.0  ;;  %v2366_v47 = vadd.f32 %v1566_v0, %v5174_v25 }
  0x78   :  { %3038 = vmatprep.mubr.bf16.mxu0 %v5303_v53  ;;  %3294 = vmatprep.mubr.bf16.mxu1 %v5312_v2  ;;  %v1050_v53 = vrot.slane %v224_v59, %v5167_v19  ;;  %v2365_v58 = vadd.f32 %v1562_v48, %v5187_v32  ;;  %v241_v59 = vcombine.high %v233_v3, %v233_v3  ;;  %v2619_v1 = vmax.f32 %v2363_v55, 0.0 }
  0x79   :  { %v2492_v36 = vmax.f32 %v2236_v17, 0.0  ;;  %v5418_v2 = vpack.c.bf16 %v2618_v24, %v2616_v12  ;;  %v5420_v38 = vpack.c.bf16 %v2617_v39, %v2615_v21  ;;  %v2622_v57 = vmax.f32 %v2366_v47, 0.0 }
  0x7a   :  { %v2237_v7 = vadd.f32 %v1050_v53, %v5187_v32  ;;  %v633_v63 = vrot.slane %v4967_v56, %v5156_v11  ;;  %v5447_v29 = vrot.slane %v4969_v23, %v5156_v11  ;;  %v1062_v20 = vrot.slane %v249_v14, %v5162_v16 }
  0x7b   :  { %v5431_v51 = vpack.c.bf16 %v2494_v41, %v2492_v36  ;;  %v5443_v4 = vpack.c.bf16 %v2622_v57, %v2620_v28  ;;  %v1058_v5 = vrot.slane %v249_v14, %v5167_v19  ;;  %v271_v21 = vcombine.high %v249_v14, %v249_v14 }
  0x7c   :  { %v2493_v54 = vmax.f32 %v2237_v7, 0.0  ;;  %v2240_v22 = vadd.f32 %v1062_v20, %v5174_v25 }
  0x7d   :  { %v2239_v39 = vadd.f32 %v1058_v5, %v5187_v32  ;;  %v1078_v46 = vrot.slane %v271_v21, %v5162_v16  ;;  %v1074_v28 = vrot.slane %v271_v21, %v5167_v19 }
  0x7e   :  { %v5439_v60 = vpack.c.bf16 %v2493_v54, %v2491_v52  ;;  %v2496_v36 = vmax.f32 %v2240_v22, 0.0 }
  0x7f   :  { %3039 = vmatmul.mubr.bf16.gmra.mxu0 %v5308_v61  ;;  %3295 = vmatmul.mubr.bf16.gmra.mxu1 %v5321_v18  ;;  %v2621_v61 = vmax.f32 %v2365_v58, 0.0  ;;  %v263_v18 = vrot.slane %v241_v59, %v5156_v11  ;;  %v2495_v40 = vmax.f32 %v2239_v39, 0.0  ;;  %v2244_v52 = vadd.f32 %v1078_v46, %v5174_v25 }
  0x80   :  { %3046 = vmatprep.mubr.bf16.mxu0 %v5340_v49  ;;  %3302 = vmatprep.mubr.bf16.mxu1 %v5351_v27  ;;  %v641_v49 = vcombine.high %v633_v63, %v633_v63  ;;  %v649_v27 = vrot.slane %v633_v63, %v5156_v11 }
  0x81   :  { %v5452_v10 = vpack.c.bf16 %v2621_v61, %v2619_v1  ;;  %v1070_v12 = vrot.slane %v263_v18, %v5162_v16  ;;  %v1066_v13 = vrot.slane %v263_v18, %v5167_v19  ;;  %v273_v34 = vcombine.high %v263_v18, %v263_v18 }
  0x82   :  { %v663_v17 = vrot.slane %v641_v49, %v5156_v11  ;;  %v1574_v24 = vrot.slane %v649_v27, %v5162_v16  ;;  %v1570_v33 = vrot.slane %v649_v27, %v5167_v19  ;;  %v2500_v59 = vmax.f32 %v2244_v52, 0.0  ;;  %v4970_v49 = vld [vmem:[#allocation2 + $0xa4] ss:$8 sps:$4 sm:$0xff]  }
  0x83   :  { %v2242_v30 = vadd.f32 %v1070_v12, %v5174_v25  ;;  %v2241_v31 = vadd.f32 %v1066_v13, %v5187_v32  ;;  %v1086_v47 = vrot.slane %v273_v34, %v5162_v16  ;;  %v1082_v57 = vrot.slane %v273_v34, %v5167_v19 }
  0x84   :  { %v1582_v37 = vrot.slane %v663_v17, %v5162_v16  ;;  %v2368_v53 = vadd.f32 %v1574_v24, %v5174_v25  ;;  %v1578_v43 = vrot.slane %v663_v17, %v5167_v19  ;;  %v2367_v7 = vadd.f32 %v1570_v33, %v5187_v32 }
  0x85   :  { %v2498_v0 = vmax.f32 %v2242_v30, 0.0  ;;  %v2497_v41 = vmax.f32 %v2241_v31, 0.0  ;;  %v673_v55 = vcombine.high %v663_v17, %v663_v17  ;;  %v2243_v18 = vadd.f32 %v1074_v28, %v5187_v32 }
  0x86   :  { %v2370_v42 = vadd.f32 %v1582_v37, %v5174_v25  ;;  %v2624_v56 = vmax.f32 %v2368_v53, 0.0  ;;  %v2369_v48 = vadd.f32 %v1578_v43, %v5187_v32  ;;  %v2623_v3 = vmax.f32 %v2367_v7, 0.0 }
  0x87   :  { %3047 = vmatmul.mubr.bf16.gmra.mxu0 %v5342_v50  ;;  %3303 = vmatmul.mubr.bf16.gmra.mxu1 %v5353_v62  ;;  %v5474_v50 = vpack.c.bf16 %v2498_v0, %v2496_v36  ;;  %v5476_v62 = vpack.c.bf16 %v2497_v41, %v2495_v40  ;;  %v1598_v61 = vrot.slane %v673_v55, %v5162_v16  ;;  %v2499_v22 = vmax.f32 %v2243_v18, 0.0 }
  0x88   :  { %3054 = vmatprep.mubr.bf16.mxu0 %v5370_v35  ;;  %3310 = vmatprep.mubr.bf16.mxu1 %v5380_v44  ;;  %v2626_v23 = vmax.f32 %v2370_v42, 0.0  ;;  %v2246_v35 = vadd.f32 %v1086_v47, %v5174_v25  ;;  %v671_v44 = vcombine.high %v649_v27, %v649_v27  ;;  %v2625_v54 = vmax.f32 %v2369_v48, 0.0 }
  0x89   :  { %v2245_v20 = vadd.f32 %v1082_v57, %v5187_v32  ;;  %v1594_v13 = vrot.slane %v673_v55, %v5167_v19  ;;  %v2374_v21 = vadd.f32 %v1598_v61, %v5174_v25  ;;  %v242_v24 = vcombine.high %v5447_v29, %v5447_v29 }
  0x8a   :  { %v5483_v58 = vpack.c.bf16 %v2626_v23, %v2624_v56  ;;  %v2502_v1 = vmax.f32 %v2246_v35, 0.0  ;;  %v1590_v14 = vrot.slane %v671_v44, %v5162_v16  ;;  %v5486_v63 = vpack.c.bf16 %v2625_v54, %v2623_v3 }
  0x8b   :  { %v1586_v12 = vrot.slane %v671_v44, %v5167_v19  ;;  %v2501_v17 = vmax.f32 %v2245_v20, 0.0  ;;  %v2373_v31 = vadd.f32 %v1594_v13, %v5187_v32  ;;  %v270_v34 = vrot.slane %v242_v24, %v5156_v11 }
  0x8c   :  { %v5491_v27 = vpack.c.bf16 %v2502_v1, %v2500_v59  ;;  %v2372_v5 = vadd.f32 %v1590_v14, %v5174_v25  ;;  %v640_v36 = vrot.slane %v4970_v49, %v5156_v11 }
  0x8d   :  { %v2371_v30 = vadd.f32 %v1586_v12, %v5187_v32  ;;  %v5507_v33 = vpack.c.bf16 %v2501_v17, %v2499_v22  ;;  %v2629_v53 = vmax.f32 %v2373_v31, 0.0  ;;  %v1102_v0 = vrot.slane %v270_v34, %v5162_v16 }
  0x8e   :  { %v2628_v39 = vmax.f32 %v2372_v5, 0.0  ;;  %v642_v41 = vcombine.high %v640_v36, %v640_v36  ;;  %v1098_v42 = vrot.slane %v270_v34, %v5167_v19  ;;  %v274_v14 = vcombine.high %v270_v34, %v270_v34 }
  0x8f   :  { %3055 = vmatmul.mubr.bf16.gmra.mxu0 %v5382_v45  ;;  %3311 = vmatmul.mubr.bf16.gmra.mxu1 %v5385_v26  ;;  %v256_v45 = vrot.slane %v5447_v29, %v5156_v11  ;;  %v2630_v26 = vmax.f32 %v2374_v21, 0.0  ;;  %v2627_v37 = vmax.f32 %v2371_v30, 0.0  ;;  %v656_v29 = vrot.slane %v640_v36, %v5156_v11  ;;  %v4971_v36 = vld [vmem:[#allocation2 + $0x30] ss:$8 sps:$4 sm:$0xff]  }
  0x90   :  { %3062 = vmatprep.mubr.bf16.mxu0 %v5405_v8  ;;  %3318 = vmatprep.mubr.bf16.mxu1 %v5418_v2  ;;  %v2250_v46 = vadd.f32 %v1102_v0, %v5174_v25  ;;  %v670_v47 = vrot.slane %v642_v41, %v5156_v11  ;;  %v2249_v52 = vadd.f32 %v1098_v42, %v5187_v32  ;;  %v4973_v0 = vld [vmem:[#allocation2 + $0xb0] ss:$8 sps:$4 sm:$0xff]   ;;  %v4975_v41 = vld [vmem:[#allocation2 + $0x34] ss:$8 sps:$4 sm:$0xff]  }
  0x91   :  { %v1094_v8 = vrot.slane %v256_v45, %v5162_v16  ;;  %v1090_v2 = vrot.slane %v256_v45, %v5167_v19  ;;  %v5513_v40 = vpack.c.bf16 %v2630_v26, %v2628_v39  ;;  %v5517_v43 = vpack.c.bf16 %v2629_v53, %v2627_v37 }
  0x92   :  { %v1606_v48 = vrot.slane %v656_v29, %v5162_v16  ;;  %v1602_v3 = vrot.slane %v656_v29, %v5167_v19  ;;  %v272_v44 = vcombine.high %v256_v45, %v256_v45  ;;  %v2506_v54 = vmax.f32 %v2250_v46, 0.0 }
  0x93   :  { %v2248_v7 = vadd.f32 %v1094_v8, %v5174_v25  ;;  %v2247_v56 = vadd.f32 %v1090_v2, %v5187_v32  ;;  %v1614_v55 = vrot.slane %v670_v47, %v5162_v16  ;;  %v1610_v57 = vrot.slane %v670_v47, %v5167_v19 }
  0x94   :  { %v2376_v28 = vadd.f32 %v1606_v48, %v5174_v25  ;;  %v2505_v59 = vmax.f32 %v2249_v52, 0.0  ;;  %v2375_v1 = vadd.f32 %v1602_v3, %v5187_v32  ;;  %v1110_v61 = vrot.slane %v272_v44, %v5162_v16 }
  0x95   :  { %v2504_v23 = vmax.f32 %v2248_v7, 0.0  ;;  %v2503_v35 = vmax.f32 %v2247_v56, 0.0  ;;  %v2377_v20 = vadd.f32 %v1610_v57, %v5187_v32  ;;  %v672_v21 = vcombine.high %v656_v29, %v656_v29 }
  0x96   :  { %v2632_v18 = vmax.f32 %v2376_v28, 0.0  ;;  %v2631_v5 = vmax.f32 %v2375_v1, 0.0  ;;  %v674_v22 = vcombine.high %v670_v47, %v670_v47  ;;  %v1106_v39 = vrot.slane %v272_v44, %v5167_v19 }
  0x97   :  { %3063 = vmatmul.mubr.bf16.gmra.mxu0 %v5411_v15  ;;  %3319 = vmatmul.mubr.bf16.gmra.mxu1 %v5420_v38  ;;  %v5536_v15 = vpack.c.bf16 %v2506_v54, %v2504_v23  ;;  %v2378_v38 = vadd.f32 %v1614_v55, %v5174_v25  ;;  %v5540_v49 = vpack.c.bf16 %v2505_v59, %v2503_v35  ;;  %v2633_v13 = vmax.f32 %v2377_v20, 0.0 }
  0x98   :  { %3070 = vmatprep.mubr.bf16.mxu0 %v5431_v51  ;;  %3326 = vmatprep.mubr.bf16.mxu1 %v5443_v4  ;;  %v1118_v51 = vrot.slane %v274_v14, %v5162_v16  ;;  %v2252_v4 = vadd.f32 %v1110_v61, %v5174_v25  ;;  %v1114_v30 = vrot.slane %v274_v14, %v5167_v19 }
  0x99   :  { %v2634_v12 = vmax.f32 %v2378_v38, 0.0  ;;  %v5549_v45 = vpack.c.bf16 %v2633_v13, %v2631_v5  ;;  %v1622_v26 = vrot.slane %v672_v21, %v5162_v16  ;;  %v1630_v34 = vrot.slane %v674_v22, %v5162_v16 }
  0x9a   :  { %v2254_v17 = vadd.f32 %v1118_v51, %v5174_v25  ;;  %v2508_v24 = vmax.f32 %v2252_v4, 0.0  ;;  %v2251_v53 = vadd.f32 %v1106_v39, %v5187_v32  ;;  %v2253_v8 = vadd.f32 %v1114_v30, %v5187_v32 }
  0x9b   :  { %v5547_v31 = vpack.c.bf16 %v2634_v12, %v2632_v18  ;;  %v1618_v2 = vrot.slane %v672_v21, %v5167_v19  ;;  %v2380_v29 = vadd.f32 %v1622_v26, %v5174_v25  ;;  %v2382_v7 = vadd.f32 %v1630_v34, %v5174_v25  ;;  %v5595_v12 = vld [vmem:[#allocation5 + $0x8] sm:$0xff] }
  0x9c   :  { %v2510_v37 = vmax.f32 %v2254_v17, 0.0  ;;  %v1626_v42 = vrot.slane %v674_v22, %v5167_v19  ;;  %v2507_v46 = vmax.f32 %v2251_v53, 0.0  ;;  %v2509_v47 = vmax.f32 %v2253_v8, 0.0 }
  0x9d   :  { %v2379_v48 = vadd.f32 %v1618_v2, %v5187_v32  ;;  %v2636_v3 = vmax.f32 %v2380_v29, 0.0  ;;  %v283_v23 = vrot.slane %v4971_v36, %v5156_v11  ;;  %v683_v35 = vrot.slane %v4973_v0, %v5156_v11 }
  0x9e   :  { %v5563_v56 = vpack.c.bf16 %v2510_v37, %v2508_v24  ;;  %v5568_v52 = vpack.c.bf16 %v2509_v47, %v2507_v46  ;;  %v5603_v24 = vld [vmem:[#allocation5] sm:$0xff] }
  0x9f   :  { %3071 = vmatmul.mubr.bf16.gmra.mxu0 %v5439_v60  ;;  %3327 = vmatmul.mubr.bf16.gmra.mxu1 %v5452_v10  ;;  %v2638_v60 = vmax.f32 %v2382_v7, 0.0  ;;  %v2381_v10 = vadd.f32 %v1626_v42, %v5187_v32  ;;  %v2635_v25 = vmax.f32 %v2379_v48, 0.0  ;;  %v291_v54 = vcombine.high %v283_v23, %v283_v23 }
  0xa0   :  { %3078 = vmatprep.mubr.bf16.mxu0 %v5474_v50  ;;  %3334 = vmatprep.mubr.bf16.mxu1 %v5483_v58  ;;  %v5572_v50 = vrot.slane %v4975_v41, %v5156_v11  ;;  %v299_v55 = vrot.slane %v283_v23, %v5156_v11  ;;  %v691_v28 = vcombine.high %v683_v35, %v683_v35 }
  0xa1   :  { %v5574_v58 = vpack.c.bf16 %v2638_v60, %v2636_v3  ;;  %v2637_v44 = vmax.f32 %v2381_v10, 0.0  ;;  %v699_v57 = vrot.slane %v683_v35, %v5156_v11  ;;  %v313_v14 = vrot.slane %v291_v54, %v5156_v11 }
  0xa2   :  { %v292_v32 = vcombine.high %v5572_v50, %v5572_v50  ;;  %v5582_v59 = vrot.slane %v5572_v50, %v5156_v11  ;;  %v1126_v61 = vrot.slane %v299_v55, %v5162_v16  ;;  %v1122_v38 = vrot.slane %v299_v55, %v5167_v19 }
  0xa3   :  { %v5584_v1 = vpack.c.bf16 %v2637_v44, %v2635_v25  ;;  %v713_v18 = vrot.slane %v691_v28, %v5156_v11  ;;  %v1638_v20 = vrot.slane %v699_v57, %v5162_v16  ;;  %v1634_v5 = vrot.slane %v699_v57, %v5167_v19 }
  0xa4   :  { %v321_v51 = vcombine.high %v299_v55, %v299_v55  ;;  %v1134_v4 = vrot.slane %v313_v14, %v5162_v16  ;;  %v2256_v13 = vadd.f32 %v5595_v12, %v1126_v61  ;;  %v1130_v21 = vrot.slane %v313_v14, %v5167_v19 }
  0xa5   :  { %v1646_v22 = vrot.slane %v713_v18, %v5162_v16  ;;  %v2384_v17 = vadd.f32 %v5595_v12, %v1638_v20  ;;  %v1642_v26 = vrot.slane %v713_v18, %v5167_v19  ;;  %v323_v2 = vcombine.high %v313_v14, %v313_v14 }
  0xa6   :  { %v2512_v39 = vmax.f32 %v2256_v13, 0.0  ;;  %v2257_v30 = vadd.f32 %v5603_v24, %v1130_v21  ;;  %v1142_v29 = vrot.slane %v321_v51, %v5162_v16  ;;  %v721_v7 = vcombine.high %v699_v57, %v699_v57 }
  0xa7   :  { %3079 = vmatmul.mubr.bf16.gmra.mxu0 %v5476_v62  ;;  %3335 = vmatmul.mubr.bf16.gmra.mxu1 %v5486_v63  ;;  %v2255_v62 = vadd.f32 %v5603_v24, %v1122_v38  ;;  %v2258_v63 = vadd.f32 %v5595_v12, %v1134_v4  ;;  %v2386_v34 = vadd.f32 %v5595_v12, %v1646_v22  ;;  %v4976_v38 = vld [vmem:[#allocation2 + $0xb4] ss:$8 sps:$4 sm:$0xff]  }
  0xa8   :  { %3086 = vmatprep.mubr.bf16.mxu0 %v5491_v27  ;;  %3342 = vmatprep.mubr.bf16.mxu1 %v5513_v40  ;;  %v2640_v27 = vmax.f32 %v2384_v17, 0.0  ;;  %v2383_v40 = vadd.f32 %v5603_v24, %v1634_v5  ;;  %v2513_v53 = vmax.f32 %v2257_v30, 0.0  ;;  %v2385_v8 = vadd.f32 %v5603_v24, %v1642_v26 }
  0xa9   :  { %v2511_v36 = vmax.f32 %v2255_v62, 0.0  ;;  %v2514_v37 = vmax.f32 %v2258_v63, 0.0  ;;  %v2642_v0 = vmax.f32 %v2386_v34, 0.0  ;;  %v1150_v48 = vrot.slane %v323_v2, %v5162_v16 }
  0xaa   :  { %v2639_v41 = vmax.f32 %v2383_v40, 0.0  ;;  %v2641_v47 = vmax.f32 %v2385_v8, 0.0  ;;  %v2260_v60 = vadd.f32 %v5595_v12, %v1142_v29  ;;  %v723_v10 = vcombine.high %v713_v18, %v713_v18 }
  0xab   :  { %v5613_v42 = vpack.c.bf16 %v2514_v37, %v2512_v39  ;;  %v5615_v46 = vpack.c.bf16 %v2513_v53, %v2511_v36  ;;  %v5618_v3 = vpack.c.bf16 %v2642_v0, %v2640_v27  ;;  %v1654_v23 = vrot.slane %v721_v7, %v5162_v16 }
  0xac   :  { %v5624_v25 = vpack.c.bf16 %v2641_v47, %v2639_v41  ;;  %v2262_v35 = vadd.f32 %v5595_v12, %v1150_v48  ;;  %v1138_v44 = vrot.slane %v321_v51, %v5167_v19  ;;  %v2516_v54 = vmax.f32 %v2260_v60, 0.0 }
  0xad   :  { %v1662_v55 = vrot.slane %v723_v10, %v5162_v16  ;;  %v2388_v28 = vadd.f32 %v5595_v12, %v1654_v23  ;;  %v1146_v57 = vrot.slane %v323_v2, %v5167_v19  ;;  %v1650_v14 = vrot.slane %v721_v7, %v5167_v19 }
  0xae   :  { %v1658_v61 = vrot.slane %v723_v10, %v5167_v19  ;;  %v320_v20 = vrot.slane %v292_v32, %v5156_v11  ;;  %v1158_v17 = vrot.slane %v5582_v59, %v5162_v16  ;;  %v690_v30 = vrot.slane %v4976_v38, %v5156_v11 }
  0xaf   :  { %3087 = vmatmul.mubr.bf16.gmra.mxu0 %v5507_v33  ;;  %3343 = vmatmul.mubr.bf16.gmra.mxu1 %v5517_v43  ;;  %v2518_v33 = vmax.f32 %v2262_v35, 0.0  ;;  %v2259_v43 = vadd.f32 %v5603_v24, %v1138_v44  ;;  %v2390_v18 = vadd.f32 %v5595_v12, %v1662_v55  ;;  %v2387_v4 = vadd.f32 %v5603_v24, %v1650_v14 }
  0xb0   :  { %3094 = vmatprep.mubr.bf16.mxu0 %v5536_v15  ;;  %3350 = vmatprep.mubr.bf16.mxu1 %v5547_v31  ;;  %v2644_v15 = vmax.f32 %v2388_v28, 0.0  ;;  %v2261_v31 = vadd.f32 %v5603_v24, %v1146_v57  ;;  %v2389_v13 = vadd.f32 %v5603_v24, %v1658_v61  ;;  %v1166_v62 = vrot.slane %v320_v20, %v5162_v16 }
  0xb1   :  { %v5642_v5 = vpack.c.bf16 %v2518_v33, %v2516_v54  ;;  %v2515_v51 = vmax.f32 %v2259_v43, 0.0  ;;  %v2646_v21 = vmax.f32 %v2390_v18, 0.0  ;;  %v2643_v63 = vmax.f32 %v2387_v4, 0.0 }
  0xb2   :  { %v2517_v22 = vmax.f32 %v2261_v31, 0.0  ;;  %v2645_v39 = vmax.f32 %v2389_v13, 0.0  ;;  %v1154_v50 = vrot.slane %v5582_v59, %v5167_v19  ;;  %v2264_v34 = vadd.f32 %v5595_v12, %v1158_v17 }
  0xb3   :  { %v5652_v32 = vpack.c.bf16 %v2646_v21, %v2644_v15  ;;  %v2266_v27 = vadd.f32 %v5595_v12, %v1166_v62  ;;  %v692_v40 = vcombine.high %v690_v30, %v690_v30  ;;  %v706_v37 = vrot.slane %v690_v30, %v5156_v11 }
  0xb4   :  { %v5654_v26 = vpack.c.bf16 %v2517_v22, %v2515_v51  ;;  %v5660_v36 = vpack.c.bf16 %v2645_v39, %v2643_v63  ;;  %v2520_v53 = vmax.f32 %v2264_v34, 0.0  ;;  %v1162_v2 = vrot.slane %v320_v20, %v5167_v19  ;;  %v4977_v51 = vld [vmem:[#allocation2 + $0x40] ss:$8 sps:$4 sm:$0xff]   ;;  %v4981_v39 = vld [vmem:[#allocation2 + $0x44] ss:$8 sps:$4 sm:$0xff]  }
  0xb5   :  { %v2522_v8 = vmax.f32 %v2266_v27, 0.0  ;;  %v2263_v0 = vadd.f32 %v5603_v24, %v1154_v50  ;;  %v720_v41 = vrot.slane %v692_v40, %v5156_v11  ;;  %v322_v29 = vcombine.high %v5582_v59, %v5582_v59 }
  0xb6   :  { %v324_v47 = vcombine.high %v320_v20, %v320_v20  ;;  %v722_v59 = vcombine.high %v706_v37, %v706_v37 }
  0xb7   :  { %3095 = vmatmul.mubr.bf16.gmra.mxu0 %v5540_v49  ;;  %3351 = vmatmul.mubr.bf16.gmra.mxu1 %v5549_v45  ;;  %v1670_v49 = vrot.slane %v706_v37, %v5162_v16  ;;  %v1666_v45 = vrot.slane %v706_v37, %v5167_v19  ;;  %v5672_v7 = vpack.c.bf16 %v2522_v8, %v2520_v53 }
  0xb8   :  { %3102 = vmatprep.mubr.bf16.mxu0 %v5563_v56  ;;  %3358 = vmatprep.mubr.bf16.mxu1 %v5574_v58  ;;  %v2265_v56 = vadd.f32 %v5603_v24, %v1162_v2  ;;  %v2519_v58 = vmax.f32 %v2263_v0, 0.0  ;;  %v1678_v48 = vrot.slane %v720_v41, %v5162_v16  ;;  %v1674_v10 = vrot.slane %v720_v41, %v5167_v19 }
  0xb9   :  { %v2392_v60 = vadd.f32 %v5595_v12, %v1670_v49  ;;  %v2391_v23 = vadd.f32 %v5603_v24, %v1666_v45  ;;  %v1174_v44 = vrot.slane %v322_v29, %v5162_v16  ;;  %v1182_v54 = vrot.slane %v324_v47, %v5162_v16 }
  0xba   :  { %v2521_v35 = vmax.f32 %v2265_v56, 0.0  ;;  %v2394_v55 = vadd.f32 %v5595_v12, %v1678_v48  ;;  %v2393_v57 = vadd.f32 %v5603_v24, %v1674_v10  ;;  %v724_v38 = vcombine.high %v720_v41, %v720_v41 }
  0xbb   :  { %v2648_v28 = vmax.f32 %v2392_v60, 0.0  ;;  %v2647_v33 = vmax.f32 %v2391_v23, 0.0  ;;  %v2268_v14 = vadd.f32 %v5595_v12, %v1174_v44  ;;  %v2270_v61 = vadd.f32 %v5595_v12, %v1182_v54 }
  0xbc   :  { %v5683_v43 = vpack.c.bf16 %v2521_v35, %v2519_v58  ;;  %v2650_v18 = vmax.f32 %v2394_v55, 0.0  ;;  %v2649_v15 = vmax.f32 %v2393_v57, 0.0  ;;  %v1686_v31 = vrot.slane %v722_v59, %v5162_v16 }
  0xbd   :  { %v1170_v20 = vrot.slane %v322_v29, %v5167_v19  ;;  %v2524_v4 = vmax.f32 %v2268_v14, 0.0  ;;  %v2526_v13 = vmax.f32 %v2270_v61, 0.0  ;;  %v1694_v21 = vrot.slane %v724_v38, %v5162_v16 }
  0xbe   :  { %v1178_v22 = vrot.slane %v324_v47, %v5167_v19  ;;  %v5695_v17 = vpack.c.bf16 %v2650_v18, %v2648_v28  ;;  %v2396_v62 = vadd.f32 %v5595_v12, %v1686_v31  ;;  %v1682_v50 = vrot.slane %v722_v59, %v5167_v19 }
  0xbf   :  { %3103 = vmatmul.mubr.bf16.gmra.mxu0 %v5568_v52  ;;  %3359 = vmatmul.mubr.bf16.gmra.mxu1 %v5584_v1  ;;  %v4979_v52 = vld [vmem:[#allocation2 + $0xc0] ss:$8 sps:$4 sm:$0xff]   ;;  %v5697_v1 = vpack.c.bf16 %v2649_v15, %v2647_v33  ;;  %v2267_v63 = vadd.f32 %v5603_v24, %v1170_v20  ;;  %v5701_v30 = vpack.c.bf16 %v2526_v13, %v2524_v4 }
  0xc0   :  { %3110 = vmatprep.mubr.bf16.mxu0 %v5613_v42  ;;  %3366 = vmatprep.mubr.bf16.mxu1 %v5618_v3  ;;  %v2398_v42 = vadd.f32 %v5595_v12, %v1694_v21  ;;  %v2269_v3 = vadd.f32 %v5603_v24, %v1178_v22  ;;  %v2652_v34 = vmax.f32 %v2396_v62, 0.0  ;;  %v1690_v40 = vrot.slane %v724_v38, %v5167_v19 }
  0xc1   :  { %v2523_v27 = vmax.f32 %v2267_v63, 0.0  ;;  %v333_v37 = vrot.slane %v4977_v51, %v5156_v11  ;;  %v2395_v2 = vadd.f32 %v5603_v24, %v1682_v50  ;;  %v733_v0 = vrot.slane %v4979_v52, %v5156_v11 }
  0xc2   :  { %v2654_v53 = vmax.f32 %v2398_v42, 0.0  ;;  %v2525_v8 = vmax.f32 %v2269_v3, 0.0  ;;  %v2397_v41 = vadd.f32 %v5603_v24, %v1690_v40  ;;  %v5713_v29 = vrot.slane %v4981_v39, %v5156_v11 }
  0xc3   :  { %v341_v49 = vcombine.high %v333_v37, %v333_v37  ;;  %v349_v45 = vrot.slane %v333_v37, %v5156_v11  ;;  %v2651_v47 = vmax.f32 %v2395_v2, 0.0  ;;  %v741_v48 = vcombine.high %v733_v0, %v733_v0 }
  0xc4   :  { %v5715_v56 = vpack.c.bf16 %v2654_v53, %v2652_v34  ;;  %v5717_v58 = vpack.c.bf16 %v2525_v8, %v2523_v27  ;;  %v2653_v60 = vmax.f32 %v2397_v41, 0.0  ;;  %v749_v35 = vrot.slane %v733_v0, %v5156_v11 }
  0xc5   :  { %v363_v10 = vrot.slane %v341_v49, %v5156_v11  ;;  %v1190_v23 = vrot.slane %v349_v45, %v5162_v16  ;;  %v763_v44 = vrot.slane %v741_v48, %v5156_v11  ;;  %v1186_v54 = vrot.slane %v349_v45, %v5167_v19  ;;  %v4982_v48 = vld [vmem:[#allocation2 + $0xc4] ss:$8 sps:$4 sm:$0xff]  }
  0xc6   :  { %v371_v59 = vcombine.high %v349_v45, %v349_v45  ;;  %v5728_v55 = vpack.c.bf16 %v2653_v60, %v2651_v47  ;;  %v1702_v28 = vrot.slane %v749_v35, %v5162_v16  ;;  %v771_v34 = vcombine.high %v749_v35, %v749_v35 }
  0xc7   :  { %3111 = vmatmul.mubr.bf16.gmra.mxu0 %v5615_v46  ;;  %3367 = vmatmul.mubr.bf16.gmra.mxu1 %v5624_v25  ;;  %v1198_v46 = vrot.slane %v363_v10, %v5162_v16  ;;  %v2272_v25 = vadd.f32 %v5595_v12, %v1190_v23  ;;  %v1710_v57 = vrot.slane %v763_v44, %v5162_v16 }
  0xc8   :  { %3118 = vmatprep.mubr.bf16.mxu0 %v5642_v5  ;;  %3374 = vmatprep.mubr.bf16.mxu1 %v5652_v32  ;;  %v1194_v33 = vrot.slane %v363_v10, %v5167_v19  ;;  %v2271_v5 = vadd.f32 %v5603_v24, %v1186_v54  ;;  %v1698_v32 = vrot.slane %v749_v35, %v5167_v19 }
  0xc9   :  { %v2274_v14 = vadd.f32 %v5595_v12, %v1198_v46  ;;  %v2528_v61 = vmax.f32 %v2272_v25, 0.0  ;;  %v2400_v38 = vadd.f32 %v5595_v12, %v1702_v28  ;;  %v1706_v18 = vrot.slane %v763_v44, %v5167_v19 }
  0xca   :  { %v2402_v15 = vadd.f32 %v5595_v12, %v1710_v57  ;;  %v2273_v31 = vadd.f32 %v5603_v24, %v1194_v33  ;;  %v2527_v20 = vmax.f32 %v2271_v5, 0.0  ;;  %v2399_v51 = vadd.f32 %v5603_v24, %v1698_v32 }
  0xcb   :  { %v2530_v4 = vmax.f32 %v2274_v14, 0.0  ;;  %v2656_v13 = vmax.f32 %v2400_v38, 0.0  ;;  %v2401_v21 = vadd.f32 %v5603_v24, %v1706_v18  ;;  %v373_v22 = vcombine.high %v363_v10, %v363_v10 }
  0xcc   :  { %v2658_v52 = vmax.f32 %v2402_v15, 0.0  ;;  %v2529_v62 = vmax.f32 %v2273_v31, 0.0  ;;  %v2655_v63 = vmax.f32 %v2399_v51, 0.0  ;;  %v1206_v39 = vrot.slane %v371_v59, %v5162_v16 }
  0xcd   :  { %v5747_v42 = vpack.c.bf16 %v2530_v4, %v2528_v61  ;;  %v2657_v3 = vmax.f32 %v2401_v21, 0.0  ;;  %v1214_v50 = vrot.slane %v373_v22, %v5162_v16  ;;  %v1718_v8 = vrot.slane %v771_v34, %v5162_v16 }
  0xce   :  { %v5752_v27 = vpack.c.bf16 %v2658_v52, %v2656_v13  ;;  %v5754_v40 = vpack.c.bf16 %v2529_v62, %v2527_v20  ;;  %v2276_v37 = vadd.f32 %v5595_v12, %v1206_v39  ;;  %v1202_v0 = vrot.slane %v371_v59, %v5167_v19 }
  0xcf   :  { %3119 = vmatmul.mubr.bf16.gmra.mxu0 %v5654_v26  ;;  %3375 = vmatmul.mubr.bf16.gmra.mxu1 %v5660_v36  ;;  %v5757_v53 = vpack.c.bf16 %v2657_v3, %v2655_v63  ;;  %v2278_v26 = vadd.f32 %v5595_v12, %v1214_v50  ;;  %v773_v36 = vcombine.high %v763_v44, %v763_v44 }
  0xd0   :  { %3126 = vmatprep.mubr.bf16.mxu0 %v5672_v7  ;;  %3382 = vmatprep.mubr.bf16.mxu1 %v5695_v17  ;;  %v2532_v2 = vmax.f32 %v2276_v37, 0.0  ;;  %v1210_v7 = vrot.slane %v373_v22, %v5167_v19  ;;  %v1714_v17 = vrot.slane %v771_v34, %v5167_v19  ;;  %v2404_v45 = vadd.f32 %v5595_v12, %v1718_v8 }
  0xd1   :  { %v2534_v41 = vmax.f32 %v2278_v26, 0.0  ;;  %v1726_v49 = vrot.slane %v773_v36, %v5162_v16  ;;  %v1722_v47 = vrot.slane %v773_v36, %v5167_v19  ;;  %v2275_v60 = vadd.f32 %v5603_v24, %v1202_v0 }
  0xd2   :  { %v2277_v10 = vadd.f32 %v5603_v24, %v1210_v7  ;;  %v2403_v23 = vadd.f32 %v5603_v24, %v1714_v17  ;;  %v342_v35 = vcombine.high %v5713_v29, %v5713_v29  ;;  %v2660_v59 = vmax.f32 %v2404_v45, 0.0 }
  0xd3   :  { %v5772_v44 = vpack.c.bf16 %v2534_v41, %v2532_v2  ;;  %v2406_v54 = vadd.f32 %v5595_v12, %v1726_v49  ;;  %v2405_v46 = vadd.f32 %v5603_v24, %v1722_v47  ;;  %v2531_v25 = vmax.f32 %v2275_v60, 0.0 }
  0xd4   :  { %v2533_v28 = vmax.f32 %v2277_v10, 0.0  ;;  %v2659_v57 = vmax.f32 %v2403_v23, 0.0  ;;  %v356_v33 = vrot.slane %v5713_v29, %v5156_v11  ;;  %v370_v14 = vrot.slane %v342_v35, %v5156_v11 }
  0xd5   :  { %v2662_v5 = vmax.f32 %v2406_v54, 0.0  ;;  %v2661_v32 = vmax.f32 %v2405_v46, 0.0  ;;  %v740_v61 = vrot.slane %v4982_v48, %v5156_v11 }
  0xd6   :  { %v5784_v38 = vpack.c.bf16 %v2533_v28, %v2531_v25  ;;  %v1222_v18 = vrot.slane %v356_v33, %v5162_v16  ;;  %v1218_v29 = vrot.slane %v356_v33, %v5167_v19  ;;  %v372_v21 = vcombine.high %v356_v33, %v356_v33  ;;  %v4985_v28 = vld [vmem:[#allocation2 + $0xd0] ss:$8 sps:$4 sm:$0xff]  }
  0xd7   :  { %3127 = vmatmul.mubr.bf16.gmra.mxu0 %v5683_v43  ;;  %3383 = vmatmul.mubr.bf16.gmra.mxu1 %v5697_v1  ;;  %v5788_v15 = vpack.c.bf16 %v2662_v5, %v2660_v59  ;;  %v5790_v43 = vpack.c.bf16 %v2661_v32, %v2659_v57  ;;  %v1230_v1 = vrot.slane %v370_v14, %v5162_v16 }
  0xd8   :  { %3134 = vmatprep.mubr.bf16.mxu0 %v5701_v30  ;;  %3390 = vmatprep.mubr.bf16.mxu1 %v5715_v56  ;;  %v742_v31 = vcombine.high %v740_v61, %v740_v61  ;;  %v2280_v20 = vadd.f32 %v5595_v12, %v1222_v18  ;;  %v756_v51 = vrot.slane %v740_v61, %v5156_v11 }
  0xd9   :  { %v1226_v30 = vrot.slane %v370_v14, %v5167_v19  ;;  %v2279_v56 = vadd.f32 %v5603_v24, %v1218_v29  ;;  %v2282_v4 = vadd.f32 %v5595_v12, %v1230_v1  ;;  %v374_v22 = vcombine.high %v370_v14, %v370_v14 }
  0xda   :  { %v770_v13 = vrot.slane %v742_v31, %v5156_v11  ;;  %v2536_v52 = vmax.f32 %v2280_v20, 0.0  ;;  %v1734_v62 = vrot.slane %v756_v51, %v5162_v16  ;;  %v1730_v34 = vrot.slane %v756_v51, %v5167_v19 }
  0xdb   :  { %v2281_v63 = vadd.f32 %v5603_v24, %v1226_v30  ;;  %v2535_v39 = vmax.f32 %v2279_v56, 0.0  ;;  %v2538_v3 = vmax.f32 %v2282_v4, 0.0  ;;  %v1238_v8 = vrot.slane %v372_v21, %v5162_v16 }
  0xdc   :  { %v1742_v50 = vrot.slane %v770_v13, %v5162_v16  ;;  %v1738_v37 = vrot.slane %v770_v13, %v5167_v19  ;;  %v2408_v26 = vadd.f32 %v5595_v12, %v1734_v62  ;;  %v1246_v2 = vrot.slane %v374_v22, %v5162_v16 }
  0xdd   :  { %v2537_v36 = vmax.f32 %v2281_v63, 0.0  ;;  %v5809_v0 = vpack.c.bf16 %v2538_v3, %v2536_v52  ;;  %v2407_v17 = vadd.f32 %v5603_v24, %v1730_v34  ;;  %v2284_v47 = vadd.f32 %v5595_v12, %v1238_v8 }
  0xde   :  { %v2410_v7 = vadd.f32 %v5595_v12, %v1742_v50  ;;  %v2664_v41 = vmax.f32 %v2408_v26, 0.0  ;;  %v2409_v45 = vadd.f32 %v5603_v24, %v1738_v37  ;;  %v772_v60 = vcombine.high %v756_v51, %v756_v51 }
  0xdf   :  { %3135 = vmatmul.mubr.bf16.gmra.mxu0 %v5717_v58  ;;  %3391 = vmatmul.mubr.bf16.gmra.mxu1 %v5728_v55  ;;  %v5815_v49 = vpack.c.bf16 %v2537_v36, %v2535_v39  ;;  %v2663_v48 = vmax.f32 %v2407_v17, 0.0  ;;  %v2286_v55 = vadd.f32 %v5595_v12, %v1246_v2  ;;  %v2540_v23 = vmax.f32 %v2284_v47, 0.0 }
  0xe0   :  { %3142 = vmatprep.mubr.bf16.mxu0 %v5747_v42  ;;  %3398 = vmatprep.mubr.bf16.mxu1 %v5752_v27  ;;  %v2666_v58 = vmax.f32 %v2410_v7, 0.0  ;;  %v2665_v10 = vmax.f32 %v2409_v45, 0.0  ;;  %v774_v35 = vcombine.high %v770_v13, %v770_v13  ;;  %v1234_v54 = vrot.slane %v372_v21, %v5167_v19  ;;  %v4983_v42 = vld [vmem:[#allocation2 + $0x50] ss:$8 sps:$4 sm:$0xff]  }
  0xe1   :  { %v2542_v27 = vmax.f32 %v2286_v55, 0.0  ;;  %v1750_v46 = vrot.slane %v772_v60, %v5162_v16  ;;  %v1242_v25 = vrot.slane %v374_v22, %v5167_v19  ;;  %v1746_v32 = vrot.slane %v772_v60, %v5167_v19 }
  0xe2   :  { %v2820_v59 = vpack.c.bf16 %v2666_v58, %v2664_v41  ;;  %v5823_v57 = vpack.c.bf16 %v2665_v10, %v2663_v48  ;;  %v1758_v33 = vrot.slane %v774_v35, %v5162_v16  ;;  %v2283_v5 = vadd.f32 %v5603_v24, %v1234_v54 }
  0xe3   :  { %v5828_v14 = vpack.c.bf16 %v2542_v27, %v2540_v23  ;;  %v2412_v61 = vadd.f32 %v5595_v12, %v1750_v46  ;;  %v2285_v18 = vadd.f32 %v5603_v24, %v1242_v25  ;;  %v1754_v29 = vrot.slane %v774_v35, %v5167_v19 }
  0xe4   :  { %v2414_v1 = vadd.f32 %v5595_v12, %v1758_v33  ;;  %v2539_v31 = vmax.f32 %v2283_v5, 0.0  ;;  %v2411_v20 = vadd.f32 %v5603_v24, %v1746_v32  ;;  %v383_v51 = vrot.slane %v4983_v42, %v5156_v11 }
  0xe5   :  { %v2668_v30 = vmax.f32 %v2412_v61, 0.0  ;;  %v2541_v56 = vmax.f32 %v2285_v18, 0.0  ;;  %v2413_v4 = vadd.f32 %v5603_v24, %v1754_v29  ;;  %v783_v13 = vrot.slane %v4985_v28, %v5156_v11 }
  0xe6   :  { %v2670_v21 = vmax.f32 %v2414_v1, 0.0  ;;  %v2667_v22 = vmax.f32 %v2411_v20, 0.0  ;;  %v391_v52 = vcombine.high %v383_v51, %v383_v51  ;;  %v399_v62 = vrot.slane %v383_v51, %v5156_v11 }
  0xe7   :  { %3143 = vmatmul.mubr.bf16.gmra.mxu0 %v5754_v40  ;;  %3399 = vmatmul.mubr.bf16.gmra.mxu1 %v5757_v53  ;;  %v5843_v63 = vpack.c.bf16 %v2541_v56, %v2539_v31  ;;  %v2669_v40 = vmax.f32 %v2413_v4, 0.0  ;;  %v791_v39 = vcombine.high %v783_v13, %v783_v13  ;;  %v799_v53 = vrot.slane %v783_v13, %v5156_v11  ;;  %v4987_v4 = vld [vmem:[#allocation2 + $0x54] ss:$8 sps:$4 sm:$0xff]  }
  0xe8   :  { %3150 = vmatprep.mubr.bf16.mxu0 %v5772_v44  ;;  %3406 = vmatprep.mubr.bf16.mxu1 %v5788_v15  ;;  %v5846_v3 = vpack.c.bf16 %v2670_v21, %v2668_v30  ;;  %v413_v50 = vrot.slane %v391_v52, %v5156_v11  ;;  %v1254_v34 = vrot.slane %v399_v62, %v5162_v16 }
  0xe9   :  { %v1250_v44 = vrot.slane %v399_v62, %v5167_v19  ;;  %v5851_v15 = vpack.c.bf16 %v2669_v40, %v2667_v22  ;;  %v813_v37 = vrot.slane %v791_v39, %v5156_v11  ;;  %v1766_v26 = vrot.slane %v799_v53, %v5162_v16 }
  0xea   :  { %v1762_v36 = vrot.slane %v799_v53, %v5167_v19  ;;  %v1262_v8 = vrot.slane %v413_v50, %v5162_v16  ;;  %v2288_v2 = vadd.f32 %v5595_v12, %v1254_v34  ;;  %v1258_v7 = vrot.slane %v413_v50, %v5167_v19  ;;  %v4989_v34 = vld [vmem:[#allocation2 + $0x60] ss:$8 sps:$4 sm:$0xff]  }
  0xeb   :  { %v2287_v17 = vadd.f32 %v5603_v24, %v1250_v44  ;;  %v1774_v41 = vrot.slane %v813_v37, %v5162_v16  ;;  %v2416_v45 = vadd.f32 %v5595_v12, %v1766_v26  ;;  %v1770_v47 = vrot.slane %v813_v37, %v5167_v19 }
  0xec   :  { %v2415_v58 = vadd.f32 %v5603_v24, %v1762_v36  ;;  %v2290_v48 = vadd.f32 %v5595_v12, %v1262_v8  ;;  %v2544_v55 = vmax.f32 %v2288_v2, 0.0  ;;  %v2289_v60 = vadd.f32 %v5603_v24, %v1258_v7  ;;  %v4991_v8 = vld [vmem:[#allocation2 + $0xe0] ss:$8 sps:$4 sm:$0xff]  }
  0xed   :  { %v2543_v10 = vmax.f32 %v2287_v17, 0.0  ;;  %v2418_v23 = vadd.f32 %v5595_v12, %v1774_v41  ;;  %v2672_v35 = vmax.f32 %v2416_v45, 0.0  ;;  %v2417_v54 = vadd.f32 %v5603_v24, %v1770_v47 }
  0xee   :  { %v2671_v42 = vmax.f32 %v2415_v58, 0.0  ;;  %v2546_v27 = vmax.f32 %v2290_v48, 0.0  ;;  %v2545_v46 = vmax.f32 %v2289_v60, 0.0  ;;  %v421_v25 = vcombine.high %v399_v62, %v399_v62  ;;  %v4988_v62 = vld [vmem:[#allocation2 + $0xd4] ss:$8 sps:$4 sm:$0xff]  }
  0xef   :  { %3151 = vmatmul.mubr.bf16.gmra.mxu0 %v5784_v38  ;;  %3407 = vmatmul.mubr.bf16.gmra.mxu1 %v5790_v43  ;;  %v423_v28 = vcombine.high %v413_v50, %v413_v50  ;;  %v2674_v33 = vmax.f32 %v2418_v23, 0.0  ;;  %v2673_v5 = vmax.f32 %v2417_v54, 0.0  ;;  %v821_v32 = vcombine.high %v799_v53, %v799_v53 }
  0xf0   :  { %3158 = vmatprep.mubr.bf16.mxu0 %v5809_v0  ;;  %3414 = vmatprep.mubr.bf16.mxu1 %v2820_v59  ;;  %v823_v61 = vcombine.high %v813_v37, %v813_v37  ;;  %v5871_v38 = vpack.c.bf16 %v2546_v27, %v2544_v55  ;;  %v5873_v43 = vpack.c.bf16 %v2545_v46, %v2543_v10 }
  0xf1   :  { %v1270_v18 = vrot.slane %v421_v25, %v5162_v16  ;;  %v1278_v29 = vrot.slane %v423_v28, %v5162_v16  ;;  %v2824_v1 = vpack.c.bf16 %v2674_v33, %v2672_v35  ;;  %v5877_v31 = vpack.c.bf16 %v2673_v5, %v2671_v42 }
  0xf2   :  { %v1782_v0 = vrot.slane %v821_v32, %v5162_v16  ;;  %v1790_v59 = vrot.slane %v823_v61, %v5162_v16  ;;  %v1266_v30 = vrot.slane %v421_v25, %v5167_v19  ;;  %v1274_v56 = vrot.slane %v423_v28, %v5167_v19 }
  0xf3   :  { %v2292_v20 = vadd.f32 %v5595_v12, %v1270_v18  ;;  %v2294_v51 = vadd.f32 %v5595_v12, %v1278_v29  ;;  %v1778_v22 = vrot.slane %v821_v32, %v5167_v19  ;;  %v1786_v52 = vrot.slane %v823_v61, %v5167_v19 }
  0xf4   :  { %v2420_v13 = vadd.f32 %v5595_v12, %v1782_v0  ;;  %v2422_v21 = vadd.f32 %v5595_v12, %v1790_v59  ;;  %v2291_v53 = vadd.f32 %v5603_v24, %v1266_v30  ;;  %v2293_v50 = vadd.f32 %v5603_v24, %v1274_v56 }
  0xf5   :  { %v2548_v40 = vmax.f32 %v2292_v20, 0.0  ;;  %v2550_v39 = vmax.f32 %v2294_v51, 0.0  ;;  %v2419_v26 = vadd.f32 %v5603_v24, %v1778_v22  ;;  %v2421_v36 = vadd.f32 %v5603_v24, %v1786_v52 }
  0xf6   :  { %v2676_v44 = vmax.f32 %v2420_v13, 0.0  ;;  %v2678_v37 = vmax.f32 %v2422_v21, 0.0  ;;  %v2547_v7 = vmax.f32 %v2291_v53, 0.0  ;;  %v2549_v17 = vmax.f32 %v2293_v50, 0.0 }
  0xf7   :  { %3159 = vmatmul.mubr.bf16.gmra.mxu0 %v5815_v49  ;;  %3415 = vmatmul.mubr.bf16.gmra.mxu1 %v5823_v57  ;;  %v5897_v2 = vpack.c.bf16 %v2550_v39, %v2548_v40  ;;  %v390_v41 = vrot.slane %v4987_v4, %v5156_v11  ;;  %v2675_v57 = vmax.f32 %v2419_v26, 0.0  ;;  %v2677_v45 = vmax.f32 %v2421_v36, 0.0 }
  0xf8   :  { %3166 = vmatprep.mubr.bf16.mxu0 %v5828_v14  ;;  %3422 = vmatprep.mubr.bf16.mxu1 %v5846_v3  ;;  %v5900_v49 = vpack.c.bf16 %v2678_v37, %v2676_v44  ;;  %v790_v47 = vrot.slane %v4988_v62, %v5156_v11  ;;  %v5903_v58 = vpack.c.bf16 %v2549_v17, %v2547_v7 }
  0xf9   :  { %v392_v48 = vcombine.high %v390_v41, %v390_v41  ;;  %v406_v55 = vrot.slane %v390_v41, %v5156_v11  ;;  %v5907_v14 = vrot.slane %v4989_v34, %v5156_v11  ;;  %v5909_v3 = vpack.c.bf16 %v2677_v45, %v2675_v57 }
  0xfa   :  { %v792_v60 = vcombine.high %v790_v47, %v790_v47  ;;  %v806_v10 = vrot.slane %v790_v47, %v5156_v11  ;;  %v5913_v23 = vrot.slane %v4991_v8, %v5156_v11 }
  0xfb   :  { %v420_v35 = vrot.slane %v392_v48, %v5156_v11  ;;  %v1286_v54 = vrot.slane %v406_v55, %v5162_v16  ;;  %v1282_v42 = vrot.slane %v406_v55, %v5167_v19  ;;  %v422_v27 = vcombine.high %v406_v55, %v406_v55 }
  0xfc   :  { %v820_v46 = vrot.slane %v792_v60, %v5156_v11  ;;  %v1798_v25 = vrot.slane %v806_v10, %v5162_v16  ;;  %v1794_v28 = vrot.slane %v806_v10, %v5167_v19  ;;  %v822_v33 = vcombine.high %v806_v10, %v806_v10 }
  0xfd   :  { %v1294_v5 = vrot.slane %v420_v35, %v5162_v16  ;;  %v2296_v32 = vadd.f32 %v5595_v12, %v1286_v54  ;;  %v1290_v61 = vrot.slane %v420_v35, %v5167_v19  ;;  %v2295_v18 = vadd.f32 %v5603_v24, %v1282_v42 }
  0xfe   :  { %v1806_v29 = vrot.slane %v820_v46, %v5162_v16  ;;  %v2424_v0 = vadd.f32 %v5595_v12, %v1798_v25  ;;  %v1802_v59 = vrot.slane %v820_v46, %v5167_v19  ;;  %v424_v52 = vcombine.high %v420_v35, %v420_v35 }
  0xff   :  { %3167 = vmatmul.mubr.bf16.gmra.mxu0 %v5843_v63  ;;  %3423 = vmatmul.mubr.bf16.gmra.mxu1 %v5851_v15  ;;  %v2298_v20 = vadd.f32 %v5595_v12, %v1294_v5  ;;  %v2552_v51 = vmax.f32 %v2296_v32, 0.0  ;;  %v2297_v30 = vadd.f32 %v5603_v24, %v1290_v61  ;;  %v2551_v56 = vmax.f32 %v2295_v18, 0.0 }
 0x100   :  { %3174 = vmatprep.mubr.bf16.mxu0 %v5871_v38  ;;  %3430 = vmatprep.mubr.bf16.mxu1 %v2824_v1  ;;  %v2426_v4 = vadd.f32 %v5595_v12, %v1806_v29  ;;  %v2680_v63 = vmax.f32 %v2424_v0, 0.0  ;;  %v2423_v15 = vadd.f32 %v5603_v24, %v1794_v28  ;;  %v2425_v13 = vadd.f32 %v5603_v24, %v1802_v59 }
 0x101   :  { %v2554_v21 = vmax.f32 %v2298_v20, 0.0  ;;  %v2553_v22 = vmax.f32 %v2297_v30, 0.0  ;;  %v1302_v62 = vrot.slane %v422_v27, %v5162_v16  ;;  %v824_v39 = vcombine.high %v820_v46, %v820_v46 }
 0x102   :  { %v2682_v38 = vmax.f32 %v2426_v4, 0.0  ;;  %v2679_v1 = vmax.f32 %v2423_v15, 0.0  ;;  %v2681_v40 = vmax.f32 %v2425_v13, 0.0  ;;  %v1310_v34 = vrot.slane %v424_v52, %v5162_v16 }
 0x103   :  { %v2764_v53 = vpack.c.bf16 %v2554_v21, %v2552_v51  ;;  %v5937_v50 = vpack.c.bf16 %v2553_v22, %v2551_v56  ;;  %v2300_v44 = vadd.f32 %v5595_v12, %v1302_v62  ;;  %v1814_v36 = vrot.slane %v822_v33, %v5162_v16 }
 0x104   :  { %v2828_v37 = vpack.c.bf16 %v2682_v38, %v2680_v63  ;;  %v5941_v26 = vpack.c.bf16 %v2681_v40, %v2679_v1  ;;  %v1822_v8 = vrot.slane %v824_v39, %v5162_v16  ;;  %v2302_v7 = vadd.f32 %v5595_v12, %v1310_v34 }
 0x105   :  { %v2556_v17 = vmax.f32 %v2300_v44, 0.0  ;;  %v1298_v41 = vrot.slane %v422_v27, %v5167_v19  ;;  %v1306_v57 = vrot.slane %v424_v52, %v5167_v19  ;;  %v2428_v45 = vadd.f32 %v5595_v12, %v1814_v36 }
 0x106   :  { %v2430_v47 = vadd.f32 %v5595_v12, %v1822_v8  ;;  %v1810_v48 = vrot.slane %v822_v33, %v5167_v19  ;;  %v2558_v55 = vmax.f32 %v2302_v7, 0.0  ;;  %v1818_v35 = vrot.slane %v824_v39, %v5167_v19 }
 0x107   :  { %3175 = vmatmul.mubr.bf16.gmra.mxu0 %v5873_v43  ;;  %3431 = vmatmul.mubr.bf16.gmra.mxu1 %v5877_v31  ;;  %v2299_v60 = vadd.f32 %v5603_v24, %v1298_v41  ;;  %v2301_v10 = vadd.f32 %v5603_v24, %v1306_v57  ;;  %v2684_v43 = vmax.f32 %v2428_v45, 0.0  ;;  %v441_v42 = vcombine.high %v5907_v14, %v5907_v14 }
 0x108   :  { %3182 = vmatprep.mubr.bf16.mxu0 %v5897_v2  ;;  %3438 = vmatprep.mubr.bf16.mxu1 %v5900_v49  ;;  %v2686_v54 = vmax.f32 %v2430_v47, 0.0  ;;  %v2427_v31 = vadd.f32 %v5603_v24, %v1810_v48  ;;  %v2766_v27 = vpack.c.bf16 %v2558_v55, %v2556_v17  ;;  %v2429_v2 = vadd.f32 %v5603_v24, %v1818_v35 }
 0x109   :  { %v2555_v46 = vmax.f32 %v2299_v60, 0.0  ;;  %v2557_v25 = vmax.f32 %v2301_v10, 0.0  ;;  %v449_v33 = vrot.slane %v5907_v14, %v5156_v11  ;;  %v463_v5 = vrot.slane %v441_v42, %v5156_v11 }
 0x10a   :  { %v2830_v49 = vpack.c.bf16 %v2686_v54, %v2684_v43  ;;  %v2683_v28 = vmax.f32 %v2427_v31, 0.0  ;;  %v2685_v61 = vmax.f32 %v2429_v2, 0.0  ;;  %v841_v18 = vcombine.high %v5913_v23, %v5913_v23  ;;  %v4993_v31 = vld [vmem:[#allocation2 + $0x64] ss:$8 sps:$4 sm:$0xff]  }
 0x10b   :  { %v5965_v32 = vpack.c.bf16 %v2557_v25, %v2555_v46  ;;  %v849_v29 = vrot.slane %v5913_v23, %v5156_v11  ;;  %v1318_v0 = vrot.slane %v449_v33, %v5162_v16  ;;  %v1326_v59 = vrot.slane %v463_v5, %v5162_v16  ;;  %v4994_v2 = vld [vmem:[#allocation2 + $0xe4] ss:$8 sps:$4 sm:$0xff]  }
 0x10c   :  { %v1314_v20 = vrot.slane %v449_v33, %v5167_v19  ;;  %v1322_v51 = vrot.slane %v463_v5, %v5167_v19  ;;  %v5975_v14 = vpack.c.bf16 %v2685_v61, %v2683_v28  ;;  %v863_v30 = vrot.slane %v841_v18, %v5156_v11  ;;  %v6010_v61 = vld [vmem:[#allocation5 + $0x8] sm:$0xff] }
 0x10d   :  { %v1830_v56 = vrot.slane %v849_v29, %v5162_v16  ;;  %v1826_v4 = vrot.slane %v849_v29, %v5167_v19  ;;  %v2304_v23 = vadd.f32 %v5595_v12, %v1318_v0  ;;  %v2306_v63 = vadd.f32 %v5595_v12, %v1326_v59 }
 0x10e   :  { %v2303_v15 = vadd.f32 %v5603_v24, %v1314_v20  ;;  %v1838_v13 = vrot.slane %v863_v30, %v5162_v16  ;;  %v2305_v22 = vadd.f32 %v5603_v24, %v1322_v51  ;;  %v871_v44 = vcombine.high %v849_v29, %v849_v29 }
 0x10f   :  { %3183 = vmatmul.mubr.bf16.gmra.mxu0 %v5903_v58  ;;  %3439 = vmatmul.mubr.bf16.gmra.mxu1 %v5909_v3  ;;  %v2432_v21 = vadd.f32 %v5595_v12, %v1830_v56  ;;  %v2560_v52 = vmax.f32 %v2304_v23, 0.0  ;;  %v2562_v62 = vmax.f32 %v2306_v63, 0.0  ;;  %v1834_v58 = vrot.slane %v863_v30, %v5167_v19 }
 0x110   :  { %3190 = vmatprep.mubr.bf16.mxu0 %v2764_v53  ;;  %3446 = vmatprep.mubr.bf16.mxu1 %v2828_v37  ;;  %v2559_v38 = vmax.f32 %v2303_v15, 0.0  ;;  %v2434_v3 = vadd.f32 %v5595_v12, %v1838_v13  ;;  %v2561_v40 = vmax.f32 %v2305_v22, 0.0  ;;  %v2431_v39 = vadd.f32 %v5603_v24, %v1826_v4 }
 0x111   :  { %v2688_v1 = vmax.f32 %v2432_v21, 0.0  ;;  %v2768_v34 = vpack.c.bf16 %v2562_v62, %v2560_v52  ;;  %v2433_v53 = vadd.f32 %v5603_v24, %v1834_v58  ;;  %v873_v37 = vcombine.high %v863_v30, %v863_v30 }
 0x112   :  { %v2690_v36 = vmax.f32 %v2434_v3, 0.0  ;;  %v5992_v8 = vpack.c.bf16 %v2561_v40, %v2559_v38  ;;  %v2687_v7 = vmax.f32 %v2431_v39, 0.0  ;;  %v471_v17 = vcombine.high %v449_v33, %v449_v33 }
 0x113   :  { %v2689_v41 = vmax.f32 %v2433_v53, 0.0  ;;  %v1846_v57 = vrot.slane %v871_v44, %v5162_v16  ;;  %v1854_v45 = vrot.slane %v873_v37, %v5162_v16  ;;  %v473_v47 = vcombine.high %v463_v5, %v463_v5  ;;  %v4995_v5 = vld [vmem:[#allocation2 + $0x70] ss:$8 sps:$4 sm:$0xff]  }
 0x114   :  { %v2832_v48 = vpack.c.bf16 %v2690_v36, %v2688_v1  ;;  %v1334_v55 = vrot.slane %v471_v17, %v5162_v16  ;;  %v1330_v60 = vrot.slane %v471_v17, %v5167_v19  ;;  %v1842_v10 = vrot.slane %v871_v44, %v5167_v19 }
 0x115   :  { %v6001_v35 = vpack.c.bf16 %v2689_v41, %v2687_v7  ;;  %v2436_v43 = vadd.f32 %v5595_v12, %v1846_v57  ;;  %v2438_v54 = vadd.f32 %v5595_v12, %v1854_v45  ;;  %v1342_v42 = vrot.slane %v473_v47, %v5162_v16 }
 0x116   :  { %v2308_v46 = vadd.f32 %v5595_v12, %v1334_v55  ;;  %v1338_v25 = vrot.slane %v473_v47, %v5167_v19  ;;  %v1850_v33 = vrot.slane %v873_v37, %v5167_v19  ;;  %v840_v4 = vrot.slane %v4994_v2, %v5156_v11 }
 0x117   :  { %3191 = vmatmul.mubr.bf16.gmra.mxu0 %v5937_v50  ;;  %3447 = vmatmul.mubr.bf16.gmra.mxu1 %v5941_v26  ;;  %v2692_v28 = vmax.f32 %v2436_v43, 0.0  ;;  %v2694_v50 = vmax.f32 %v2438_v54, 0.0  ;;  %v2307_v26 = vadd.f32 %v5603_v24, %v1330_v60  ;;  %v2310_v18 = vadd.f32 %v6010_v61, %v1342_v42 }
 0x118   :  { %3198 = vmatprep.mubr.bf16.mxu0 %v2766_v27  ;;  %3454 = vmatprep.mubr.bf16.mxu1 %v2830_v49  ;;  %v2564_v27 = vmax.f32 %v2308_v46, 0.0  ;;  %v6013_v49 = vld [vmem:[#allocation5] sm:$0xff]  ;;  %v440_v24 = vrot.slane %v4993_v31, %v5156_v11  ;;  %v6022_v13 = vrot.slane %v4995_v5, %v5156_v11  ;;  %v842_v52 = vcombine.high %v840_v4, %v840_v4 }
 0x119   :  { %v2309_v29 = vadd.f32 %v6013_v49, %v1338_v25  ;;  %v2435_v12 = vadd.f32 %v6013_v49, %v1842_v10  ;;  %v2834_v0 = vpack.c.bf16 %v2694_v50, %v2692_v28  ;;  %v2563_v59 = vmax.f32 %v2307_v26, 0.0  ;;  %v6052_v10 = vld [vmem:[%s6974_s3] ss:$0 sm:$0xff] }
 0x11a   :  { %v2437_v20 = vadd.f32 %v6013_v49, %v1850_v33  ;;  %v2566_v51 = vmax.f32 %v2310_v18, 0.0  ;;  %v442_v63 = vcombine.high %v440_v24, %v440_v24  ;;  %v456_v15 = vrot.slane %v440_v24, %v5156_v11 }
 0x11b   :  { %v2565_v30 = vmax.f32 %v2309_v29, 0.0  ;;  %v2691_v56 = vmax.f32 %v2435_v12, 0.0  ;;  %v856_v62 = vrot.slane %v840_v4, %v5156_v11  ;;  %v870_v40 = vrot.slane %v842_v52, %v5156_v11 }
 0x11c   :  { %v2693_v23 = vmax.f32 %v2437_v20, 0.0  ;;  %v2770_v21 = vpack.c.bf16 %v2566_v51, %v2564_v27  ;;  %v470_v58 = vrot.slane %v442_v63, %v5156_v11  ;;  %v1350_v3 = vrot.slane %v456_v15, %v5162_v16 }
 0x11d   :  { %v6024_v22 = vpack.c.bf16 %v2565_v30, %v2563_v59  ;;  %v1346_v1 = vrot.slane %v456_v15, %v5167_v19  ;;  %v1862_v39 = vrot.slane %v856_v62, %v5162_v16  ;;  %v1858_v44 = vrot.slane %v856_v62, %v5167_v19 }
 0x11e   :  { %v6029_v38 = vpack.c.bf16 %v2693_v23, %v2691_v56  ;;  %v1358_v53 = vrot.slane %v470_v58, %v5162_v16  ;;  %v1870_v36 = vrot.slane %v870_v40, %v5162_v16  ;;  %v1866_v7 = vrot.slane %v870_v40, %v5167_v19 }
 0x11f   :  { %3199 = vmatmul.mubr.bf16.gmra.mxu0 %v5965_v32  ;;  %3455 = vmatmul.mubr.bf16.gmra.mxu1 %v5975_v14  ;;  %v2312_v32 = vadd.f32 %v6010_v61, %v1350_v3  ;;  %v1354_v14 = vrot.slane %v470_v58, %v5167_v19  ;;  %v2311_v37 = vadd.f32 %v6013_v49, %v1346_v1 }
 0x120   :  { %3206 = vmatprep.mubr.bf16.mxu0 %v2768_v34  ;;  %3462 = vmatprep.mubr.bf16.mxu1 %v2832_v48  ;;  %v2440_v34 = vadd.f32 %v6010_v61, %v1862_v39  ;;  %v2314_v17 = vadd.f32 %v6010_v61, %v1358_v53  ;;  %v2439_v45 = vadd.f32 %v6013_v49, %v1858_v44 }
 0x121   :  { %v2568_v41 = vmax.f32 %v2312_v32, 0.0  ;;  %v2313_v57 = vadd.f32 %v6013_v49, %v1354_v14  ;;  %v2567_v47 = vmax.f32 %v2311_v37, 0.0  ;;  %v2442_v48 = vadd.f32 %v6010_v61, %v1870_v36 }
 0x122   :  { %v2696_v55 = vmax.f32 %v2440_v34, 0.0  ;;  %v2441_v60 = vadd.f32 %v6013_v49, %v1866_v7  ;;  %v2570_v43 = vmax.f32 %v2314_v17, 0.0  ;;  %v2695_v31 = vmax.f32 %v2439_v45, 0.0 }
 0x123   :  { %v2569_v54 = vmax.f32 %v2313_v57, 0.0  ;;  %v472_v42 = vcombine.high %v456_v15, %v456_v15  ;;  %v2698_v46 = vmax.f32 %v2442_v48, 0.0  ;;  %v474_v2 = vcombine.high %v470_v58, %v470_v58 }
 0x124   :  { %v2697_v25 = vmax.f32 %v2441_v60, 0.0  ;;  %v6054_v28 = vcombine.high %v856_v62, %v856_v62  ;;  %v2772_v33 = vpack.c.bf16 %v2570_v43, %v2568_v41  ;;  %v874_v23 = vcombine.high %v870_v40, %v870_v40  ;;  %v4997_v43 = vld [vmem:[#allocation2 + $0xf0] ss:$8 sps:$4 sm:$0xff]  }
 0x125   :  { %v6058_v5 = vpack.c.bf16 %v2569_v54, %v2567_v47  ;;  %v1366_v18 = vrot.slane %v472_v42, %v5162_v16  ;;  %v2836_v12 = vpack.c.bf16 %v2698_v46, %v2696_v55  ;;  %v1374_v24 = vrot.slane %v474_v2, %v5162_v16 }
 0x126   :  { %v1362_v30 = vrot.slane %v472_v42, %v5167_v19  ;;  %v1878_v58 = vrot.slane %v6054_v28, %v5162_v16  ;;  %v1886_v36 = vrot.slane %v874_v23, %v5162_v16  ;;  %v1874_v41 = vrot.slane %v6054_v28, %v5167_v19 }
 0x127   :  { %v3016_v50 = vpop.f32.mrf.mxu0  ;;  %3207 = vmatmul.mubr.bf16.gmra.mxu0 %v5992_v8  ;;  %v3272_v26 = vpop.f32.mrf.mxu1  ;;  %3463 = vmatmul.mubr.bf16.gmra.mxu1 %v6001_v35  ;;  %v6066_v8 = vld [vmem:[%s6975_s4] ss:$0 sm:$0xff]  ;;  %v6068_v35 = vpack.c.bf16 %v2697_v25, %v2695_v31  ;;  %v2316_v51 = vadd.f32 %v6010_v61, %v1366_v18  ;;  %v1882_v60 = vrot.slane %v874_v23, %v5167_v19 }
 0x128   :  { %v3017_v27 = vadd.f32 %v6052_v10, %v3016_v50  ;;  %v3273_v29 = vadd.f32 %v6052_v10, %v3272_v26  ;;  %3470 = vmatprep.mubr.bf16.mxu1 %v2834_v0  ;;  %3214 = vmatprep.mubr.bf16.mxu0 %v2770_v21  ;;  %v1370_v0 = vrot.slane %v474_v2, %v5167_v19 }
 0x129   :  { %v3018_v59 = vpop.f32.mrf.mxu0  ;;  %v3274_v20 = vpop.f32.mrf.mxu1  ;;  %v2318_v21 = vadd.f32 %v6010_v61, %v1374_v24  ;;  %v2572_v52 = vmax.f32 %v2316_v51, 0.0  ;;  %v2315_v62 = vadd.f32 %v6013_v49, %v1362_v30  ;;  %v2444_v17 = vadd.f32 %v6010_v61, %v1878_v58 }
 0x12a   :  { %v3527_v56 = vmax.f32 %v3017_v27, 0.0  ;;  %v3591_v4 = vmax.f32 %v3273_v29, 0.0  ;;  %v2317_v44 = vadd.f32 %v6013_v49, %v1370_v0  ;;  %v2446_v55 = vadd.f32 %v6010_v61, %v1886_v36 }
 0x12b   :  { %v3019_v63 = vpop.f32.mrf.mxu0  ;;  %v3275_v15 = vpop.f32.mrf.mxu1  ;;  %v2574_v14 = vmax.f32 %v2318_v21, 0.0  ;;  %v2571_v37 = vmax.f32 %v2315_v62, 0.0  ;;  %v2700_v2 = vmax.f32 %v2444_v17, 0.0  ;;  %v2443_v50 = vadd.f32 %v6013_v49, %v1874_v41 }
 0x12c   :  { %v3020_v3 = vadd.f32 %v6052_v10, %v3019_v63  ;;  %v3276_v1 = vadd.f32 %v6052_v10, %v3275_v15  ;;  %v3662_v39 = vmul.f32 %v6066_v8, %v3527_v56  ;;  %v3726_v53 = vmul.f32 %v6066_v8, %v3591_v4 }
 0x12d   :  { %v3021_v32 = vpop.f32.mrf.mxu0  ;;  %v3277_v40 = vpop.f32.mrf.mxu1  ;;  %v2774_v47 = vpack.c.bf16 %v2574_v14, %v2572_v52  ;;  %v2573_v48 = vmax.f32 %v2317_v44, 0.0  ;;  %v2702_v28 = vmax.f32 %v2446_v55, 0.0  ;;  %v2445_v27 = vadd.f32 %v6013_v49, %v1882_v60 }
 0x12e   :  { %v3528_v34 = vmax.f32 %v3020_v3, 0.0  ;;  %v3592_v7 = vmax.f32 %v3276_v1, 0.0  ;;  %3790 = vadd.xlane.f32.xlu0 %v3662_v39  ;;  %v491_v29 = vcombine.high %v6022_v13, %v6022_v13  ;;  %v2699_v24 = vmax.f32 %v2443_v50, 0.0 }
 0x12f   :  { %v3024_v57 = vpop.f32.mrf.mxu0  ;;  %3215 = vmatmul.mubr.bf16.gmra.mxu0 %v6024_v22  ;;  %v3280_v45 = vpop.f32.mrf.mxu1  ;;  %3471 = vmatmul.mubr.bf16.gmra.mxu1 %v6029_v38  ;;  %v6095_v38 = vpack.c.bf16 %v2573_v48, %v2571_v37  ;;  %v2838_v20 = vpack.c.bf16 %v2702_v28, %v2700_v2  ;;  %v883_v51 = vrot.slane %v4997_v43, %v5156_v11  ;;  %v2701_v15 = vmax.f32 %v2445_v27, 0.0 }
 0x130   :  { %v3025_v54 = vadd.f32 %v6052_v10, %v3024_v57  ;;  %v3281_v31 = vadd.f32 %v6052_v10, %v3280_v45  ;;  %v3727_v42 = vmul.f32 %v6066_v8, %v3592_v7  ;;  %v3663_v46 = vmul.f32 %v6066_v8, %v3528_v34  ;;  %3222 = vmatprep.mubr.bf16.mxu0 %v2772_v33 }
 0x131   :  { %v3026_v22 = vpop.f32.mrf.mxu0  ;;  %v3282_v25 = vpop.f32.mrf.mxu1  ;;  %3478 = vmatprep.mubr.bf16.mxu1 %v2836_v12  ;;  %v6103_v12 = vrot.slane %v6022_v13, %v5156_v11  ;;  %v6111_v21 = vrot.slane %v491_v29, %v5156_v11  ;;  %v891_v3 = vcombine.high %v883_v51, %v883_v51  ;;  %v6118_v1 = vrot.slane %v883_v51, %v5156_v11 }
 0x132   :  { %v3529_v26 = vmax.f32 %v3025_v54, 0.0  ;;  %v3593_v18 = vmax.f32 %v3281_v31, 0.0  ;;  %3920 = vadd.xlane.f32.xlu1 %v3727_v42  ;;  %3918 = vadd.xlane.f32.xlu0 %v3726_v53  ;;  %v2837_v32 = vpack.c.bf16 %v2701_v15, %v2699_v24 }
 0x133   :  { %v3027_v59 = vpop.f32.mrf.mxu0  ;;  %v3283_v33 = vpop.f32.mrf.mxu1  ;;  %v1382_v13 = vrot.slane %v6103_v12, %v5162_v16  ;;  %v1378_v52 = vrot.slane %v6103_v12, %v5167_v19  ;;  %v1390_v40 = vrot.slane %v6111_v21, %v5162_v16  ;;  %v1386_v41 = vrot.slane %v6111_v21, %v5167_v19 }
 0x134   :  { %v3028_v30 = vadd.f32 %v6052_v10, %v3027_v59  ;;  %v3284_v56 = vadd.f32 %v6052_v10, %v3283_v33  ;;  %v3664_v4 = vmul.f32 %v6066_v8, %v3529_v26  ;;  %v3728_v0 = vmul.f32 %v6066_v8, %v3593_v18 }
 0x135   :  { %v3029_v23 = vpop.f32.mrf.mxu0  ;;  %v3285_v63 = vpop.f32.mrf.mxu1  ;;  %v2320_v14 = vadd.f32 %v6010_v61, %v1382_v13  ;;  %v2319_v57 = vadd.f32 %v6013_v49, %v1378_v52  ;;  %v6134_v55 = vrot.slane %v891_v3, %v5156_v11  ;;  %v2321_v31 = vadd.f32 %v6013_v49, %v1386_v41 }
 0x136   :  { %v3530_v62 = vmax.f32 %v3028_v30, 0.0  ;;  %v3594_v58 = vmax.f32 %v3284_v56, 0.0  ;;  %3792 = vadd.xlane.f32.xlu0 %v3663_v46  ;;  %3794 = vadd.xlane.f32.xlu1 %v3664_v4  ;;  %v1890_v46 = vrot.slane %v6118_v1, %v5167_v19  ;;  %v521_v63 = vcombine.high %v6103_v12, %v6103_v12 }
 0x137   :  { %v3032_v39 = vpop.f32.mrf.mxu0  ;;  %3223 = vmatmul.mubr.bf16.gmra.mxu0 %v6058_v5  ;;  %v3288_v53 = vpop.f32.mrf.mxu1  ;;  %3479 = vmatmul.mubr.bf16.gmra.mxu1 %v6068_v35  ;;  %v2322_v35 = vadd.f32 %v6010_v61, %v1390_v40  ;;  %v2576_v17 = vmax.f32 %v2320_v14, 0.0  ;;  %v2575_v42 = vmax.f32 %v2319_v57, 0.0  ;;  %v2577_v27 = vmax.f32 %v2321_v31, 0.0 }
 0x138   :  { %v3033_v44 = vadd.f32 %v6052_v10, %v3032_v39  ;;  %v3289_v37 = vadd.f32 %v6052_v10, %v3288_v53  ;;  %v3665_v36 = vmul.f32 %v6066_v8, %v3530_v62  ;;  %3230 = vmatprep.mubr.bf16.mxu0 %v2774_v47  ;;  %v3729_v34 = vmul.f32 %v6066_v8, %v3594_v58 }
 0x139   :  { %v3034_v7 = vpop.f32.mrf.mxu0  ;;  %v3290_v5 = vpop.f32.mrf.mxu1  ;;  %3486 = vmatprep.mubr.bf16.mxu1 %v2838_v20  ;;  %v1894_v47 = vrot.slane %v6118_v1, %v5162_v16  ;;  %v2578_v54 = vmax.f32 %v2322_v35, 0.0  ;;  %v1902_v29 = vrot.slane %v6134_v55, %v5162_v16  ;;  %v1898_v24 = vrot.slane %v6134_v55, %v5167_v19 }
 0x13a   :  { %v3531_v45 = vmax.f32 %v3033_v44, 0.0  ;;  %v3595_v48 = vmax.f32 %v3289_v37, 0.0  ;;  %3922 = vadd.xlane.f32.xlu0 %v3728_v0  ;;  %3796 = vadd.xlane.f32.xlu1 %v3665_v36  ;;  %v2447_v51 = vadd.f32 %v6013_v49, %v1890_v46  ;;  %v2775_v4 = vpack.c.bf16 %v2577_v27, %v2575_v42  ;;  %v4999_v27 = vld [vmem:[#allocation2 + $0x74] ss:$8 sps:$4 sm:$0xff]  }
 0x13b   :  { %v3035_v60 = vpop.f32.mrf.mxu0  ;;  %v3291_v43 = vpop.f32.mrf.mxu1  ;;  %v2776_v18 = vpack.c.bf16 %v2578_v54, %v2576_v17  ;;  %v2448_v59 = vadd.f32 %v6010_v61, %v1894_v47  ;;  %v2450_v0 = vadd.f32 %v6010_v61, %v1902_v29  ;;  %v2449_v39 = vadd.f32 %v6013_v49, %v1898_v24 }
 0x13c   :  { %v3036_v22 = vadd.f32 %v6052_v10, %v3035_v60  ;;  %v3292_v25 = vadd.f32 %v6052_v10, %v3291_v43  ;;  %v3666_v2 = vmul.f32 %v6066_v8, %v3531_v45  ;;  %v3730_v28 = vmul.f32 %v6066_v8, %v3595_v48 }
 0x13d   :  { %v3037_v50 = vpop.f32.mrf.mxu0  ;;  %v3293_v26 = vpop.f32.mrf.mxu1  ;;  %v2704_v23 = vmax.f32 %v2448_v59, 0.0  ;;  %v2706_v3 = vmax.f32 %v2450_v0, 0.0  ;;  %v2703_v53 = vmax.f32 %v2447_v51, 0.0  ;;  %v1398_v14 = vrot.slane %v521_v63, %v5162_v16 }
 0x13e   :  { %v3532_v33 = vmax.f32 %v3036_v22, 0.0  ;;  %v3596_v20 = vmax.f32 %v3292_v25, 0.0  ;;  %3798 = vadd.xlane.f32.xlu0 %v3666_v2  ;;  %3924 = vadd.xlane.f32.xlu1 %v3729_v34  ;;  %v1394_v44 = vrot.slane %v521_v63, %v5167_v19  ;;  %v2705_v7 = vmax.f32 %v2449_v39, 0.0 }
 0x13f   :  { %v3040_v30 = vpop.f32.mrf.mxu0  ;;  %3231 = vmatmul.mubr.bf16.gmra.mxu0 %v6095_v38  ;;  %v3296_v56 = vpop.f32.mrf.mxu1  ;;  %3487 = vmatmul.mubr.bf16.gmra.mxu1 %v2837_v32  ;;  %v523_v32 = vcombine.high %v6111_v21, %v6111_v21  ;;  %v2840_v34 = vpack.c.bf16 %v2706_v3, %v2704_v23  ;;  %v2324_v60 = vadd.f32 %v6010_v61, %v1398_v14  ;;  %v5000_v3 = vld [vmem:[#allocation2 + $0xf4] ss:$8 sps:$4 sm:$0xff]  }
 0x140   :  { %v3041_v15 = vadd.f32 %v6052_v10, %v3040_v30  ;;  %v3297_v13 = vadd.f32 %v6052_v10, %v3296_v56  ;;  %v3667_v52 = vmul.f32 %v6066_v8, %v3532_v33  ;;  %3238 = vmatprep.mubr.bf16.mxu0 %v2776_v18  ;;  %v3731_v62 = vmul.f32 %v6066_v8, %v3596_v20 }
 0x141   :  { %v3042_v58 = vpop.f32.mrf.mxu0  ;;  %v3298_v38 = vpop.f32.mrf.mxu1  ;;  %v1406_v5 = vrot.slane %v523_v32, %v5162_v16  ;;  %v1402_v35 = vrot.slane %v523_v32, %v5167_v19  ;;  %3494 = vmatprep.mubr.bf16.mxu1 %v2840_v34  ;;  %v2839_v47 = vpack.c.bf16 %v2705_v7, %v2703_v53  ;;  %v2323_v54 = vadd.f32 %v6013_v49, %v1394_v44 }
 0x142   :  { %v3533_v40 = vmax.f32 %v3041_v15, 0.0  ;;  %v3597_v12 = vmax.f32 %v3297_v13, 0.0  ;;  %3926 = vadd.xlane.f32.xlu0 %v3730_v28  ;;  %3800 = vadd.xlane.f32.xlu1 %v3667_v52  ;;  %v921_v22 = vcombine.high %v6118_v1, %v6118_v1  ;;  %v2580_v28 = vmax.f32 %v2324_v60, 0.0 }
 0x143   :  { %v3043_v37 = vpop.f32.mrf.mxu0  ;;  %v3299_v36 = vpop.f32.mrf.mxu1  ;;  %v2326_v43 = vadd.f32 %v6010_v61, %v1406_v5  ;;  %v2325_v46 = vadd.f32 %v6013_v49, %v1402_v35  ;;  %v2579_v26 = vmax.f32 %v2323_v54, 0.0  ;;  %v923_v18 = vcombine.high %v6134_v55, %v6134_v55 }
 0x144   :  { %v3044_v17 = vadd.f32 %v6052_v10, %v3043_v37  ;;  %v3300_v21 = vadd.f32 %v6052_v10, %v3299_v36  ;;  %v3668_v41 = vmul.f32 %v6066_v8, %v3533_v40  ;;  %v3732_v57 = vmul.f32 %v6066_v8, %v3597_v12 }
 0x145   :  { %v3045_v45 = vpop.f32.mrf.mxu0  ;;  %v3301_v48 = vpop.f32.mrf.mxu1  ;;  %v2582_v50 = vmax.f32 %v2326_v43, 0.0  ;;  %v2581_v30 = vmax.f32 %v2325_v46, 0.0  ;;  %v1910_v56 = vrot.slane %v921_v22, %v5162_v16  ;;  %v1906_v55 = vrot.slane %v921_v22, %v5167_v19 }
 0x146   :  { %v3534_v31 = vmax.f32 %v3044_v17, 0.0  ;;  %v3598_v42 = vmax.f32 %v3300_v21, 0.0  ;;  %3802 = vadd.xlane.f32.xlu0 %v3668_v41  ;;  %3928 = vadd.xlane.f32.xlu1 %v3731_v62  ;;  %v1914_v63 = vrot.slane %v923_v18, %v5167_v19  ;;  %v490_v38 = vrot.slane %v4999_v27, %v5156_v11 }
 0x147   :  { %v3048_v25 = vpop.f32.mrf.mxu0  ;;  %3239 = vmatmul.mubr.bf16.gmra.mxu0 %v2775_v4  ;;  %v3304_v2 = vpop.f32.mrf.mxu1  ;;  %3495 = vmatmul.mubr.bf16.gmra.mxu1 %v2839_v47  ;;  %v2778_v51 = vpack.c.bf16 %v2582_v50, %v2580_v28  ;;  %v1918_v4 = vrot.slane %v923_v18, %v5162_v16  ;;  %v2777_v52 = vpack.c.bf16 %v2581_v30, %v2579_v26 }
 0x148   :  { %v3049_v29 = vadd.f32 %v6052_v10, %v3048_v25  ;;  %v3305_v59 = vadd.f32 %v6052_v10, %v3304_v2  ;;  %v3669_v33 = vmul.f32 %v6066_v8, %v3534_v31  ;;  %v3733_v20 = vmul.f32 %v6066_v8, %v3598_v42 }
 0x149   :  { %v3050_v1 = vpop.f32.mrf.mxu0  ;;  %v3306_v24 = vpop.f32.mrf.mxu1  ;;  %3246 = vmatprep.mubr.bf16.mxu0 %v2778_v51  ;;  %v2452_v62 = vadd.f32 %v6010_v61, %v1910_v56  ;;  %v2454_v58 = vadd.f32 %v6010_v61, %v1918_v4  ;;  %v2451_v40 = vadd.f32 %v6013_v49, %v1906_v55  ;;  %v2453_v36 = vadd.f32 %v6013_v49, %v1914_v63 }
 0x14a   :  { %v3535_v0 = vmax.f32 %v3049_v29, 0.0  ;;  %v3599_v23 = vmax.f32 %v3305_v59, 0.0  ;;  %3930 = vadd.xlane.f32.xlu0 %v3732_v57  ;;  %3804 = vadd.xlane.f32.xlu1 %v3669_v33  ;;  %v492_v17 = vcombine.high %v490_v38, %v490_v38  ;;  %v6196_v48 = vrot.slane %v490_v38, %v5156_v11 }
 0x14b   :  { %v3051_v15 = vpop.f32.mrf.mxu0  ;;  %v3307_v13 = vpop.f32.mrf.mxu1  ;;  %v2708_v44 = vmax.f32 %v2452_v62, 0.0  ;;  %v2710_v37 = vmax.f32 %v2454_v58, 0.0  ;;  %v2707_v35 = vmax.f32 %v2451_v40, 0.0  ;;  %v2709_v45 = vmax.f32 %v2453_v36, 0.0 }
 0x14c   :  { %v3052_v39 = vadd.f32 %v6052_v10, %v3051_v15  ;;  %v3308_v53 = vadd.f32 %v6052_v10, %v3307_v13  ;;  %v3670_v32 = vmul.f32 %v6066_v8, %v3535_v0  ;;  %v3734_v34 = vmul.f32 %v6066_v8, %v3599_v23 }
 0x14d   :  { %v3053_v12 = vpop.f32.mrf.mxu0  ;;  %v3309_v14 = vpop.f32.mrf.mxu1  ;;  %v2842_v57 = vpack.c.bf16 %v2710_v37, %v2708_v44  ;;  %v890_v47 = vrot.slane %v5000_v3, %v5156_v11  ;;  %v6202_v54 = vrot.slane %v492_v17, %v5156_v11  ;;  %v2841_v22 = vpack.c.bf16 %v2709_v45, %v2707_v35 }
 0x14e   :  { %v3536_v7 = vmax.f32 %v3052_v39, 0.0  ;;  %v3600_v5 = vmax.f32 %v3308_v53, 0.0  ;;  %3806 = vadd.xlane.f32.xlu0 %v3670_v32  ;;  %3932 = vadd.xlane.f32.xlu1 %v3733_v20  ;;  %v1414_v25 = vrot.slane %v6196_v48, %v5162_v16  ;;  %v1410_v2 = vrot.slane %v6196_v48, %v5167_v19 }
 0x14f   :  { %v3056_v21 = vpop.f32.mrf.mxu0  ;;  %3247 = vmatmul.mubr.bf16.gmra.mxu0 %v2777_v52  ;;  %v3312_v41 = vpop.f32.mrf.mxu1  ;;  %3502 = vmatprep.mubr.bf16.mxu1 %v2842_v57  ;;  %v1422_v50 = vrot.slane %v6202_v54, %v5162_v16  ;;  %v1418_v18 = vrot.slane %v6202_v54, %v5167_v19  ;;  %v892_v20 = vcombine.high %v890_v47, %v890_v47 }
 0x150   :  { %v3057_v60 = vadd.f32 %v6052_v10, %v3056_v21  ;;  %v3671_v43 = vmul.f32 %v6066_v8, %v3536_v7  ;;  %v3313_v31 = vadd.f32 %v6052_v10, %v3312_v41  ;;  %v3735_v26 = vmul.f32 %v6066_v8, %v3600_v5  ;;  %3503 = vmatmul.mubr.bf16.gmra.mxu1 %v2841_v22 }
 0x151   :  { %v3058_v42 = vpop.f32.mrf.mxu0  ;;  %v3314_v46 = vpop.f32.mrf.mxu1  ;;  %v2328_v59 = vadd.f32 %v6010_v61, %v1414_v25  ;;  %v2327_v33 = vadd.f32 %v6013_v49, %v1410_v2  ;;  %v6217_v1 = vrot.slane %v890_v47, %v5156_v11  ;;  %v2330_v30 = vadd.f32 %v6010_v61, %v1422_v50 }
 0x152   :  { %v3537_v28 = vmax.f32 %v3057_v60, 0.0  ;;  %3934 = vadd.xlane.f32.xlu0 %v3734_v34  ;;  %3808 = vadd.xlane.f32.xlu1 %v3671_v43  ;;  %v2329_v55 = vadd.f32 %v6013_v49, %v1418_v18  ;;  %v920_v15 = vrot.slane %v892_v20, %v5156_v11  ;;  %v3601_v13 = vmax.f32 %v3313_v31, 0.0 }
 0x153   :  { %v3059_v27 = vpop.f32.mrf.mxu0  ;;  %v3315_v29 = vpop.f32.mrf.mxu1  ;;  %v2584_v23 = vmax.f32 %v2328_v59, 0.0  ;;  %v2583_v63 = vmax.f32 %v2327_v33, 0.0  ;;  %v2586_v62 = vmax.f32 %v2330_v30, 0.0  ;;  %v1926_v58 = vrot.slane %v6217_v1, %v5162_v16 }
 0x154   :  { %v3060_v24 = vadd.f32 %v6052_v10, %v3059_v27  ;;  %v3316_v51 = vadd.f32 %v6052_v10, %v3315_v29  ;;  %v3672_v56 = vmul.f32 %v6066_v8, %v3537_v28  ;;  %v2585_v3 = vmax.f32 %v2329_v55, 0.0 }
 0x155   :  { %v3061_v4 = vpop.f32.mrf.mxu0  ;;  %v3317_v0 = vpop.f32.mrf.mxu1  ;;  %v1934_v53 = vrot.slane %v920_v15, %v5162_v16  ;;  %v1922_v32 = vrot.slane %v6217_v1, %v5167_v19  ;;  %v1930_v40 = vrot.slane %v920_v15, %v5167_v19  ;;  %v2780_v11 = vpack.c.bf16 %v2586_v62, %v2584_v23 }
 0x156   :  { %v3538_v52 = vmax.f32 %v3060_v24, 0.0  ;;  %3810 = vadd.xlane.f32.xlu0 %v3672_v56  ;;  %3936 = vadd.xlane.f32.xlu1 %v3735_v26  ;;  %v3602_v12 = vmax.f32 %v3316_v51, 0.0  ;;  %v2456_v44 = vadd.f32 %v6010_v61, %v1926_v58  ;;  %v2779_v37 = vpack.c.bf16 %v2585_v3, %v2583_v63 }
 0x157   :  { %v3064_v38 = vpop.f32.mrf.mxu0  ;;  %v3320_v39 = vpop.f32.mrf.mxu1  ;;  %v2458_v36 = vadd.f32 %v6010_v61, %v1934_v53  ;;  %v2455_v5 = vadd.f32 %v6013_v49, %v1922_v32  ;;  %v2457_v35 = vadd.f32 %v6013_v49, %v1930_v40  ;;  %3254 = vmatprep.mubr.bf16.mxu0 %v2780_v11  ;;  %v3736_v57 = vmul.f32 %v6066_v8, %v3601_v13 }
 0x158   :  { %v3065_v14 = vadd.f32 %v6052_v10, %v3064_v38  ;;  %v3321_v21 = vadd.f32 %v6052_v10, %v3320_v39  ;;  %v2712_v41 = vmax.f32 %v2456_v44, 0.0  ;;  %3255 = vmatmul.mubr.bf16.gmra.mxu0 %v2779_v37  ;;  %v3673_v43 = vmul.f32 %v6066_v8, %v3538_v52 }
 0x159   :  { %v3066_v34 = vpop.f32.mrf.mxu0  ;;  %v3322_v7 = vpop.f32.mrf.mxu1  ;;  %v2714_v45 = vmax.f32 %v2458_v36, 0.0  ;;  %v2711_v47 = vmax.f32 %v2455_v5, 0.0  ;;  %v2713_v60 = vmax.f32 %v2457_v35, 0.0  ;;  %v522_v22 = vcombine.high %v6196_v48, %v6196_v48 }
 0x15a   :  { %v3539_v17 = vmax.f32 %v3065_v14, 0.0  ;;  %3938 = vadd.xlane.f32.xlu0 %v3736_v57  ;;  %v524_v25 = vcombine.high %v6202_v54, %v6202_v54  ;;  %3812 = vadd.xlane.f32.xlu1 %v3673_v43  ;;  %v3603_v29 = vmax.f32 %v3321_v21, 0.0  ;;  %v3737_v48 = vmul.f32 %v6066_v8, %v3602_v12 }
 0x15b   :  { %v3067_v31 = vpop.f32.mrf.mxu0  ;;  %v3323_v42 = vpop.f32.mrf.mxu1  ;;  %v2844_v2 = vpack.c.bf16 %v2714_v45, %v2712_v41  ;;  %v2843_v28 = vpack.c.bf16 %v2713_v60, %v2711_v47  ;;  %v1430_v59 = vrot.slane %v522_v22, %v5162_v16  ;;  %v1426_v54 = vrot.slane %v522_v22, %v5167_v19 }
 0x15c   :  { %v3068_v46 = vadd.f32 %v6052_v10, %v3067_v31  ;;  %v6245_v50 = vadd.f32 %v6052_v10, %v3323_v42  ;;  %v3674_v27 = vmul.f32 %v6066_v8, %v3539_v17  ;;  %v1438_v33 = vrot.slane %v524_v25, %v5162_v16 }
 0x15d   :  { %v3069_v26 = vpop.f32.mrf.mxu0  ;;  %v3325_v18 = vpop.f32.mrf.mxu1  ;;  %3510 = vmatprep.mubr.bf16.mxu1 %v2844_v2  ;;  %v1434_v24 = vrot.slane %v524_v25, %v5167_v19  ;;  %v922_v30 = vcombine.high %v6217_v1, %v6217_v1  ;;  %v924_v56 = vcombine.high %v920_v15, %v920_v15  ;;  %v2332_v0 = vadd.f32 %v6010_v61, %v1430_v59 }
 0x15e   :  { %3511 = vmatmul.mubr.bf16.gmra.mxu1 %v2843_v28  ;;  %v3540_v4 = vmax.f32 %v3068_v46, 0.0  ;;  %v2334_v23 = vadd.f32 %v6010_v61, %v1438_v33  ;;  %3814 = vadd.xlane.f32.xlu0 %v3674_v27  ;;  %v3604_v63 = vmax.f32 %v6245_v50, 0.0  ;;  %v2331_v13 = vadd.f32 %v6013_v49, %v1426_v54 }
 0x15f   :  { %v3072_v20 = vpop.f32.mrf.mxu0  ;;  %v3328_v51 = vpop.f32.mrf.mxu1  ;;  %3940 = vadd.xlane.f32.xlu1 %v3737_v48  ;;  %v2333_v52 = vadd.f32 %v6013_v49, %v1434_v24  ;;  %v1942_v62 = vrot.slane %v922_v30, %v5162_v16  ;;  %v2588_v58 = vmax.f32 %v2332_v0, 0.0  ;;  %v1950_v39 = vrot.slane %v924_v56, %v5162_v16 }
 0x160   :  { %v3073_v55 = vadd.f32 %v6052_v10, %v3072_v20  ;;  %v2590_v38 = vmax.f32 %v2334_v23, 0.0  ;;  %v3329_v3 = vadd.f32 %v6052_v10, %v3328_v51  ;;  %v2587_v32 = vmax.f32 %v2331_v13, 0.0 }
 0x161   :  { %v3074_v1 = vpop.f32.mrf.mxu0  ;;  %v3330_v15 = vpop.f32.mrf.mxu1  ;;  %v2589_v40 = vmax.f32 %v2333_v52, 0.0  ;;  %v2460_v12 = vadd.f32 %v6010_v61, %v1942_v62  ;;  %v2462_v37 = vadd.f32 %v6010_v61, %v1950_v39  ;;  %v1938_v36 = vrot.slane %v922_v30, %v5167_v19 }
 0x162   :  { %v3541_v53 = vmax.f32 %v3073_v55, 0.0  ;;  %v2782_v44 = vpack.c.bf16 %v2590_v38, %v2588_v58  ;;  %v1946_v34 = vrot.slane %v924_v56, %v5167_v19  ;;  %v3738_v35 = vmul.f32 %v6066_v8, %v3603_v29 }
 0x163   :  { %v3075_v11 = vpop.f32.mrf.mxu0  ;;  %v3331_v14 = vpop.f32.mrf.mxu1  ;;  %v2781_v7 = vpack.c.bf16 %v2589_v40, %v2587_v32  ;;  %v2716_v5 = vmax.f32 %v2460_v12, 0.0  ;;  %v3675_v16 = vmul.f32 %v6066_v8, %v3540_v4  ;;  %v2718_v41 = vmax.f32 %v2462_v37, 0.0 }
 0x164   :  { %3262 = vmatprep.mubr.bf16.mxu0 %v2782_v44  ;;  %v2459_v57 = vadd.f32 %v6013_v49, %v1938_v36  ;;  %v2461_v45 = vadd.f32 %v6013_v49, %v1946_v34  ;;  %v3076_v61 = vadd.f32 %v6052_v10, %v3075_v11  ;;  %v3605_v47 = vmax.f32 %v3329_v3, 0.0  ;;  %3942 = vadd.xlane.f32.xlu0 %v3738_v35 }
 0x165   :  { %v3077_v17 = vpop.f32.mrf.mxu0  ;;  %v3333_v21 = vpop.f32.mrf.mxu1  ;;  %3263 = vmatmul.mubr.bf16.gmra.mxu0 %v2781_v7  ;;  %v3676_v19 = vmul.f32 %v6066_v8, %v3541_v53  ;;  %v2846_v31 = vpack.c.bf16 %v2718_v41, %v2716_v5  ;;  %3816 = vadd.xlane.f32.xlu1 %v3675_v16  ;;  %v3332_v50 = vadd.f32 %v6052_v10, %v3331_v14 }
 0x166   :  { %v2715_v42 = vmax.f32 %v2459_v57, 0.0  ;;  %v2717_v46 = vmax.f32 %v2461_v45, 0.0  ;;  %v3542_v22 = vmax.f32 %v3076_v61, 0.0  ;;  %v3739_v26 = vmul.f32 %v6066_v8, %v3604_v63 }
 0x167   :  { %v3080_v60 = vpop.f32.mrf.mxu0  ;;  %v3336_v43 = vpop.f32.mrf.mxu1  ;;  %3518 = vmatprep.mubr.bf16.mxu1 %v2846_v31  ;;  %v3740_v29 = vmul.f32 %v6066_v8, %v3605_v47  ;;  %v3606_v51 = vmax.f32 %v3332_v50, 0.0 }
 0x168   :  { %v3081_v25 = vadd.f32 %v6052_v10, %v3080_v60  ;;  %v2845_v49 = vpack.c.bf16 %v2717_v46, %v2715_v42  ;;  %3818 = vadd.xlane.f32.xlu0 %v3676_v19  ;;  %v3337_v27 = vadd.f32 %v6052_v10, %v3336_v43  ;;  %v3677_v48 = vmul.f32 %v6066_v8, %v3542_v22 }
 0x169   :  { %v3082_v2 = vpop.f32.mrf.mxu0  ;;  %v3338_v28 = vpop.f32.mrf.mxu1  ;;  %3944 = vadd.xlane.f32.xlu1 %v3739_v26  ;;  %v3741_v62 = vmul.f32 %v6066_v8, %v3606_v51 }
 0x16a   :  { %v3543_v18 = vmax.f32 %v3081_v25, 0.0  ;;  %3519 = vmatmul.mubr.bf16.gmra.mxu1 %v2845_v49  ;;  %v3607_v30 = vmax.f32 %v3337_v27, 0.0 }
 0x16b   :  { %v3083_v59 = vpop.f32.mrf.mxu0  ;;  %v3339_v33 = vpop.f32.mrf.mxu1 }
 0x16c   :  { %v3084_v20 = vadd.f32 %v6052_v10, %v3083_v59  ;;  %3946 = vadd.xlane.f32.xlu0 %v3740_v29  ;;  %v3678_v56 = vmul.f32 %v6066_v8, %v3543_v18  ;;  %v3340_v52 = vadd.f32 %v6052_v10, %v3339_v33  ;;  %v3742_v58 = vmul.f32 %v6066_v8, %v3607_v30 }
 0x16d   :  { %v3085_v54 = vpop.f32.mrf.mxu0  ;;  %v3341_v24 = vpop.f32.mrf.mxu1  ;;  %3820 = vadd.xlane.f32.xlu1 %v3677_v48 }
 0x16e   :  { %v3544_v23 = vmax.f32 %v3084_v20, 0.0  ;;  %v3608_v12 = vmax.f32 %v3340_v52, 0.0 }
 0x16f   :  { %v3088_v4 = vpop.f32.mrf.mxu0  ;;  %v3344_v0 = vpop.f32.mrf.mxu1 }
 0x170   :  { %v3089_v55 = vadd.f32 %v6052_v10, %v3088_v4  ;;  %3822 = vadd.xlane.f32.xlu0 %v3678_v56  ;;  %v3345_v15 = vadd.f32 %v6052_v10, %v3344_v0  ;;  %v3679_v39 = vmul.f32 %v6066_v8, %v3544_v23  ;;  %v3743_v16 = vmul.f32 %v6066_v8, %v3608_v12 }
 0x171   :  { %v3090_v63 = vpop.f32.mrf.mxu0  ;;  %v3346_v13 = vpop.f32.mrf.mxu1  ;;  %3948 = vadd.xlane.f32.xlu1 %v3741_v62 }
 0x172   :  { %v3545_v1 = vmax.f32 %v3089_v55, 0.0  ;;  %v3609_v11 = vmax.f32 %v3345_v15, 0.0 }
 0x173   :  { %v3091_v38 = vpop.f32.mrf.mxu0  ;;  %v3347_v3 = vpop.f32.mrf.mxu1 }
 0x174   :  { %v3092_v53 = vadd.f32 %v6052_v10, %v3091_v38  ;;  %3950 = vadd.xlane.f32.xlu0 %v3742_v58  ;;  %v3680_v14 = vmul.f32 %v6066_v8, %v3545_v1  ;;  %v3348_v35 = vadd.f32 %v6052_v10, %v3347_v3  ;;  %v3744_v41 = vmul.f32 %v6066_v8, %v3609_v11 }
 0x175   :  { %v3093_v32 = vpop.f32.mrf.mxu0  ;;  %v3349_v40 = vpop.f32.mrf.mxu1  ;;  %3824 = vadd.xlane.f32.xlu1 %v3679_v39 }
 0x176   :  { %v3546_v36 = vmax.f32 %v3092_v53, 0.0  ;;  %v3610_v43 = vmax.f32 %v3348_v35, 0.0 }
 0x177   :  { %v3096_v44 = vpop.f32.mrf.mxu0  ;;  %v3352_v37 = vpop.f32.mrf.mxu1 }
 0x178   :  { %v3097_v34 = vadd.f32 %v6052_v10, %v3096_v44  ;;  %3826 = vadd.xlane.f32.xlu0 %v3680_v14  ;;  %v3353_v21 = vadd.f32 %v6052_v10, %v3352_v37  ;;  %v3681_v61 = vmul.f32 %v6066_v8, %v3546_v36  ;;  %v3745_v26 = vmul.f32 %v6066_v8, %v3610_v43 }
 0x179   :  { %v3098_v7 = vpop.f32.mrf.mxu0  ;;  %v3354_v5 = vpop.f32.mrf.mxu1  ;;  %3952 = vadd.xlane.f32.xlu1 %v3743_v16 }
 0x17a   :  { %v3547_v17 = vmax.f32 %v3097_v34, 0.0  ;;  %v3611_v31 = vmax.f32 %v3353_v21, 0.0  ;;  %v6317_v34 = vld [vmem:[%s6974_s3] ss:$0 sm:$0xff] }
 0x17b   :  { %v3099_v57 = vpop.f32.mrf.mxu0  ;;  %v3355_v45 = vpop.f32.mrf.mxu1 }
 0x17c   :  { %v3100_v47 = vadd.f32 %v6052_v10, %v3099_v57  ;;  %3954 = vadd.xlane.f32.xlu0 %v3744_v41  ;;  %v3682_v42 = vmul.f32 %v6066_v8, %v3547_v17  ;;  %v3356_v50 = vadd.f32 %v6052_v10, %v3355_v45  ;;  %v3746_v29 = vmul.f32 %v6066_v8, %v3611_v31 }
 0x17d   :  { %v3101_v19 = vpop.f32.mrf.mxu0  ;;  %v3357_v60 = vpop.f32.mrf.mxu1  ;;  %3828 = vadd.xlane.f32.xlu1 %v3681_v61 }
 0x17e   :  { %v3548_v25 = vmax.f32 %v3100_v47, 0.0  ;;  %v3612_v51 = vmax.f32 %v3356_v50, 0.0 }
 0x17f   :  { %v3104_v46 = vpop.f32.mrf.mxu0  ;;  %v3360_v22 = vpop.f32.mrf.mxu1 }
 0x180   :  { %v3105_v2 = vadd.f32 %v6052_v10, %v3104_v46  ;;  %3830 = vadd.xlane.f32.xlu0 %v3682_v42  ;;  %v3361_v27 = vadd.f32 %v6052_v10, %v3360_v22  ;;  %v3683_v48 = vmul.f32 %v6066_v8, %v3548_v25  ;;  %v3747_v62 = vmul.f32 %v6066_v8, %v3612_v51 }
 0x181   :  { %v3106_v28 = vpop.f32.mrf.mxu0  ;;  %v3362_v49 = vpop.f32.mrf.mxu1  ;;  %3956 = vadd.xlane.f32.xlu1 %v3745_v26  ;;  %v6332_v26 = vld [vmem:[%s6975_s4] ss:$0 sm:$0xff] }
 0x182   :  { %v3549_v18 = vmax.f32 %v3105_v2, 0.0  ;;  %v3613_v30 = vmax.f32 %v3361_v27, 0.0 }
 0x183   :  { %v3107_v59 = vpop.f32.mrf.mxu0  ;;  %v3363_v33 = vpop.f32.mrf.mxu1 }
 0x184   :  { %v3108_v20 = vadd.f32 %v6052_v10, %v3107_v59  ;;  %3958 = vadd.xlane.f32.xlu0 %v3746_v29  ;;  %v3684_v56 = vmul.f32 %v6066_v8, %v3549_v18  ;;  %v3364_v52 = vadd.f32 %v6052_v10, %v3363_v33  ;;  %v3748_v58 = vmul.f32 %v6066_v8, %v3613_v30 }
 0x185   :  { %v3109_v54 = vpop.f32.mrf.mxu0  ;;  %v3365_v24 = vpop.f32.mrf.mxu1  ;;  %3832 = vadd.xlane.f32.xlu1 %v3683_v48 }
 0x186   :  { %v3550_v23 = vmax.f32 %v3108_v20, 0.0  ;;  %v3614_v12 = vmax.f32 %v3364_v52, 0.0 }
 0x187   :  { %v3112_v4 = vpop.f32.mrf.mxu0  ;;  %v3368_v0 = vpop.f32.mrf.mxu1 }
 0x188   :  { %v3113_v55 = vadd.f32 %v6052_v10, %v3112_v4  ;;  %3834 = vadd.xlane.f32.xlu0 %v3684_v56  ;;  %v3369_v15 = vadd.f32 %v6052_v10, %v3368_v0  ;;  %v3685_v39 = vmul.f32 %v6066_v8, %v3550_v23  ;;  %v3749_v16 = vmul.f32 %v6066_v8, %v3614_v12 }
 0x189   :  { %v3114_v63 = vpop.f32.mrf.mxu0  ;;  %v3370_v13 = vpop.f32.mrf.mxu1  ;;  %3960 = vadd.xlane.f32.xlu1 %v3747_v62 }
 0x18a   :  { %v3551_v1 = vmax.f32 %v3113_v55, 0.0  ;;  %v3615_v11 = vmax.f32 %v3369_v15, 0.0 }
 0x18b   :  { %v3115_v38 = vpop.f32.mrf.mxu0  ;;  %v3371_v3 = vpop.f32.mrf.mxu1 }
 0x18c   :  { %v3116_v53 = vadd.f32 %v6052_v10, %v3115_v38  ;;  %3962 = vadd.xlane.f32.xlu0 %v3748_v58  ;;  %v3686_v14 = vmul.f32 %v6066_v8, %v3551_v1  ;;  %v3372_v35 = vadd.f32 %v6317_v34, %v3371_v3  ;;  %v3750_v41 = vmul.f32 %v6066_v8, %v3615_v11 }
 0x18d   :  { %v3117_v32 = vpop.f32.mrf.mxu0  ;;  %v3373_v40 = vpop.f32.mrf.mxu1  ;;  %3836 = vadd.xlane.f32.xlu1 %v3685_v39 }
 0x18e   :  { %v3552_v36 = vmax.f32 %v3116_v53, 0.0  ;;  %v3616_v43 = vmax.f32 %v3372_v35, 0.0 }
 0x18f   :  { %v3120_v44 = vpop.f32.mrf.mxu0  ;;  %v3376_v37 = vpop.f32.mrf.mxu1 }
 0x190   :  { %v3121_v7 = vadd.f32 %v6317_v34, %v3120_v44  ;;  %3838 = vadd.xlane.f32.xlu0 %v3686_v14  ;;  %v3377_v21 = vadd.f32 %v6317_v34, %v3376_v37  ;;  %v3687_v61 = vmul.f32 %v6066_v8, %v3552_v36  ;;  %v3751_v18 = vmul.f32 %v6332_v26, %v3616_v43 }
 0x191   :  { %v3122_v5 = vpop.f32.mrf.mxu0  ;;  %v3378_v10 = vpop.f32.mrf.mxu1  ;;  %3964 = vadd.xlane.f32.xlu1 %v3749_v16 }
 0x192   :  { %v3553_v17 = vmax.f32 %v3121_v7, 0.0  ;;  %v3617_v31 = vmax.f32 %v3377_v21, 0.0 }
 0x193   :  { %v3123_v57 = vpop.f32.mrf.mxu0  ;;  %v3379_v45 = vpop.f32.mrf.mxu1 }
 0x194   :  { %v3124_v47 = vadd.f32 %v6317_v34, %v3123_v57  ;;  %3966 = vadd.xlane.f32.xlu0 %v3750_v41  ;;  %v3688_v42 = vmul.f32 %v6066_v8, %v3553_v17  ;;  %v3380_v50 = vadd.f32 %v6317_v34, %v3379_v45  ;;  %v3752_v29 = vmul.f32 %v6332_v26, %v3617_v31 }
 0x195   :  { %v3125_v19 = vpop.f32.mrf.mxu0  ;;  %v3381_v60 = vpop.f32.mrf.mxu1  ;;  %3840 = vadd.xlane.f32.xlu1 %v3687_v61 }
 0x196   :  { %v3554_v25 = vmax.f32 %v3124_v47, 0.0  ;;  %v3618_v51 = vmax.f32 %v3380_v50, 0.0 }
 0x197   :  { %v3128_v46 = vpop.f32.mrf.mxu0  ;;  %v3384_v22 = vpop.f32.mrf.mxu1 }
 0x198   :  { %v3129_v2 = vadd.f32 %v6317_v34, %v3128_v46  ;;  %3842 = vadd.xlane.f32.xlu0 %v3688_v42  ;;  %v3385_v8 = vadd.f32 %v6317_v34, %v3384_v22  ;;  %v3689_v48 = vmul.f32 %v6332_v26, %v3554_v25  ;;  %v3753_v62 = vmul.f32 %v6332_v26, %v3618_v51 }
 0x199   :  { %v3130_v28 = vpop.f32.mrf.mxu0  ;;  %v3386_v49 = vpop.f32.mrf.mxu1  ;;  %3968 = vadd.xlane.f32.xlu1 %v3751_v18 }
 0x19a   :  { %v3555_v27 = vmax.f32 %v3129_v2, 0.0  ;;  %v3619_v30 = vmax.f32 %v3385_v8, 0.0 }
 0x19b   :  { %v3131_v59 = vpop.f32.mrf.mxu0  ;;  %v3387_v33 = vpop.f32.mrf.mxu1 }
 0x19c   :  { %v3132_v20 = vadd.f32 %v6317_v34, %v3131_v59  ;;  %3970 = vadd.xlane.f32.xlu0 %v3752_v29  ;;  %v3690_v56 = vmul.f32 %v6332_v26, %v3555_v27  ;;  %v3388_v52 = vadd.f32 %v6317_v34, %v3387_v33  ;;  %v3754_v58 = vmul.f32 %v6332_v26, %v3619_v30 }
 0x19d   :  { %v3133_v54 = vpop.f32.mrf.mxu0  ;;  %v3389_v24 = vpop.f32.mrf.mxu1  ;;  %3844 = vadd.xlane.f32.xlu1 %v3689_v48 }
 0x19e   :  { %v3556_v23 = vmax.f32 %v3132_v20, 0.0  ;;  %v3620_v12 = vmax.f32 %v3388_v52, 0.0 }
 0x19f   :  { %v3136_v4 = vpop.f32.mrf.mxu0  ;;  %v3392_v0 = vpop.f32.mrf.mxu1 }
 0x1a0   :  { %v3137_v55 = vadd.f32 %v6317_v34, %v3136_v4  ;;  %3846 = vadd.xlane.f32.xlu0 %v3690_v56  ;;  %v3393_v15 = vadd.f32 %v6317_v34, %v3392_v0  ;;  %v3691_v39 = vmul.f32 %v6332_v26, %v3556_v23  ;;  %v3755_v16 = vmul.f32 %v6332_v26, %v3620_v12 }
 0x1a1   :  { %v3138_v63 = vpop.f32.mrf.mxu0  ;;  %v3394_v13 = vpop.f32.mrf.mxu1  ;;  %3972 = vadd.xlane.f32.xlu1 %v3753_v62 }
 0x1a2   :  { %v3557_v1 = vmax.f32 %v3137_v55, 0.0  ;;  %v3621_v11 = vmax.f32 %v3393_v15, 0.0 }
 0x1a3   :  { %v3139_v38 = vpop.f32.mrf.mxu0  ;;  %v3395_v3 = vpop.f32.mrf.mxu1 }
 0x1a4   :  { %v3140_v53 = vadd.f32 %v6317_v34, %v3139_v38  ;;  %3974 = vadd.xlane.f32.xlu0 %v3754_v58  ;;  %v3692_v14 = vmul.f32 %v6332_v26, %v3557_v1  ;;  %v3396_v35 = vadd.f32 %v6317_v34, %v3395_v3  ;;  %v3756_v41 = vmul.f32 %v6332_v26, %v3621_v11 }
 0x1a5   :  { %v3141_v32 = vpop.f32.mrf.mxu0  ;;  %v3397_v40 = vpop.f32.mrf.mxu1  ;;  %3848 = vadd.xlane.f32.xlu1 %v3691_v39 }
 0x1a6   :  { %v3558_v36 = vmax.f32 %v3140_v53, 0.0  ;;  %v3622_v43 = vmax.f32 %v3396_v35, 0.0 }
 0x1a7   :  { %v3144_v44 = vpop.f32.mrf.mxu0  ;;  %v3400_v37 = vpop.f32.mrf.mxu1 }
 0x1a8   :  { %v3145_v7 = vadd.f32 %v6317_v34, %v3144_v44  ;;  %3850 = vadd.xlane.f32.xlu0 %v3692_v14  ;;  %v3401_v21 = vadd.f32 %v6317_v34, %v3400_v37  ;;  %v3693_v61 = vmul.f32 %v6332_v26, %v3558_v36  ;;  %v3757_v18 = vmul.f32 %v6332_v26, %v3622_v43 }
 0x1a9   :  { %v3146_v5 = vpop.f32.mrf.mxu0  ;;  %v3402_v10 = vpop.f32.mrf.mxu1  ;;  %3976 = vadd.xlane.f32.xlu1 %v3755_v16 }
 0x1aa   :  { %v3559_v17 = vmax.f32 %v3145_v7, 0.0  ;;  %v3623_v31 = vmax.f32 %v3401_v21, 0.0 }
 0x1ab   :  { %v3147_v57 = vpop.f32.mrf.mxu0  ;;  %v3403_v45 = vpop.f32.mrf.mxu1 }
 0x1ac   :  { %v3148_v47 = vadd.f32 %v6317_v34, %v3147_v57  ;;  %3978 = vadd.xlane.f32.xlu0 %v3756_v41  ;;  %v3694_v42 = vmul.f32 %v6332_v26, %v3559_v17  ;;  %v3404_v50 = vadd.f32 %v6317_v34, %v3403_v45  ;;  %v3758_v29 = vmul.f32 %v6332_v26, %v3623_v31 }
 0x1ad   :  { %v3149_v19 = vpop.f32.mrf.mxu0  ;;  %v3405_v60 = vpop.f32.mrf.mxu1  ;;  %3852 = vadd.xlane.f32.xlu1 %v3693_v61 }
 0x1ae   :  { %v3560_v25 = vmax.f32 %v3148_v47, 0.0  ;;  %v3624_v51 = vmax.f32 %v3404_v50, 0.0 }
 0x1af   :  { %v3152_v46 = vpop.f32.mrf.mxu0  ;;  %v3408_v22 = vpop.f32.mrf.mxu1 }
 0x1b0   :  { %v3153_v2 = vadd.f32 %v6317_v34, %v3152_v46  ;;  %3854 = vadd.xlane.f32.xlu0 %v3694_v42  ;;  %v3409_v8 = vadd.f32 %v6317_v34, %v3408_v22  ;;  %v3695_v48 = vmul.f32 %v6332_v26, %v3560_v25  ;;  %v3759_v62 = vmul.f32 %v6332_v26, %v3624_v51 }
 0x1b1   :  { %v3154_v28 = vpop.f32.mrf.mxu0  ;;  %v3410_v49 = vpop.f32.mrf.mxu1  ;;  %3980 = vadd.xlane.f32.xlu1 %v3757_v18 }
 0x1b2   :  { %v3561_v27 = vmax.f32 %v3153_v2, 0.0  ;;  %v3625_v30 = vmax.f32 %v3409_v8, 0.0 }
 0x1b3   :  { %v3155_v59 = vpop.f32.mrf.mxu0  ;;  %v3411_v33 = vpop.f32.mrf.mxu1 }
 0x1b4   :  { %v3156_v20 = vadd.f32 %v6317_v34, %v3155_v59  ;;  %3982 = vadd.xlane.f32.xlu0 %v3758_v29  ;;  %v3696_v56 = vmul.f32 %v6332_v26, %v3561_v27  ;;  %v3412_v13 = vadd.f32 %v6317_v34, %v3411_v33  ;;  %v3760_v15 = vmul.f32 %v6332_v26, %v3625_v30 }
 0x1b5   :  { %v3157_v54 = vpop.f32.mrf.mxu0  ;;  %v3413_v24 = vpop.f32.mrf.mxu1  ;;  %3856 = vadd.xlane.f32.xlu1 %v3695_v48 }
 0x1b6   :  { %v3562_v23 = vmax.f32 %v3156_v20, 0.0  ;;  %v3626_v40 = vmax.f32 %v3412_v13, 0.0 }
 0x1b7   :  { %v3416_v4 = vpop.f32.mrf.mxu1  ;;  %v6364_v0 = vpop.xlane.xlu0 %3790 }
 0x1b8   :  { %v3417_v55 = vadd.f32 %v6317_v34, %v3416_v4  ;;  %v3160_v63 = vpop.f32.mrf.mxu0  ;;  %3858 = vadd.xlane.f32.xlu0 %v3696_v56  ;;  %v3697_v39 = vmul.f32 %v6332_v26, %v3562_v23  ;;  %v3761_v41 = vmul.f32 %v6332_v26, %v3626_v40 }
 0x1b9   :  { %v3418_v52 = vpop.f32.mrf.mxu1  ;;  %3984 = vadd.xlane.f32.xlu1 %v3759_v62  ;;  %v3161_v12 = vadd.f32 %v6317_v34, %v3160_v63 }
 0x1ba   :  { %v3162_v1 = vpop.f32.mrf.mxu0  ;;  %v3627_v3 = vmax.f32 %v3417_v55, 0.0 }
 0x1bb   :  { %v6370_v58 = vpop.xlane.xlu1 %3920  ;;  %v3419_v38 = vpop.f32.mrf.mxu1  ;;  %v3563_v17 = vmax.f32 %v3161_v12, 0.0 }
 0x1bc   :  { %v6373_v53 = vpop.xlane.xlu0 %3918  ;;  %v3163_v32 = vpop.f32.mrf.mxu0  ;;  %3986 = vadd.xlane.f32.xlu0 %v3760_v15  ;;  %v3762_v5 = vmul.f32 %v6332_v26, %v3627_v3  ;;  %v3420_v21 = vadd.f32 %v6317_v34, %v3419_v38 }
 0x1bd   :  { %v3164_v11 = vadd.f32 %v6317_v34, %v3163_v32  ;;  %v3421_v14 = vpop.f32.mrf.mxu1  ;;  %3860 = vadd.xlane.f32.xlu1 %v3697_v39  ;;  %v3698_v22 = vmul.f32 %v6332_v26, %v3563_v17  ;;  %v6420_v17 = vand.u32 127, %v130_v6 }
 0x1be   :  { %v3165_v44 = vpop.f32.mrf.mxu0  ;;  %v3628_v42 = vmax.f32 %v3420_v21, 0.0 }
 0x1bf   :  { %v3424_v37 = vpop.f32.mrf.mxu1  ;;  %v6377_v36 = vpop.xlane.xlu1 %3794  ;;  %v3564_v7 = vmax.f32 %v3164_v11, 0.0  ;;  %v4075_v6 = vadd.s32 4294967280, %v6420_v17 }
 0x1c0   :  { %v3425_v10 = vadd.f32 %v6317_v34, %v3424_v37  ;;  %v6381_v35 = vpop.xlane.xlu0 %3792  ;;  %v3168_v16 = vpop.f32.mrf.mxu0  ;;  %3988 = vadd.xlane.f32.xlu0 %v3761_v41  ;;  %v3763_v20 = vmul.f32 %v6332_v26, %v3628_v42 }
 0x1c1   :  { %v3426_v57 = vpop.f32.mrf.mxu1  ;;  %3990 = vadd.xlane.f32.xlu1 %v3762_v5  ;;  %v3699_v60 = vmul.f32 %v6332_v26, %v3564_v7  ;;  %v3169_v46 = vadd.f32 %v6317_v34, %v3168_v16 }
 0x1c2   :  { %v3170_v45 = vpop.f32.mrf.mxu0  ;;  %v3629_v19 = vmax.f32 %v3425_v10, 0.0 }
 0x1c3   :  { %v3427_v61 = vpop.f32.mrf.mxu1  ;;  %v6385_v47 = vpop.xlane.xlu1 %3796  ;;  %v3565_v33 = vmax.f32 %v3169_v46, 0.0 }
 0x1c4   :  { %v6388_v43 = vpop.xlane.xlu0 %3922  ;;  %v3171_v31 = vpop.f32.mrf.mxu0  ;;  %3862 = vadd.xlane.f32.xlu0 %v3698_v22  ;;  %v3764_v27 = vmul.f32 %v6332_v26, %v3629_v19  ;;  %v3428_v48 = vadd.f32 %v6317_v34, %v3427_v61  ;;  %v4068_v22 = vadd.s32 4294967288, %v6420_v17 }
 0x1c5   :  { %v3172_v25 = vadd.f32 %v6317_v34, %v3171_v31  ;;  %v3429_v2 = vpop.f32.mrf.mxu1  ;;  %3864 = vadd.xlane.f32.xlu1 %v3699_v60  ;;  %v3700_v52 = vmul.f32 %v6332_v26, %v3565_v33 }
 0x1c6   :  { %v3173_v28 = vpop.f32.mrf.mxu0  ;;  %v3630_v63 = vmax.f32 %v3428_v48, 0.0 }
 0x1c7   :  { %v3432_v49 = vpop.f32.mrf.mxu1  ;;  %v6393_v50 = vpop.xlane.xlu1 %3924  ;;  %v3566_v18 = vmax.f32 %v3172_v25, 0.0 }
 0x1c8   :  { %v3176_v8 = vpop.f32.mrf.mxu0  ;;  %v3433_v29 = vadd.f32 %v6317_v34, %v3432_v49  ;;  %v6397_v59 = vpop.xlane.xlu0 %3798  ;;  %3992 = vadd.xlane.f32.xlu0 %v3763_v20  ;;  %v3765_v37 = vmul.f32 %v6332_v26, %v3630_v63 }
 0x1c9   :  { %v3434_v54 = vpop.f32.mrf.mxu1  ;;  %3994 = vadd.xlane.f32.xlu1 %v3764_v27  ;;  %v3701_v4 = vmul.f32 %v6332_v26, %v3566_v18  ;;  %v3177_v13 = vadd.f32 %v6317_v34, %v3176_v8 }
 0x1ca   :  { %v3178_v24 = vpop.f32.mrf.mxu0  ;;  %v3631_v56 = vmax.f32 %v3433_v29, 0.0  ;;  %v4082_v54 = vadd.s32 4294967272, %v6420_v17 }
 0x1cb   :  { %v3435_v51 = vpop.f32.mrf.mxu1  ;;  %v6401_v30 = vpop.xlane.xlu1 %3800  ;;  %v3567_v14 = vmax.f32 %v3177_v13, 0.0 }
 0x1cc   :  { %v3179_v23 = vpop.f32.mrf.mxu0  ;;  %v6404_v55 = vpop.xlane.xlu0 %3926  ;;  %3866 = vadd.xlane.f32.xlu0 %v3700_v52  ;;  %v3766_v32 = vmul.f32 %v6332_v26, %v3631_v56  ;;  %v3436_v44 = vadd.f32 %v6317_v34, %v3435_v51  ;;  %v6441_v51 = vsub.s32 %v6420_v17, %v5151_v9  ;;  %v6444_v56 = vsub.s32 %v4068_v22, %v5151_v9 }
 0x1cd   :  { %v3180_v62 = vadd.f32 %v6317_v34, %v3179_v23  ;;  %v3437_v1 = vpop.f32.mrf.mxu1  ;;  %3868 = vadd.xlane.f32.xlu1 %v3701_v4  ;;  %v3702_v60 = vmul.f32 %v6332_v26, %v3567_v14  ;;  %v6447_v4 = vsub.s32 %v4075_v6, %v5151_v9  ;;  %v4089_v23 = vadd.s32 4294967264, %v6420_v17 }
 0x1ce   :  { %v3181_v15 = vpop.f32.mrf.mxu0  ;;  %v3632_v61 = vmax.f32 %v3436_v44, 0.0  ;;  %v4096_v52 = vadd.s32 4294967256, %v6420_v17 }
 0x1cf   :  { %v3440_v38 = vpop.f32.mrf.mxu1  ;;  %v6409_v3 = vpop.xlane.xlu1 %3928  ;;  %v3568_v39 = vmax.f32 %v3180_v62, 0.0  ;;  %v4103_v62 = vadd.s32 4294967248, %v6420_v17 }
 0x1d0   :  { %v3184_v40 = vpop.f32.mrf.mxu0  ;;  %v3441_v12 = vadd.f32 %v6317_v34, %v3440_v38  ;;  %v6413_v11 = vpop.xlane.xlu0 %3802  ;;  %3996 = vadd.xlane.f32.xlu0 %v3765_v37  ;;  %v3767_v48 = vmul.f32 %v6332_v26, %v3632_v61  ;;  %v6461_v37 = vsub.s32 %v4082_v54, %v5151_v9  ;;  %v4131_v61 = vadd.s32 4294967216, %v6420_v17 }
 0x1d1   :  { %v3442_v7 = vpop.f32.mrf.mxu1  ;;  %3998 = vadd.xlane.f32.xlu1 %v3766_v32  ;;  %v3703_v41 = vmul.f32 %v6332_v26, %v3568_v39  ;;  %v3185_v19 = vadd.f32 %v6317_v34, %v3184_v40 }
 0x1d2   :  { %v3186_v5 = vpop.f32.mrf.mxu0  ;;  %v3633_v21 = vmax.f32 %v3441_v12, 0.0  ;;  %v4110_v7 = vadd.s32 4294967240, %v6420_v17 }
 0x1d3   :  { %v3443_v10 = vpop.f32.mrf.mxu1  ;;  %v6417_v16 = vpop.xlane.xlu1 %3804  ;;  %v3569_v29 = vmax.f32 %v3185_v19, 0.0  ;;  %v4117_v5 = vadd.s32 4294967232, %v6420_v17 }
 0x1d4   :  { %v3187_v57 = vpop.f32.mrf.mxu0  ;;  %v6423_v45 = vpop.xlane.xlu0 %3930  ;;  %3870 = vadd.xlane.f32.xlu0 %v3702_v60  ;;  %v3768_v49 = vmul.f32 %v6332_v26, %v3633_v21  ;;  %v3444_v33 = vadd.f32 %v6317_v34, %v3443_v10  ;;  %v4124_v10 = vadd.s32 4294967224, %v6420_v17  ;;  %v4138_v60 = vadd.s32 4294967208, %v6420_v17 }
 0x1d5   :  { %v3188_v31 = vadd.f32 %v6317_v34, %v3187_v57  ;;  %v3445_v42 = vpop.f32.mrf.mxu1  ;;  %3872 = vadd.xlane.f32.xlu1 %v3703_v41  ;;  %v3704_v12 = vmul.f32 %v6332_v26, %v3569_v29  ;;  %v6467_v41 = vsub.s32 %v4089_v23, %v5151_v9  ;;  %v4152_v23 = vadd.s32 4294967192, %v6420_v17 }
 0x1d6   :  { %v3189_v46 = vpop.f32.mrf.mxu0  ;;  %v3634_v32 = vmax.f32 %v3444_v33, 0.0  ;;  %v6475_v42 = vsub.s32 %v4096_v52, %v5151_v9  ;;  %v6493_v54 = vsub.s32 %v4124_v10, %v5151_v9  ;;  %v4072_v52 = vrot.slane %v6381_v35, %v6444_v56 }
 0x1d7   :  { %v3448_v25 = vpop.f32.mrf.mxu1  ;;  %v6430_v2 = vpop.xlane.xlu1 %3932  ;;  %v3570_v28 = vmax.f32 %v3188_v31, 0.0  ;;  %v4145_v31 = vadd.s32 4294967200, %v6420_v17 }
 0x1d8   :  { %v3192_v18 = vpop.f32.mrf.mxu0  ;;  %v3449_v27 = vadd.f32 %v6317_v34, %v3448_v25  ;;  %v6434_v8 = vpop.xlane.xlu0 %3806  ;;  %4000 = vadd.xlane.f32.xlu0 %v3767_v48  ;;  %v3769_v29 = vmul.f32 %v6332_v26, %v3634_v32  ;;  %v6487_v48 = vsub.s32 %v4110_v7, %v5151_v9 }
 0x1d9   :  { %v3450_v20 = vpop.f32.mrf.mxu1  ;;  %4002 = vadd.xlane.f32.xlu1 %v3768_v49  ;;  %v3705_v15 = vmul.f32 %v6332_v26, %v3570_v28  ;;  %v3193_v40 = vadd.f32 %v6317_v34, %v3192_v18  ;;  %v6482_v49 = vsub.s32 %v4103_v62, %v5151_v9 }
 0x1da   :  { %v3194_v24 = vpop.f32.mrf.mxu0  ;;  %v3635_v1 = vmax.f32 %v3449_v27, 0.0  ;;  %v6490_v20 = vsub.s32 %v4117_v5, %v5151_v9 }
 0x1db   :  { %v3451_v63 = vpop.f32.mrf.mxu1  ;;  %v6450_v13 = vpop.xlane.xlu1 %3808  ;;  %v3571_v18 = vmax.f32 %v3193_v40, 0.0 }
 0x1dc   :  { %v3195_v38 = vpop.f32.mrf.mxu0  ;;  %v6455_v39 = vpop.xlane.xlu0 %3934  ;;  %3874 = vadd.xlane.f32.xlu0 %v3704_v12  ;;  %v3770_v22 = vmul.f32 %v6332_v26, %v3635_v1  ;;  %v3452_v27 = vadd.f32 %v6317_v34, %v3451_v63  ;;  %v6499_v63 = vsub.s32 %v4131_v61, %v5151_v9  ;;  %v6504_v1 = vsub.s32 %v4138_v60, %v5151_v9 }
 0x1dd   :  { %v3196_v14 = vadd.f32 %v6317_v34, %v3195_v38  ;;  %v3453_v44 = vpop.f32.mrf.mxu1  ;;  %3876 = vadd.xlane.f32.xlu1 %v3705_v15  ;;  %v6507_v15 = vsub.s32 %v4145_v31, %v5151_v9  ;;  %v4067_v38 = vrot.slane %v6364_v0, %v6441_v51  ;;  %v4159_v12 = vadd.s32 4294967184, %v6420_v17 }
 0x1de   :  { %v3197_v21 = vpop.f32.mrf.mxu0  ;;  %v3706_v7 = vmul.f32 %v6332_v26, %v3571_v18  ;;  %v4492_v0 = vrot.slane %v6370_v58, %v6444_v56  ;;  %v4079_v61 = vrot.slane %v6377_v36, %v6447_v4  ;;  %v4086_v58 = vrot.slane %v6385_v47, %v6461_v37 }
 0x1df   :  { %v3456_v57 = vpop.f32.mrf.mxu1  ;;  %v6470_v19 = vpop.xlane.xlu1 %3936  ;;  %v3572_v46 = vmax.f32 %v3196_v14, 0.0  ;;  %v3636_v14 = vmax.f32 %v3452_v27, 0.0  ;;  %v4093_v36 = vrot.slane %v6397_v59, %v6467_v41  ;;  %v4502_v18 = vrot.slane %v6393_v50, %v6461_v37 }
 0x1e0   :  { %v3200_v6 = vpop.f32.mrf.mxu0  ;;  %v3457_v25 = vadd.f32 %v6317_v34, %v3456_v57  ;;  %v6479_v28 = vpop.xlane.xlu0 %3810  ;;  %4004 = vadd.xlane.f32.xlu0 %v3769_v29  ;;  %v4488_v57 = vrot.slane %v6373_v53, %v6441_v51  ;;  %v4100_v47 = vrot.slane %v6401_v30, %v6475_v42  ;;  %v4507_v50 = vrot.slane %v6404_v55, %v6467_v41 }
 0x1e1   :  { %v3458_v33 = vpop.f32.mrf.mxu1  ;;  %4006 = vadd.xlane.f32.xlu1 %v3770_v22  ;;  %v3707_v40 = vmul.f32 %v6332_v26, %v3572_v46  ;;  %v3201_v44 = vadd.f32 %v6317_v34, %v3200_v6  ;;  %v6527_v46 = vsub.s32 %v4152_v23, %v5151_v9  ;;  %v4074_v22 = vsel %vm4073_vm0, %v4072_v52, %v4067_v38 }
 0x1e2   :  { %v3202_v24 = vpop.f32.mrf.mxu0  ;;  %v3637_v32 = vmax.f32 %v3457_v25, 0.0  ;;  %v4497_v6 = vrot.slane %v6388_v43, %v6447_v4  ;;  %v6535_v25 = vadd.s32 4294967176, %v6420_v17  ;;  %v4493_v59 = vsel %vm4073_vm0, %v4492_v0, %v4488_v57 }
 0x1e3   :  { %v6501_v62 = vpop.f32.mrf.mxu1  ;;  %v6524_v60 = vpop.xlane.xlu1 %3812  ;;  %v3573_v33 = vmax.f32 %v3201_v44, 0.0  ;;  %v3771_v24 = vmul.f32 %v6332_v26, %v3636_v14  ;;  %v4081_v52 = vsel %vm4080_vm1, %v4079_v61, %v4074_v22  ;;  %v6553_v30 = vsub.s32 %v4159_v12, %v5151_v9 }
 0x1e4   :  { %v3203_v35 = vpop.f32.mrf.mxu0  ;;  %v6516_v10 = vpop.xlane.xlu0 %3938  ;;  %3878 = vadd.xlane.f32.xlu0 %v3706_v7  ;;  %v3772_v29 = vmul.f32 %v6332_v26, %v3637_v32  ;;  %v4498_v55 = vsel %vm4080_vm1, %v4497_v6, %v4493_v59  ;;  %v4107_v12 = vrot.slane %v6413_v11, %v6482_v49  ;;  %v4517_v11 = vrot.slane %v6423_v45, %v6482_v49 }
 0x1e5   :  { %v3204_v5 = vadd.f32 %v6317_v34, %v3203_v35  ;;  %v3461_v21 = vpop.f32.mrf.mxu1  ;;  %3880 = vadd.xlane.f32.xlu1 %v3707_v40  ;;  %v4088_v40 = vsel %vm4087_vm2, %v4086_v58, %v4081_v52  ;;  %v4512_v35 = vrot.slane %v6409_v3, %v6475_v42  ;;  %v4503_v3 = vsel %vm4087_vm2, %v4502_v18, %v4498_v55 }
 0x1e6   :  { %v3205_v31 = vpop.f32.mrf.mxu0  ;;  %v4095_v21 = vsel %vm4094_vm3, %v4093_v36, %v4088_v40  ;;  %v4508_v58 = vsel %vm4094_vm3, %v4507_v50, %v4503_v3  ;;  %v4121_v45 = vrot.slane %v6434_v8, %v6490_v20  ;;  %v4527_v52 = vrot.slane %v6455_v39, %v6490_v20 }
 0x1e7   :  { %v3464_v53 = vpop.f32.mrf.mxu1  ;;  %v3574_v27 = vmax.f32 %v3204_v5, 0.0  ;;  %v4102_v61 = vsel %vm4101_vm4, %v4100_v47, %v4095_v21  ;;  %v3708_v31 = vmul.f32 %v6332_v26, %v3573_v33  ;;  %v4128_v50 = vrot.slane %v6450_v13, %v6493_v54 }
 0x1e8   :  { %v3208_v43 = vpop.f32.mrf.mxu0  ;;  %v6550_v38 = vpop.xlane.xlu0 %3814  ;;  %4008 = vadd.xlane.f32.xlu0 %v3771_v24  ;;  %v3465_v44 = vadd.f32 %v6317_v34, %v3464_v53  ;;  %v4114_v53 = vrot.slane %v6417_v16, %v6487_v48  ;;  %v4109_v24 = vsel %vm4108_vm5, %v4107_v12, %v4102_v61  ;;  %v4522_v16 = vrot.slane %v6430_v2, %v6487_v48 }
 0x1e9   :  { %v3209_v17 = vadd.f32 %v6317_v34, %v3208_v43  ;;  %v3466_v23 = vpop.f32.mrf.mxu1  ;;  %v6559_v7 = vpop.xlane.xlu1 %3940  ;;  %4010 = vadd.xlane.f32.xlu1 %v3772_v29  ;;  %v3709_v0 = vmul.f32 %v6332_v26, %v3574_v27  ;;  %v4513_v27 = vsel %vm4101_vm4, %v4512_v35, %v4508_v58  ;;  %v4135_v39 = vrot.slane %v6479_v28, %v6499_v63 }
 0x1ea   :  { %v3210_v32 = vpop.f32.mrf.mxu0  ;;  %v3639_v29 = vmax.f32 %v3465_v44, 0.0  ;;  %v4518_v2 = vsel %vm4108_vm5, %v4517_v11, %v4513_v27  ;;  %v4532_v44 = vrot.slane %v6470_v19, %v6493_v54  ;;  %v4537_v13 = vrot.slane %v6516_v10, %v6499_v63 }
 0x1eb   :  { %v3575_v14 = vmax.f32 %v3209_v17, 0.0  ;;  %v3467_v5 = vpop.f32.mrf.mxu1  ;;  %v4523_v3 = vsel %vm4115_vm6, %v4522_v16, %v4518_v2  ;;  %v4142_v19 = vrot.slane %v6524_v60, %v6504_v1  ;;  %v6611_v11 = vsub.s32 %v6535_v25, %v5151_v9 }
 0x1ec   :  { %v3211_v57 = vpop.f32.mrf.mxu0  ;;  %v3468_v36 = vadd.f32 %v6317_v34, %v3467_v5  ;;  %3882 = vadd.xlane.f32.xlu0 %v3708_v31  ;;  %v3774_v21 = vmul.f32 %v6332_v26, %v3639_v29  ;;  %v4528_v28 = vsel %vm4122_vm7, %v4527_v52, %v4523_v3 }
 0x1ed   :  { %v3212_v22 = vadd.f32 %v6317_v34, %v3211_v57  ;;  %v3469_v6 = vpop.f32.mrf.mxu1  ;;  %v3710_v47 = vmul.f32 %v6332_v26, %v3575_v14  ;;  %3884 = vadd.xlane.f32.xlu1 %v3709_v0  ;;  %v6583_v17 = vpop.xlane.xlu0 %3942  ;;  %v4116_v14 = vsel %vm4115_vm6, %v4114_v53, %v4109_v24  ;;  %v4542_v24 = vrot.slane %v6559_v7, %v6504_v1 }
 0x1ee   :  { %v3213_v18 = vpop.f32.mrf.mxu0  ;;  %v3817_v32 = vpop.xlane.xlu1 %3816  ;;  %v3640_v5 = vmax.f32 %v3468_v36, 0.0  ;;  %v4123_v57 = vsel %vm4122_vm7, %v4121_v45, %v4116_v14  ;;  %v4149_v6 = vrot.slane %v6550_v38, %v6507_v15  ;;  %v4533_v36 = vsel %vm4129_vm8, %v4532_v44, %v4528_v28 }
 0x1ef   :  { %v3576_v43 = vmax.f32 %v3212_v22, 0.0  ;;  %v3472_v33 = vpop.f32.mrf.mxu1  ;;  %v4130_v10 = vsel %vm4129_vm8, %v4128_v50, %v4123_v57  ;;  %v4156_v60 = vrot.slane %v3817_v32, %v6527_v46  ;;  %v4547_v50 = vrot.slane %v6583_v17, %v6507_v15 }
 0x1f0   :  { %v3216_v23 = vpop.f32.mrf.mxu0  ;;  %v3473_v59 = vadd.f32 %v6317_v34, %v3472_v33  ;;  %3886 = vadd.xlane.f32.xlu0 %v3710_v47  ;;  %v3775_v29 = vmul.f32 %v6332_v26, %v3640_v5  ;;  %v4538_v47 = vsel %vm4136_vm9, %v4537_v13, %v4533_v36 }
 0x1f1   :  { %v3217_v40 = vadd.f32 %v6317_v34, %v3216_v23  ;;  %v3474_v8 = vpop.f32.mrf.mxu1  ;;  %v3711_v35 = vmul.f32 %v6332_v26, %v3576_v43  ;;  %v3819_v31 = vpop.xlane.xlu0 %3818  ;;  %v4137_v43 = vsel %vm4136_vm9, %v4135_v39, %v4130_v10 }
 0x1f2   :  { %v3218_v55 = vpop.f32.mrf.mxu0  ;;  %v3641_v61 = vmax.f32 %v3473_v59, 0.0  ;;  %v3945_v58 = vpop.xlane.xlu1 %3944  ;;  %v4163_v33 = vrot.slane %v3819_v31, %v6553_v30  ;;  %v4144_v25 = vsel %vm4143_vm10, %v4142_v19, %v4137_v43 }
 0x1f3   :  { %v3577_v12 = vmax.f32 %v3217_v40, 0.0  ;;  %v3475_v0 = vpop.f32.mrf.mxu1  ;;  %3888 = vadd.xlane.f32.xlu1 %v3711_v35  ;;  %v4151_v52 = vsel %vm4150_vm11, %v4149_v6, %v4144_v25  ;;  %v4552_v2 = vrot.slane %v3945_v58, %v6527_v46 }
 0x1f4   :  { %v3219_v22 = vpop.f32.mrf.mxu0  ;;  %4014 = vadd.xlane.f32.xlu0 %v3774_v21  ;;  %v3776_v45 = vmul.f32 %v6332_v26, %v3641_v61  ;;  %v3476_v32 = vadd.f32 %v6317_v34, %v3475_v0  ;;  %v4158_v7 = vsel %vm4157_vm12, %v4156_v60, %v4151_v52 }
 0x1f5   :  { %v3477_v53 = vpop.f32.mrf.mxu1  ;;  %v3220_v18 = vadd.f32 %v6317_v34, %v3219_v22  ;;  %v3712_v38 = vmul.f32 %v6332_v26, %v3577_v12  ;;  %v3947_v16 = vpop.xlane.xlu0 %3946  ;;  %v4165_v55 = vsel %vm4164_vm13, %v4163_v33, %v4158_v7  ;;  %v4543_v12 = vsel %vm4143_vm10, %v4542_v24, %v4538_v47 }
 0x1f6   :  { %v3221_v27 = vpop.f32.mrf.mxu0  ;;  %v3821_v40 = vpop.xlane.xlu1 %3820  ;;  %v4557_v39 = vrot.slane %v3947_v16, %v6553_v30  ;;  %v4548_v19 = vsel %vm4150_vm11, %v4547_v50, %v4543_v12  ;;  %v3642_v61 = vmax.f32 %v3476_v32, 0.0 }
 0x1f7   :  { %v3480_v9 = vpop.f32.mrf.mxu1  ;;  %4016 = vadd.xlane.f32.xlu1 %v3775_v29  ;;  %v3578_v14 = vmax.f32 %v3220_v18, 0.0  ;;  %v4170_v44 = vrot.slane %v3821_v40, %v6611_v11  ;;  %v4553_v10 = vsel %vm4157_vm12, %v4552_v2, %v4548_v19 }
 0x1f8   :  { %v3224_v23 = vpop.f32.mrf.mxu0  ;;  %v3481_v59 = vadd.f32 %v6317_v34, %v3480_v9  ;;  %3890 = vadd.xlane.f32.xlu0 %v3712_v38  ;;  %v4558_v60 = vsel %vm4164_vm13, %v4557_v39, %v4553_v10  ;;  %v3777_v24 = vmul.f32 %v6332_v26, %v3642_v61 }
 0x1f9   :  { %v3225_v8 = vadd.f32 %v6317_v34, %v3224_v23  ;;  %v3482_v35 = vpop.f32.mrf.mxu1  ;;  %v4172_v0 = vsel %vm4171_vm14, %v4170_v44, %v4165_v55  ;;  %v6638_v57 = vpop.xlane.xlu0 %3822  ;;  %v3713_v6 = vmul.f32 %v6332_v26, %v3578_v14 }
 0x1fa   :  { %v3226_v5 = vpop.f32.mrf.mxu0  ;;  %v3643_v13 = vmax.f32 %v3481_v59, 0.0  ;;  %4173 = vst [vmem:[#allocation8] ss:$8 sm:$0x1] %v4172_v0  ;;  %v3949_v22 = vpop.xlane.xlu1 %3948 }
 0x1fb   :  { %v3579_v17 = vmax.f32 %v3225_v8, 0.0  ;;  %v3483_v21 = vpop.f32.mrf.mxu1  ;;  %4018 = vadd.xlane.f32.xlu1 %v3776_v45  ;;  %v4562_v58 = vrot.slane %v3949_v22, %v6611_v11 }
 0x1fc   :  { %v3227_v3 = vpop.f32.mrf.mxu0  ;;  %v3778_v18 = vmul.f32 %v6332_v26, %v3643_v13  ;;  %v3484_v16 = vadd.f32 %v6317_v34, %v3483_v21 }
 0x1fd   :  { %v3714_v31 = vmul.f32 %v6332_v26, %v3579_v17  ;;  %v3485_v28 = vpop.f32.mrf.mxu1  ;;  %v3228_v53 = vadd.f32 %v6317_v34, %v3227_v3  ;;  %v4563_v29 = vsel %vm4171_vm14, %v4562_v58, %v4558_v60  ;;  %v6649_v43 = vpop.xlane.xlu0 %3950 }
 0x1fe   :  { %v3229_v36 = vpop.f32.mrf.mxu0  ;;  %4565 = vst [vmem:[#allocation8 + $0x4] ss:$8 sm:$0x1] %v4563_v29  ;;  %v6652_v33 = vpop.xlane.xlu1 %3824  ;;  %v3644_v14 = vmax.f32 %v3484_v16, 0.0 }
 0x1ff   :  { %3894 = vadd.xlane.f32.xlu0 %v3714_v31  ;;  %v3488_v27 = vpop.f32.mrf.mxu1  ;;  %3892 = vadd.xlane.f32.xlu1 %v3713_v6  ;;  %v3580_v45 = vmax.f32 %v3228_v53, 0.0  ;;  %v6675_v31 = vld [vmem:[%s6974_s3] ss:$0 sm:$0xff] }
 0x200   :  { %v3232_v47 = vpop.f32.mrf.mxu0  ;;  %v3489_v38 = vadd.f32 %v6317_v34, %v3488_v27  ;;  %v3779_v19 = vmul.f32 %v6332_v26, %v3644_v14 }
 0x201   :  { %v3233_v9 = vadd.f32 %v6317_v34, %v3232_v47  ;;  %v3490_v25 = vpop.f32.mrf.mxu1  ;;  %v6657_v32 = vpop.xlane.xlu0 %3826  ;;  %v3715_v2 = vmul.f32 %v6332_v26, %v3580_v45 }
 0x202   :  { %v3234_v23 = vpop.f32.mrf.mxu0  ;;  %v3645_v52 = vmax.f32 %v3489_v38, 0.0  ;;  %v6660_v35 = vpop.xlane.xlu1 %3952 }
 0x203   :  { %v3581_v59 = vmax.f32 %v3233_v9, 0.0  ;;  %4022 = vadd.xlane.f32.xlu0 %v3778_v18  ;;  %v3491_v50 = vpop.f32.mrf.mxu1  ;;  %4020 = vadd.xlane.f32.xlu1 %v3777_v24 }
 0x204   :  { %v3235_v40 = vpop.f32.mrf.mxu0  ;;  %v3780_v55 = vmul.f32 %v6332_v26, %v3645_v52  ;;  %v3492_v22 = vadd.f32 %v6675_v31, %v3491_v50 }
 0x205   :  { %v3716_v8 = vmul.f32 %v6332_v26, %v3581_v59  ;;  %v3493_v7 = vpop.f32.mrf.mxu1  ;;  %v3236_v44 = vadd.f32 %v6317_v34, %v3235_v40  ;;  %v6665_v17 = vpop.xlane.xlu0 %3954 }
 0x206   :  { %v3237_v5 = vpop.f32.mrf.mxu0  ;;  %v6668_v12 = vpop.xlane.xlu1 %3828  ;;  %v3646_v29 = vmax.f32 %v3492_v22, 0.0 }
 0x207   :  { %3898 = vadd.xlane.f32.xlu0 %v3716_v8  ;;  %v3496_v39 = vpop.f32.mrf.mxu1  ;;  %3896 = vadd.xlane.f32.xlu1 %v3715_v2  ;;  %v3582_v61 = vmax.f32 %v3236_v44, 0.0  ;;  %v6699_v44 = vld [vmem:[%s6975_s4] ss:$0 sm:$0xff]  ;;  %s5104_s4 = smov [#allocation8]  }
 0x208   :  { %v3240_v13 = vpop.f32.mrf.mxu0  ;;  %v3497_v21 = vadd.f32 %v6317_v34, %v3496_v39  ;;  %v3781_v23 = vmul.f32 %v6332_v26, %v3646_v29  ;;  %s4867_s20 = sshll.u32 %s5104_s4, 4  ;;  %s4868_s20 = int_to_ptr.vmem [resolvable:$true] %s4867_s20 }
 0x209   :  { %v3241_v0 = vadd.f32 %v6317_v34, %v3240_v13  ;;  %v3498_v3 = vpop.f32.mrf.mxu1  ;;  %v6678_v53 = vpop.xlane.xlu0 %3830  ;;  %v3717_v27 = vmul.f32 %v6332_v26, %v3582_v61  ;;  %s5069_s21 = scalar_lea.vmem %s4868_s20, 128  ;;  %p5074_p2 = scmp.lt.s32.totalorder %s4868_s20, %s4868_s20 }
 0x20a   :  { %v3242_v28 = vpop.f32.mrf.mxu0  ;;  %v3647_v6 = vmax.f32 %v3497_v21, 0.0  ;;  %v6681_v60 = vpop.xlane.xlu1 %3956  ;;  %p5070_p1 = scmp.ne.s32.totalorder %s4868_s20, %s5069_s21  ;;  %p5075_p3 = scmp.lt.s32.totalorder %s5069_s21, %s5069_s21 }
 0x20b   :  { %v3583_v10 = vmax.f32 %v3241_v0, 0.0  ;;  %4026 = vadd.xlane.f32.xlu0 %v3780_v55  ;;  %v3499_v58 = vpop.f32.mrf.mxu1  ;;  %4024 = vadd.xlane.f32.xlu1 %v3779_v19 }
 0x20c   :  { %v3243_v34 = vpop.f32.mrf.mxu0  ;;  %v3782_v9 = vmul.f32 %v6332_v26, %v3647_v6  ;;  %v3500_v52 = vadd.f32 %v6675_v31, %v3499_v58  ;;  %p5076_p4 = por %p5075_p3, %p5074_p2 }
 0x20d   :  { %v3718_v36 = vmul.f32 %v6332_v26, %v3583_v10  ;;  %v3501_v18 = vpop.f32.mrf.mxu1  ;;  %v3244_v47 = vadd.f32 %v6675_v31, %v3243_v34  ;;  %v6686_v25 = vpop.xlane.xlu0 %3958 }
 0x20e   :  { %v3245_v38 = vpop.f32.mrf.mxu0  ;;  %v6688_v45 = vpop.xlane.xlu1 %3832  ;;  %v3648_v13 = vmax.f32 %v3500_v52, 0.0  ;;  %p5077_p5 = pnand %p5076_p4, %p5070_p1 }
 0x20f   :  { %3902 = vadd.xlane.f32.xlu0 %v3718_v36  ;;  %3900 = vadd.xlane.f32.xlu1 %v3717_v27  ;;  %v3584_v59 = vmax.f32 %v3244_v47, 0.0 }
 0x210   :  { %v3248_v24 = vpop.f32.mrf.mxu0  ;;  %v3504_v8 = vpop.f32.mrf.mxu1  ;;  %v3783_v6 = vmul.f32 %v6699_v44, %v3648_v13 }
 0x211   :  { %v3249_v16 = vadd.f32 %v6675_v31, %v3248_v24  ;;  %v6693_v7 = vpop.xlane.xlu0 %3834  ;;  %v3505_v2 = vadd.f32 %v6675_v31, %v3504_v8  ;;  %v3719_v39 = vmul.f32 %v6699_v44, %v3584_v59 }
 0x212   :  { %v3250_v50 = vpop.f32.mrf.mxu0  ;;  %v6702_v5 = vpop.xlane.xlu1 %3960 }
 0x213   :  { %v3585_v40 = vmax.f32 %v3249_v16, 0.0  ;;  %4030 = vadd.xlane.f32.xlu0 %v3782_v9  ;;  %4028 = vadd.xlane.f32.xlu1 %v3781_v23  ;;  %v3506_v55 = vpop.f32.mrf.mxu1  ;;  %v3649_v21 = vmax.f32 %v3505_v2, 0.0 }
 0x214   :  { %v3251_v14 = vpop.f32.mrf.mxu0 }
 0x215   :  { %v3720_v26 = vmul.f32 %v6699_v44, %v3585_v40  ;;  %v3252_v0 = vadd.f32 %v6675_v31, %v3251_v14  ;;  %v3507_v19 = vpop.f32.mrf.mxu1  ;;  %v3784_v61 = vmul.f32 %v6699_v44, %v3649_v21  ;;  %v6707_v22 = vpop.xlane.xlu0 %3962 }
 0x216   :  { %v3253_v3 = vpop.f32.mrf.mxu0  ;;  %v6709_v28 = vpop.xlane.xlu1 %3836  ;;  %v3508_v34 = vadd.f32 %v6675_v31, %v3507_v19 }
 0x217   :  { %3906 = vadd.xlane.f32.xlu0 %v3720_v26  ;;  %3904 = vadd.xlane.f32.xlu1 %v3719_v39  ;;  %v3509_v10 = vpop.f32.mrf.mxu1  ;;  %v3586_v58 = vmax.f32 %v3252_v0, 0.0  ;;  %v3460_v0 = vadd.f32 %v6675_v31, %v6501_v62 }
 0x218   :  { %v3256_v36 = vpop.f32.mrf.mxu0  ;;  %v3650_v9 = vmax.f32 %v3508_v34, 0.0 }
 0x219   :  { %v3257_v18 = vadd.f32 %v6675_v31, %v3256_v36  ;;  %v6714_v27 = vpop.xlane.xlu0 %3838  ;;  %v3721_v38 = vmul.f32 %v6699_v44, %v3586_v58  ;;  %v4198_v36 = vrot.slane %v6652_v33, %v6444_v56  ;;  %v3638_v62 = vmax.f32 %v3460_v0, 0.0 }
 0x21a   :  { %v6716_v29 = vpop.xlane.xlu1 %3964  ;;  %v3258_v47 = vpop.f32.mrf.mxu0  ;;  %v3785_v14 = vmul.f32 %v6699_v44, %v3650_v9 }
 0x21b   :  { %4034 = vadd.xlane.f32.xlu0 %v3784_v61  ;;  %4032 = vadd.xlane.f32.xlu1 %v3783_v6  ;;  %v3587_v24 = vmax.f32 %v3257_v18, 0.0 }
 0x21c   :  { %v3259_v16 = vpop.f32.mrf.mxu0 }
 0x21d   :  { %v3722_v23 = vmul.f32 %v6699_v44, %v3587_v24  ;;  %v3260_v52 = vadd.f32 %v6675_v31, %v3259_v16  ;;  %v6721_v50 = vpop.xlane.xlu0 %3966  ;;  %v4194_v16 = vrot.slane %v6638_v57, %v6441_v51 }
 0x21e   :  { %v3512_v59 = vpop.f32.mrf.mxu1  ;;  %v6724_v8 = vpop.xlane.xlu1 %3840 }
 0x21f   :  { %3908 = vadd.xlane.f32.xlu1 %v3721_v38  ;;  %v3513_v40 = vadd.f32 %v6675_v31, %v3512_v59  ;;  %v3261_v2 = vpop.f32.mrf.mxu0  ;;  %v3588_v26 = vmax.f32 %v3260_v52, 0.0  ;;  %3910 = vadd.xlane.f32.xlu0 %v3722_v23  ;;  %v4203_v38 = vrot.slane %v6657_v32, %v6447_v4  ;;  %v4590_v23 = vrot.slane %v6660_v35, %v6444_v56 }
 0x220   :  { %v3514_v55 = vpop.f32.mrf.mxu1  ;;  %v4586_v52 = vrot.slane %v6649_v43, %v6441_v51  ;;  %v4199_v32 = vsel %vm4073_vm0, %v4198_v36, %v4194_v16  ;;  %v4223_v36 = vrot.slane %v6693_v7, %v6482_v49 }
 0x221   :  { %v3651_v39 = vmax.f32 %v3513_v40, 0.0  ;;  %v6727_v21 = vpop.xlane.xlu0 %3842  ;;  %v3723_v10 = vmul.f32 %v6699_v44, %v3588_v26  ;;  %v4595_v40 = vrot.slane %v6665_v17, %v6447_v4  ;;  %v4204_v43 = vsel %vm4080_vm1, %v4203_v38, %v4199_v32 }
 0x222   :  { %v3515_v13 = vpop.f32.mrf.mxu1  ;;  %v6733_v61 = vpop.xlane.xlu1 %3968  ;;  %v4213_v17 = vrot.slane %v6678_v53, %v6467_v41  ;;  %v4605_v53 = vrot.slane %v6686_v25, %v6467_v41  ;;  %v4233_v25 = vrot.slane %v6714_v27, %v6490_v20 }
 0x223   :  { %4036 = vadd.xlane.f32.xlu1 %v3785_v14  ;;  %v3786_v3 = vmul.f32 %v6699_v44, %v3651_v39  ;;  %v3516_v19 = vadd.f32 %v6675_v31, %v3515_v13  ;;  %v4208_v14 = vrot.slane %v6668_v12, %v6461_v37  ;;  %v3773_v39 = vmul.f32 %v6699_v44, %v3638_v62 }
 0x224   :  { %v3517_v6 = vpop.f32.mrf.mxu1  ;;  %v4591_v12 = vsel %vm4073_vm0, %v4590_v23, %v4586_v52 }
 0x225   :  { %v3652_v58 = vmax.f32 %v3516_v19, 0.0  ;;  %v3264_v34 = vpop.f32.mrf.mxu0  ;;  %4038 = vadd.xlane.f32.xlu0 %v3786_v3  ;;  %v6739_v47 = vpop.xlane.xlu0 %3970  ;;  %v4600_v19 = vrot.slane %v6681_v60, %v6461_v37  ;;  %v4209_v62 = vsel %vm4087_vm2, %v4208_v14, %v4204_v43  ;;  %v4610_v60 = vrot.slane %v6702_v5, %v6475_v42 }
 0x226   :  { %v3265_v18 = vadd.f32 %v6675_v31, %v3264_v34  ;;  %v6743_v24 = vpop.xlane.xlu1 %3844  ;;  %v4596_v34 = vsel %vm4080_vm1, %v4595_v40, %v4591_v12  ;;  %v4214_v23 = vsel %vm4094_vm3, %v4213_v17, %v4209_v62  ;;  %v4238_v40 = vrot.slane %v6724_v8, %v6493_v54 }
 0x227   :  { %3912 = vadd.xlane.f32.xlu1 %v3723_v10  ;;  %v3266_v9 = vpop.f32.mrf.mxu0  ;;  %v3787_v33 = vmul.f32 %v6699_v44, %v3652_v58  ;;  %v4218_v10 = vrot.slane %v6688_v45, %v6475_v42  ;;  %v4228_v45 = vrot.slane %v6709_v28, %v6487_v48  ;;  %v4601_v52 = vsel %vm4087_vm2, %v4600_v19, %v4596_v34 }
 0x228   :  { %v3589_v59 = vmax.f32 %v3265_v18, 0.0  ;;  %v4615_v28 = vrot.slane %v6707_v22, %v6482_v49  ;;  %v4606_v32 = vsel %vm4094_vm3, %v4605_v53, %v4601_v52  ;;  %v4620_v22 = vrot.slane %v6716_v29, %v6487_v48 }
 0x229   :  { %v3267_v2 = vpop.f32.mrf.mxu0  ;;  %v6759_v55 = vpop.xlane.xlu0 %3846  ;;  %v4219_v5 = vsel %vm4101_vm4, %v4218_v10, %v4214_v23  ;;  %v4248_v8 = vrot.slane %v6743_v24, %v6504_v1  ;;  %v4625_v17 = vrot.slane %v6721_v50, %v6490_v20  ;;  %v4630_v29 = vrot.slane %v6733_v61, %v6493_v54 }
 0x22a   :  { %v3724_v57 = vmul.f32 %v6699_v44, %v3589_v59  ;;  %v3520_v26 = vpop.f32.mrf.mxu1  ;;  %v3268_v35 = vadd.f32 %v6675_v31, %v3267_v2  ;;  %v6766_v3 = vpop.xlane.xlu1 %3972  ;;  %v4224_v27 = vsel %vm4108_vm5, %v4223_v36, %v4219_v5  ;;  %v4635_v50 = vrot.slane %v6739_v47, %v6499_v63 }
 0x22b   :  { %4040 = vadd.xlane.f32.xlu1 %v3787_v33  ;;  %v3521_v13 = vadd.f32 %v6675_v31, %v3520_v26  ;;  %v3269_v0 = vpop.f32.mrf.mxu0  ;;  %v4229_v26 = vsel %vm4115_vm6, %v4228_v45, %v4224_v27 }
 0x22c   :  { %v3590_v6 = vmax.f32 %v3268_v35, 0.0  ;;  %v3522_v58 = vpop.f32.mrf.mxu1  ;;  %3914 = vadd.xlane.f32.xlu0 %v3724_v57  ;;  %v4611_v57 = vsel %vm4101_vm4, %v4610_v60, %v4606_v32  ;;  %v4234_v43 = vsel %vm4122_vm7, %v4233_v25, %v4229_v26 }
 0x22d   :  { %v3653_v18 = vmax.f32 %v3521_v13, 0.0  ;;  %v3975_v16 = vpop.xlane.xlu0 %3974  ;;  %v4253_v13 = vrot.slane %v6759_v55, %v6507_v15  ;;  %v4616_v12 = vsel %vm4108_vm5, %v4615_v28, %v4611_v57  ;;  %v4239_v19 = vsel %vm4129_vm8, %v4238_v40, %v4234_v43 }
 0x22e   :  { %v3725_v38 = vmul.f32 %v6699_v44, %v3590_v6  ;;  %v3523_v9 = vpop.f32.mrf.mxu1  ;;  %v3849_v59 = vpop.xlane.xlu1 %3848  ;;  %v4621_v55 = vsel %vm4115_vm6, %v4620_v22, %v4616_v12  ;;  %v4640_v58 = vrot.slane %v6766_v3, %v6504_v1  ;;  %v4645_v36 = vrot.slane %v3975_v16, %v6507_v15 }
 0x22f   :  { %v3788_v7 = vmul.f32 %v6699_v44, %v3653_v18  ;;  %v3524_v33 = vadd.f32 %v6675_v31, %v3523_v9  ;;  %v4243_v31 = vrot.slane %v6727_v21, %v6499_v63  ;;  %v4258_v24 = vrot.slane %v3849_v59, %v6527_v46 }
 0x230   :  { %v3525_v2 = vpop.f32.mrf.mxu1  ;;  %3916 = vadd.xlane.f32.xlu1 %v3725_v38  ;;  %v4626_v61 = vsel %vm4122_vm7, %v4625_v17, %v4621_v55 }
 0x231   :  { %v3654_v14 = vmax.f32 %v3524_v33, 0.0  ;;  %4042 = vadd.xlane.f32.xlu0 %v3788_v7  ;;  %v3851_v35 = vpop.xlane.xlu0 %3850  ;;  %v4244_v10 = vsel %vm4136_vm9, %v4243_v31, %v4239_v19  ;;  %v4631_v47 = vsel %vm4129_vm8, %v4630_v29, %v4626_v61 }
 0x232   :  { %v3977_v0 = vpop.xlane.xlu1 %3976  ;;  %v4249_v6 = vsel %vm4143_vm10, %v4248_v8, %v4244_v10  ;;  %v4636_v45 = vsel %vm4136_vm9, %v4635_v50, %v4631_v47 }
 0x233   :  { %v3789_v21 = vmul.f32 %v6699_v44, %v3654_v14  ;;  %v4263_v44 = vrot.slane %v3851_v35, %v6553_v30  ;;  %v4254_v53 = vsel %vm4150_vm11, %v4253_v13, %v4249_v6  ;;  %v4650_v62 = vrot.slane %v3977_v0, %v6527_v46 }
 0x234   :  { %v4641_v9 = vsel %vm4143_vm10, %v4640_v58, %v4636_v45 }
 0x235   :  { %4012 = vadd.xlane.f32.xlu0 %v3773_v39  ;;  %4044 = vadd.xlane.f32.xlu1 %v3789_v21  ;;  %v3979_v34 = vpop.xlane.xlu0 %3978  ;;  %v4259_v39 = vsel %vm4157_vm12, %v4258_v24, %v4254_v53  ;;  %v4646_v25 = vsel %vm4150_vm11, %v4645_v36, %v4641_v9 }
 0x236   :  { %v3853_v18 = vpop.xlane.xlu1 %3852  ;;  %v4264_v3 = vsel %vm4164_vm13, %v4263_v44, %v4259_v39  ;;  %v4655_v38 = vrot.slane %v3979_v34, %v6553_v30  ;;  %v4651_v33 = vsel %vm4157_vm12, %v4650_v62, %v4646_v25 }
 0x237   :  { %v4268_v60 = vrot.slane %v3853_v18, %v6611_v11 }
 0x238   :  { %v4656_v52 = vsel %vm4164_vm13, %v4655_v38, %v4651_v33 }
 0x239   :  { %v4269_v23 = vsel %vm4171_vm14, %v4268_v60, %v4264_v3  ;;  %v3855_v16 = vpop.xlane.xlu0 %3854 }
 0x23a   :  { %4271 = vst [vmem:[#allocation8 + $0x1] ss:$8 sm:$0x1] %v4269_v23  ;;  %v3981_v7 = vpop.xlane.xlu1 %3980  ;;  %v4292_v3 = vrot.slane %v3855_v16, %v6441_v51 }
 0x23b   :  { %v4660_v59 = vrot.slane %v3981_v7, %v6611_v11 }
 0x23d   :  { %v4661_v5 = vsel %vm4171_vm14, %v4660_v59, %v4656_v52  ;;  %v3983_v28 = vpop.xlane.xlu0 %3982 }
 0x23e   :  { %4663 = vst [vmem:[#allocation8 + $0x5] ss:$8 sm:$0x1] %v4661_v5  ;;  %v3857_v40 = vpop.xlane.xlu1 %3856  ;;  %v4684_v27 = vrot.slane %v3983_v28, %v6441_v51 }
 0x23f   :  { %v4296_v47 = vrot.slane %v3857_v40, %v6444_v56 }
 0x241   :  { %v3859_v2 = vpop.xlane.xlu0 %3858  ;;  %v4297_v23 = vsel %vm4073_vm0, %v4296_v47, %v4292_v3 }
 0x242   :  { %v3985_v32 = vpop.xlane.xlu1 %3984  ;;  %v4301_v60 = vrot.slane %v3859_v2, %v6447_v4 }
 0x243   :  { %v4688_v31 = vrot.slane %v3985_v32, %v6444_v56 }
 0x244   :  { %v4302_v7 = vsel %vm4080_vm1, %v4301_v60, %v4297_v23 }
 0x245   :  { %v4689_v14 = vsel %vm4073_vm0, %v4688_v31, %v4684_v27  ;;  %v3987_v57 = vpop.xlane.xlu0 %3986 }
 0x246   :  { %v4693_v26 = vrot.slane %v3987_v57, %v6447_v4  ;;  %v3861_v22 = vpop.xlane.xlu1 %3860 }
 0x247   :  { %v4306_v38 = vrot.slane %v3861_v22, %v6461_v37 }
 0x248   :  { %v4694_v8 = vsel %vm4080_vm1, %v4693_v26, %v4689_v14 }
 0x249   :  { %v3989_v35 = vpop.xlane.xlu0 %3988  ;;  %v4307_v52 = vsel %vm4087_vm2, %v4306_v38, %v4302_v7 }
 0x24a   :  { %v4698_v43 = vrot.slane %v3989_v35, %v6461_v37  ;;  %v3991_v17 = vpop.xlane.xlu1 %3990 }
 0x24b   :  { %v4703_v21 = vrot.slane %v3991_v17, %v6467_v41 }
 0x24c   :  { %v4699_v13 = vsel %vm4087_vm2, %v4698_v43, %v4694_v8 }
 0x24d   :  { %v4704_v0 = vsel %vm4094_vm3, %v4703_v21, %v4699_v13  ;;  %v3863_v12 = vpop.xlane.xlu0 %3862 }
 0x24e   :  { %v3865_v19 = vpop.xlane.xlu1 %3864  ;;  %v4311_v9 = vrot.slane %v3863_v12, %v6467_v41 }
 0x24f   :  { %v4316_v5 = vrot.slane %v3865_v19, %v6475_v42 }
 0x250   :  { %v4312_v16 = vsel %vm4094_vm3, %v4311_v9, %v4307_v52 }
 0x251   :  { %v3993_v29 = vpop.xlane.xlu0 %3992  ;;  %v4317_v14 = vsel %vm4101_vm4, %v4316_v5, %v4312_v16 }
 0x252   :  { %v4708_v24 = vrot.slane %v3993_v29, %v6475_v42  ;;  %v3995_v10 = vpop.xlane.xlu1 %3994 }
 0x253   :  { %v4713_v50 = vrot.slane %v3995_v10, %v6482_v49 }
 0x254   :  { %v4709_v44 = vsel %vm4101_vm4, %v4708_v24, %v4704_v0 }
 0x255   :  { %v4714_v55 = vsel %vm4108_vm5, %v4713_v50, %v4709_v44  ;;  %v3867_v6 = vpop.xlane.xlu0 %3866 }
 0x256   :  { %v3869_v58 = vpop.xlane.xlu1 %3868  ;;  %v4321_v40 = vrot.slane %v3867_v6, %v6482_v49 }
 0x257   :  { %v4326_v57 = vrot.slane %v3869_v58, %v6487_v48 }
 0x258   :  { %v4322_v26 = vsel %vm4108_vm5, %v4321_v40, %v4317_v14 }
 0x259   :  { %v3997_v34 = vpop.xlane.xlu0 %3996  ;;  %v4327_v17 = vsel %vm4115_vm6, %v4326_v57, %v4322_v26 }
 0x25a   :  { %v4718_v61 = vrot.slane %v3997_v34, %v6487_v48  ;;  %v3999_v53 = vpop.xlane.xlu1 %3998 }
 0x25b   :  { %v4723_v36 = vrot.slane %v3999_v53, %v6490_v20 }
 0x25c   :  { %v4719_v18 = vsel %vm4115_vm6, %v4718_v61, %v4714_v55 }
 0x25d   :  { %v4724_v39 = vsel %vm4122_vm7, %v4723_v36, %v4719_v18  ;;  %v3871_v62 = vpop.xlane.xlu0 %3870 }
 0x25e   :  { %v3873_v45 = vpop.xlane.xlu1 %3872  ;;  %v4331_v22 = vrot.slane %v3871_v62, %v6490_v20 }
 0x25f   :  { %v4336_v21 = vrot.slane %v3873_v45, %v6493_v54 }
 0x260   :  { %v4332_v0 = vsel %vm4122_vm7, %v4331_v22, %v4327_v17 }
 0x261   :  { %v4001_v25 = vpop.xlane.xlu0 %4000  ;;  %v4337_v50 = vsel %vm4129_vm8, %v4336_v21, %v4332_v0 }
 0x262   :  { %v4728_v33 = vrot.slane %v4001_v25, %v6493_v54  ;;  %v4003_v59 = vpop.xlane.xlu1 %4002 }
 0x263   :  { %v4733_v28 = vrot.slane %v4003_v59, %v6499_v63 }
 0x264   :  { %v4729_v2 = vsel %vm4129_vm8, %v4728_v33, %v4724_v39 }
 0x265   :  { %v4734_v32 = vsel %vm4136_vm9, %v4733_v28, %v4729_v2  ;;  %v3875_v27 = vpop.xlane.xlu0 %3874 }
 0x266   :  { %v3877_v31 = vpop.xlane.xlu1 %3876  ;;  %v4341_v12 = vrot.slane %v3875_v27, %v6499_v63 }
 0x267   :  { %v4346_v44 = vrot.slane %v3877_v31, %v6504_v1 }
 0x268   :  { %v4342_v55 = vsel %vm4136_vm9, %v4341_v12, %v4337_v50 }
 0x269   :  { %v4005_v8 = vpop.xlane.xlu0 %4004  ;;  %v4347_v53 = vsel %vm4143_vm10, %v4346_v44, %v4342_v55 }
 0x26a   :  { %v4738_v35 = vrot.slane %v4005_v8, %v6504_v1  ;;  %v4007_v43 = vpop.xlane.xlu1 %4006 }
 0x26b   :  { %v4743_v13 = vrot.slane %v4007_v43, %v6507_v15 }
 0x26c   :  { %v4739_v19 = vsel %vm4143_vm10, %v4738_v35, %v4734_v32 }
 0x26d   :  { %v4744_v29 = vsel %vm4150_vm11, %v4743_v13, %v4739_v19  ;;  %v3879_v24 = vpop.xlane.xlu0 %3878 }
 0x26e   :  { %v3881_v10 = vpop.xlane.xlu1 %3880  ;;  %v4351_v6 = vrot.slane %v3879_v24, %v6507_v15 }
 0x26f   :  { %v4356_v36 = vrot.slane %v3881_v10, %v6527_v46 }
 0x270   :  { %v4352_v47 = vsel %vm4150_vm11, %v4351_v6, %v4347_v53 }
 0x271   :  { %v4009_v58 = vpop.xlane.xlu0 %4008  ;;  %v4357_v38 = vsel %vm4157_vm12, %v4356_v36, %v4352_v47 }
 0x272   :  { %v4748_v34 = vrot.slane %v4009_v58, %v6527_v46  ;;  %v4011_v61 = vpop.xlane.xlu1 %4010 }
 0x273   :  { %v4753_v18 = vrot.slane %v4011_v61, %v6553_v30 }
 0x274   :  { %v4749_v39 = vsel %vm4157_vm12, %v4748_v34, %v4744_v29 }
 0x275   :  { %v6896_v62 = vsel %vm4164_vm13, %v4753_v18, %v4749_v39  ;;  %v3883_v60 = vpop.xlane.xlu0 %3882 }
 0x276   :  { %v4361_v45 = vrot.slane %v3883_v60, %v6553_v30  ;;  %v3885_v3 = vpop.xlane.xlu1 %3884 }
 0x277   :  { %v4366_v9 = vrot.slane %v3885_v3, %v6611_v11 }
 0x278   :  { %v4362_v23 = vsel %vm4164_vm13, %v4361_v45, %v4357_v38 }
 0x279   :  { %v4367_v25 = vsel %vm4171_vm14, %v4366_v9, %v4362_v23  ;;  %v3887_v7 = vpop.xlane.xlu0 %3886 }
 0x27a   :  { %4369 = vst [vmem:[#allocation8 + $0x2] ss:$8 sm:$0x1] %v4367_v25  ;;  %v4390_v0 = vrot.slane %v3887_v7, %v6441_v51 }
 0x27c   :  { %v3889_v33 = vpop.xlane.xlu1 %3888 }
 0x27d   :  { %v4015_v59 = vpop.xlane.xlu0 %4014  ;;  %v4394_v43 = vrot.slane %v3889_v33, %v6444_v56 }
 0x27e   :  { %v4782_v34 = vrot.slane %v4015_v59, %v6441_v51 }
 0x27f   :  { %v4395_v19 = vsel %vm4073_vm0, %v4394_v43, %v4390_v0 }
 0x280   :  { %v4017_v52 = vpop.xlane.xlu1 %4016 }
 0x281   :  { %v3891_v5 = vpop.xlane.xlu0 %3890  ;;  %v4786_v24 = vrot.slane %v4017_v52, %v6444_v56 }
 0x282   :  { %v4399_v21 = vrot.slane %v3891_v5, %v6447_v4 }
 0x283   :  { %v4787_v53 = vsel %vm4073_vm0, %v4786_v24, %v4782_v34 }
 0x284   :  { %v4019_v28 = vpop.xlane.xlu1 %4018  ;;  %v4400_v29 = vsel %vm4080_vm1, %v4399_v21, %v4395_v19 }
 0x285   :  { %v4791_v55 = vrot.slane %v4019_v28, %v6447_v4 }
 0x287   :  { %v4792_v47 = vsel %vm4080_vm1, %v4791_v55, %v4787_v53 }
 0x288   :  { %v3895_v16 = vpop.xlane.xlu0 %3894  ;;  %v3893_v40 = vpop.xlane.xlu1 %3892 }
 0x289   :  { %v4404_v12 = vrot.slane %v3893_v40, %v6461_v37  ;;  %v4409_v10 = vrot.slane %v3895_v16, %v6467_v41 }
 0x28b   :  { %v4405_v6 = vsel %vm4087_vm2, %v4404_v12, %v4400_v29 }
 0x28c   :  { %v4023_v2 = vpop.xlane.xlu0 %4022  ;;  %v4021_v32 = vpop.xlane.xlu1 %4020  ;;  %v4410_v56 = vsel %vm4094_vm3, %v4409_v10, %v4405_v6 }
 0x28d   :  { %v4796_v61 = vrot.slane %v4021_v32, %v6461_v37  ;;  %v4801_v39 = vrot.slane %v4023_v2, %v6467_v41 }
 0x28f   :  { %v4797_v45 = vsel %vm4087_vm2, %v4796_v61, %v4792_v47 }
 0x290   :  { %v3899_v27 = vpop.xlane.xlu0 %3898  ;;  %v3897_v31 = vpop.xlane.xlu1 %3896  ;;  %v4802_v25 = vsel %vm4094_vm3, %v4801_v39, %v4797_v45 }
 0x291   :  { %v4414_v58 = vrot.slane %v3897_v31, %v6475_v42  ;;  %v4419_v36 = vrot.slane %v3899_v27, %v6482_v49 }
 0x293   :  { %v4415_v4 = vsel %vm4101_vm4, %v4414_v58, %v4410_v56 }
 0x294   :  { %v4027_v14 = vpop.xlane.xlu0 %4026  ;;  %v4025_v57 = vpop.xlane.xlu1 %4024  ;;  %v4420_v38 = vsel %vm4108_vm5, %v4419_v36, %v4415_v4 }
 0x295   :  { %v4806_v51 = vrot.slane %v4025_v57, %v6475_v42  ;;  %v4811_v23 = vrot.slane %v4027_v14, %v6482_v49 }
 0x297   :  { %v4807_v33 = vsel %vm4101_vm4, %v4806_v51, %v4802_v25 }
 0x298   :  { %v3903_v26 = vpop.xlane.xlu0 %3902  ;;  %v3901_v22 = vpop.xlane.xlu1 %3900  ;;  %v4812_v49 = vsel %vm4108_vm5, %v4811_v23, %v4807_v33 }
 0x299   :  { %v4424_v60 = vrot.slane %v3901_v22, %v6487_v48  ;;  %v4429_v3 = vrot.slane %v3903_v26, %v6490_v20 }
 0x29b   :  { %v4425_v41 = vsel %vm4115_vm6, %v4424_v60, %v4420_v38 }
 0x29c   :  { %v4031_v8 = vpop.xlane.xlu0 %4030  ;;  %v4029_v35 = vpop.xlane.xlu1 %4028  ;;  %v4430_v52 = vsel %vm4122_vm7, %v4429_v3, %v4425_v41 }
 0x29d   :  { %v4816_v59 = vrot.slane %v4029_v35, %v6487_v48  ;;  %v4821_v16 = vrot.slane %v4031_v8, %v6490_v20 }
 0x29f   :  { %v4817_v32 = vsel %vm4115_vm6, %v4816_v59, %v4812_v49 }
 0x2a0   :  { %v3907_v17 = vpop.xlane.xlu0 %3906  ;;  %v3905_v13 = vpop.xlane.xlu1 %3904  ;;  %v4822_v26 = vsel %vm4122_vm7, %v4821_v16, %v4817_v32 }
 0x2a1   :  { %v4434_v7 = vrot.slane %v3905_v13, %v6493_v54  ;;  %v4439_v42 = vrot.slane %v3907_v17, %v6499_v63 }
 0x2a3   :  { %v4435_v40 = vsel %vm4129_vm8, %v4434_v7, %v4430_v52 }
 0x2a4   :  { %v4035_v50 = vpop.xlane.xlu0 %4034  ;;  %v4033_v44 = vpop.xlane.xlu1 %4032  ;;  %v4440_v31 = vsel %vm4136_vm9, %v4439_v42, %v4435_v40 }
 0x2a5   :  { %v4826_v27 = vrot.slane %v4033_v44, %v6493_v54  ;;  %v4831_v57 = vrot.slane %v4035_v50, %v6499_v63 }
 0x2a7   :  { %v4827_v8 = vsel %vm4129_vm8, %v4826_v27, %v4822_v26 }
 0x2a8   :  { %v3909_v18 = vpop.xlane.xlu1 %3908  ;;  %v3911_v37 = vpop.xlane.xlu0 %3910  ;;  %v4832_v13 = vsel %vm4136_vm9, %v4831_v57, %v4827_v8 }
 0x2a9   :  { %v4444_v2 = vrot.slane %v3909_v18, %v6504_v1  ;;  %v4449_v48 = vrot.slane %v3911_v37, %v6507_v15 }
 0x2ab   :  { %v4445_v20 = vsel %vm4143_vm10, %v4444_v2, %v4440_v31 }
 0x2ac   :  { %v4037_v9 = vpop.xlane.xlu1 %4036  ;;  %v4450_v17 = vsel %vm4150_vm11, %v4449_v48, %v4445_v20 }
 0x2ad   :  { %v4836_v35 = vrot.slane %v4037_v9, %v6504_v1 }
 0x2ae   :  { %v4039_v5 = vpop.xlane.xlu0 %4038 }
 0x2af   :  { %v4841_v21 = vrot.slane %v4039_v5, %v6507_v15  ;;  %v4837_v0 = vsel %vm4143_vm10, %v4836_v35, %v4832_v13 }
 0x2b0   :  { %v3913_v28 = vpop.xlane.xlu1 %3912 }
 0x2b1   :  { %v4454_v22 = vrot.slane %v3913_v28, %v6527_v46  ;;  %v4842_v50 = vsel %vm4150_vm11, %v4841_v21, %v4837_v0 }
 0x2b3   :  { %v4455_v63 = vsel %vm4157_vm12, %v4454_v22, %v4450_v17 }
 0x2b4   :  { %v4041_v14 = vpop.xlane.xlu1 %4040 }
 0x2b5   :  { %v3915_v43 = vpop.xlane.xlu0 %3914  ;;  %v4846_v12 = vrot.slane %v4041_v14, %v6527_v46 }
 0x2b6   :  { %v4459_v54 = vrot.slane %v3915_v43, %v6553_v30 }
 0x2b7   :  { %v4847_v44 = vsel %vm4157_vm12, %v4846_v12, %v4842_v50 }
 0x2b8   :  { %v4460_v1 = vsel %vm4164_vm13, %v4459_v54, %v4455_v63 }
 0x2b9   :  { %v3917_v19 = vpop.xlane.xlu1 %3916 }
 0x2ba   :  { %v4043_v29 = vpop.xlane.xlu0 %4042  ;;  %v4464_v24 = vrot.slane %v3917_v19, %v6611_v11 }
 0x2bb   :  { %v4851_v10 = vrot.slane %v4043_v29, %v6553_v30 }
 0x2bc   :  { %v4465_v15 = vsel %vm4171_vm14, %v4464_v24, %v4460_v1 }
 0x2bd   :  { %4467 = vst [vmem:[#allocation8 + $0x3] ss:$8 sm:$0x1] %v4465_v15  ;;  %v4852_v34 = vsel %vm4164_vm13, %v4851_v10, %v4847_v44 }
 0x2be   :  { %v4013_v55 = vpop.xlane.xlu0 %4012  ;;  %v4045_v6 = vpop.xlane.xlu1 %4044 }
 0x2bf   :  { %v4758_v46 = vrot.slane %v4013_v55, %v6611_v11  ;;  %v4856_v58 = vrot.slane %v4045_v6, %v6611_v11 }
 0x2c1   :  { %v4759_v30 = vsel %vm4171_vm14, %v4758_v46, %v6896_v62  ;;  %v4857_v61 = vsel %vm4171_vm14, %v4856_v58, %v4852_v34 }
 0x2c2   :  { %4761 = vst [vmem:[#allocation8 + $0x6] ss:$8 sm:$0x1] %v4759_v30  ;;  %4859 = vst [vmem:[#allocation8 + $0x7] ss:$8 sm:$0x1] %v4857_v61 }
 0x2c3   :  { %5080 = shalt.err (!%p5077_p5)
}
 0x2c4   :  { %4870 = dma.vmem_to_hbm [thread:$0]  %s4868_s20, 128, %s6976_s5, [#allocation4]  }
 0x2c5   :  { %5093 = dma.done.wait [#allocation4], 128  }
 0x2c6   :  { %5094 = vsyncadd [#allocation4], 4294967168 }
 0x2c7   :  { %4874 = vsyncpa [#allocation3], 1 }
 0x2c8   :  { %4875 = vsyncpa [#allocation6], 1 }
 0x2c9   :  { %4876 = vsyncpa [#allocation4], 1 }

</bundles_post_ra>
